<compile_context>
chip_gen: v7x
topology: tpu7x:2x2x1
jax: 0.10.0
libtpu: 0.0.40
codegen_flags: <defaults>
</compile_context>

<pallas_src>
import numpy as np
import jax
import jax.numpy as jnp
from jax import lax
from jax.experimental import pallas as pl
from jax.experimental.pallas import tpu as pltpu

F32 = jnp.float32
BF16 = jnp.bfloat16
BN_EPS = 1e-5

IMG = 28
H1, H2, H3 = 14, 7, 5                  # 28 -> 14 -> 7 -> 5 (encoder spatial)
R1, R2, R3 = H1 * H1, H2 * H2, H3 * H3  # 196, 49, 25


# ----------------------------- constant spatial operators (numpy, built once) ---

def _conv_sel(h_in, w_in, h_out, w_out, stride, pad):
    """Per-tap 0/1 selection S[t, p_in, p_out]: conv tap (kh,kw) reads input
    pixel (o*stride - pad + k) for output pixel o (cross-correlation)."""
    sel = np.zeros((9, h_in * w_in, h_out * w_out), np.float32)
    for kh in range(3):
        for kw in range(3):
            t = kh * 3 + kw
            for oi in range(h_out):
                for oj in range(w_out):
                    mi = oi * stride - pad + kh
                    mj = oj * stride - pad + kw
                    if 0 <= mi < h_in and 0 <= mj < w_in:
                        sel[t, mi * w_in + mj, oi * w_out + oj] = 1.0
    return sel


def _convT_sel(h_in, w_in, h_out, w_out, stride, pad):
    """Per-tap selection for ConvTranspose2d: o = m*stride - pad + k."""
    sel = np.zeros((9, h_in * w_in, h_out * w_out), np.float32)
    for kh in range(3):
        for kw in range(3):
            t = kh * 3 + kw
            for oi in range(h_out):
                for oj in range(w_out):
                    ti, tj = oi + pad - kh, oj + pad - kw
                    if ti % stride or tj % stride:
                        continue
                    mi, mj = ti // stride, tj // stride
                    if 0 <= mi < h_in and 0 <= mj < w_in:
                        sel[t, mi * w_in + mj, oi * w_out + oj] = 1.0
    return sel


def _shift_sel(h, w, dh, dw):
    """S[p_in, p_out] = 1 iff p_in = (i_out+dh, j_out+dw) (zero at border)."""
    s = np.zeros((h * w, h * w), np.float32)
    for i in range(h):
        for j in range(w):
            si, sj = i + dh, j + dw
            if si < h and sj < w:
                s[si * w + sj, i * w + j] = 1.0
    return s


def _dec3_plane_weights(w3_convT):
    """Fold the last ConvTranspose(8->1, k3, s2, p1, op1) weights into per
    shift-class, per parity-plane (2x2) row vectors: A[class, plane, cin]."""
    cin = w3_convT.shape[0]
    wtaps = w3_convT.transpose(2, 3, 0, 1).reshape(9, cin)       # [t, cin]
    classes = [(0, 0), (0, 1), (1, 0), (1, 1)]
    msel = np.zeros((4, 4, 9), np.float32)                       # [class, plane, tap]
    for a in (0, 1):
        for b in (0, 1):
            p = a * 2 + b
            for kh in ([1] if a == 0 else [0, 2]):
                for kw in ([1] if b == 0 else [0, 2]):
                    dh = 1 if kh == 0 else 0
                    dw = 1 if kw == 0 else 0
                    msel[classes.index((dh, dw)), p, kh * 3 + kw] = 1.0
    return np.einsum("cpt,tk->cpk", msel, wtaps)                 # (4, 4, cin)


# ----------------------------- parameter preparation (outside jit, once) --------

def prepare_inputs(params):
    """All weight reshapes, BN folding and spatial-selection constants, done once."""
    enc, up, dec = params["enc"], params["up"], params["dec"]
    proto = np.asarray(params["protolayer"], np.float32)          # (P, d, 1, 1)
    n_proto, d = proto.shape[0], proto.shape[1]
    ud = up["w"].shape[2]                                         # 5

    def fold(bn, bias):
        s = np.asarray(bn["gamma"], np.float32) / np.sqrt(np.asarray(bn["var"], np.float32) + BN_EPS)
        b = np.asarray(bn["beta"], np.float32) + s * (np.asarray(bias, np.float32) - np.asarray(bn["mean"], np.float32))
        return s, b

    # encoder (HWIO weights)
    w1 = np.asarray(enc["w1"], np.float32).reshape(9, 8).T                      # (8, 9)
    b1 = np.asarray(enc["b1"], np.float32).reshape(8, 1)

    s2f, b2f = fold(enc["bn2"], enc["b2"])
    w2t = np.asarray(enc["w2"], np.float32).transpose(0, 1, 3, 2).reshape(9, 16, 8) * s2f[None, :, None]
    b2 = b2f.reshape(16, 1)

    w3t = np.asarray(enc["w3"], np.float32).transpose(0, 1, 3, 2).reshape(9, d, 16)
    b3 = np.asarray(enc["b3"], np.float32).reshape(d, 1)

    # prototypes
    proto_flat = proto.reshape(n_proto, d)
    p2 = np.sum(proto_flat ** 2, axis=1, keepdims=True)                         # (P, 1)

    # up layer: ConvTranspose on a 1x1 input == matmul; rows ordered (q, c')
    suf, buf = fold(up["bn"], up["b"])
    wupT = np.asarray(up["w"], np.float32).transpose(2, 3, 1, 0).reshape(ud * ud * d, d)
    wupT = wupT * np.tile(suf, ud * ud)[:, None]
    bup = np.tile(buf, ud * ud).reshape(ud * ud * d, 1)

    # decoder (torch ConvTranspose layout (Cin, Cout, kh, kw))
    sd1f, bd1f = fold(dec["bn1"], dec["b1"])
    wd1t = np.asarray(dec["w1"], np.float32).transpose(2, 3, 1, 0).reshape(9, 16, d) * sd1f[None, :, None]
    bd1 = bd1f.reshape(16, 1)

    sd2f, bd2f = fold(dec["bn2"], dec["b2"])
    wd2t = np.asarray(dec["w2"], np.float32).transpose(2, 3, 1, 0).reshape(9, 8, 16) * sd2f[None, :, None]
    bd2 = bd2f.reshape(8, 1)

    a3 = _dec3_plane_weights(np.asarray(dec["w3"], np.float32))                  # (4, 4, 8)
    bd3 = np.asarray(dec["b3"], np.float32).reshape(1, 1)

    # spatial selection operators (per image)
    s2sel = _conv_sel(H1, H1, H2, H2, 2, 1)
    s3sel = _conv_sel(H2, H2, H3, H3, 1, 0)
    sd1sel = _convT_sel(H3, H3, H2, H2, 1, 0)
    sd2sel = _convT_sel(H2, H2, H1, H1, 2, 1)
    shifts = np.stack([_shift_sel(H1, H1, 0, 1),
                       _shift_sel(H1, H1, 1, 0),
                       _shift_sel(H1, H1, 1, 1)])                                # (3, 196, 196)

    bf = lambda a: jnp.asarray(a, BF16)
    f32 = lambda a: jnp.asarray(a, F32)
    return (bf(w1), f32(b1),
            bf(s2sel), bf(w2t), f32(b2),
            bf(s3sel), bf(w3t), f32(b3),
            bf(proto_flat), f32(p2), bf(proto_flat.T),
            bf(wupT), f32(bup),
            bf(sd1sel), bf(wd1t), f32(bd1),
            bf(sd2sel), bf(wd2t), f32(bd2),
            bf(shifts), bf(a3), f32(bd3))


# ----------------------------- fused Pallas kernel -------------------------------

def _conv_block(inT, s_ref, w_ref, b_ref, relu=True):
    """conv / transposed-conv in transposed layout: out(Cout,Rout) =
    sum_t W[t] @ (inT @ S[t]) + b, with f32 accumulation."""
    x = inT.astype(BF16)
    n_taps, cout, _ = w_ref.shape
    r_out = s_ref.shape[2]
    acc = jnp.zeros((cout, r_out), F32)
    for t in range(n_taps):
        sel = jnp.dot(x, s_ref[t], preferred_element_type=F32).astype(BF16)
        acc = acc + jnp.dot(w_ref[t], sel, preferred_element_type=F32)
    y = acc + b_ref[...]
    return jnp.maximum(y, 0.0) if relu else y


def _fused_kernel(p1_ref,
                  w1_ref, b1_ref,
                  s2_ref, w2_ref, b2_ref,
                  s3_ref, w3_ref, b3_ref,
                  proto_ref, p2_ref, protoT_ref,
                  wup_ref, bup_ref,
                  sd1_ref, wd1_ref, bd1_ref,
                  sd2_ref, wd2_ref, bd2_ref,
                  shift_ref, a3_ref, bd3_ref,
                  out_ref, mind_ref):
    # ---- encoder ----
    h1 = jnp.dot(w1_ref[...], p1_ref[0], preferred_element_type=F32) + b1_ref[...]
    h1 = jnp.maximum(h1, 0.0)                                     # (8, 196)
    h2 = _conv_block(h1, s2_ref, w2_ref, b2_ref)                  # (16, 49)
    enc = _conv_block(h2, s3_ref, w3_ref, b3_ref)                 # (d, 25)
    d = enc.shape[0]

    # ---- prototype head: L2 distances to 1x1 prototypes, min over space ----
    x2 = jnp.sum(enc * enc, axis=0, keepdims=True)                # (1, 25)
    xp = jnp.dot(proto_ref[...], enc.astype(BF16), preferred_element_type=F32)  # (P, 25)
    dist = jnp.maximum(x2 - 2.0 * xp + p2_ref[...], 0.0)
    mind = jnp.min(dist, axis=1, keepdims=True)                   # (P, 1)
    mind_ref[0] = mind

    # distance_2_similarity('linear') + softmax over prototypes
    sim = -mind
    sim = sim - jnp.max(sim, axis=0, keepdims=True)
    es = jnp.exp(sim)
    sm = es / jnp.sum(es, axis=0, keepdims=True)                  # (P, 1)
    z = jnp.dot(protoT_ref[...], sm.astype(BF16), preferred_element_type=F32)   # (d, 1)

    # ---- up layer (ConvTranspose on 1x1 input == matmul) + BN + ReLU ----
    zup = jnp.dot(wup_ref[...], z.astype(BF16), preferred_element_type=F32) + bup_ref[...]
    zup = jnp.maximum(zup, 0.0)                                   # (25*d, 1), rows (q, c')
    upq = zup.shape[0] // d                                       # 25

    # relayout (q, c') rows -> (c', q) columns (800 elements; pure VPU select)
    col = lax.broadcasted_iota(jnp.int32, (d, upq), 1)
    zupT = jnp.zeros((d, upq), F32)
    for q in range(upq):
        zupT = zupT + jnp.where(col == q, zup[q * d:(q + 1) * d, :], 0.0)

    # ---- decoder ----
    y1 = _conv_block(zupT, sd1_ref, wd1_ref, bd1_ref)             # (16, 49)
    y2 = _conv_block(y1, sd2_ref, wd2_ref, bd2_ref)               # (8, 196)

    # last ConvTranspose(8->1, s2) as 4 lane-dense parity planes + sigmoid
    y2b = y2.astype(BF16)
    shifted = [y2b]
    for c in range(shift_ref.shape[0]):
        shifted.append(jnp.dot(y2b, shift_ref[c], preferred_element_type=F32).astype(BF16))
    planes = jnp.zeros((a3_ref.shape[1], y2.shape[1]), F32)       # (4, 196)
    for c in range(a3_ref.shape[0]):
        planes = planes + jnp.dot(a3_ref[c], shifted[c], preferred_element_type=F32)
    planes = planes + bd3_ref[...]
    out_ref[0] = 1.0 / (1.0 + jnp.exp(-planes))


# ----------------------------- forward (Pallas path) -----------------------------

def _const_spec(a):
    nd = a.ndim

    def imap(n):
        return (0,) * nd

    return pl.BlockSpec(a.shape, imap)


def proto_autoencoder_forward(x_nchw, prep):
    n = x_nchw.shape[0]
    n_proto = prep[8].shape[0]

    # conv1 im2col on the raw input only (input must be read from HBM anyway)
    x = x_nchw[:, 0, :, :].astype(F32)                            # (N, 28, 28)
    xpad = jnp.pad(x, ((0, 0), (1, 1), (1, 1)))
    taps = [xpad[:, kh:kh + IMG:2, kw:kw + IMG:2]
            for kh in range(3) for kw in range(3)]
    p1T = jnp.stack(taps, axis=1).reshape(n, 9, R1).astype(BF16)  # (N, 9, 196)

    in_specs = [pl.BlockSpec((1, 9, R1), lambda i: (i, 0, 0))] + [_const_spec(a) for a in prep]
    out_planes, min_d = pl.pallas_call(
        _fused_kernel,
        grid=(n,),
        in_specs=in_specs,
        out_specs=(pl.BlockSpec((1, 4, R1), lambda i: (i, 0, 0)),
                   pl.BlockSpec((1, n_proto, 1), lambda i: (i, 0, 0))),
        out_shape=(jax.ShapeDtypeStruct((n, 4, R1), F32),
                   jax.ShapeDtypeStruct((n, n_proto, 1), F32)),
        compiler_params=pltpu.CompilerParams(dimension_semantics=("parallel",)),
    )(p1T, *prep)

    # interleave the 4 parity planes -> (N, 1, 28, 28)
    planes = out_planes.reshape(n, 2, 2, H1, H1)                  # (n, a, b, i, j)
    recon = planes.transpose(0, 3, 1, 4, 2).reshape(n, 1, IMG, IMG)
    return recon, min_d[:, :, 0]


# ----------------------------- pure-JAX reference -----------------------------

def _deconv_weight_hwio(w_t):
    return jnp.transpose(w_t, (2, 3, 0, 1))[::-1, ::-1, :, :]


def reference_forward(x_nchw, params):
    enc, up, dec = params["enc"], params["up"], params["dec"]
    proto = params["protolayer"]
    n_proto, d = proto.shape[0], proto.shape[1]
    x = jnp.transpose(x_nchw, (0, 2, 3, 1)).astype(F32)

    def conv(v, w_hwio, stride, pad_lo, pad_hi, lhs_dilation=1):
        return lax.conv_general_dilated(
            v.astype(BF16), w_hwio.astype(BF16), (stride, stride),
            ((pad_lo, pad_hi), (pad_lo, pad_hi)),
            lhs_dilation=(lhs_dilation, lhs_dilation),
            dimension_numbers=("NHWC", "HWIO", "NHWC"),
            preferred_element_type=F32)

    def bn(v, p):
        return (v - p["mean"]) / jnp.sqrt(p["var"] + BN_EPS) * p["gamma"] + p["beta"]

    h = jnp.maximum(conv(x, enc["w1"], 2, 1, 1) + enc["b1"], 0.0)
    h = jnp.maximum(bn(conv(h, enc["w2"], 2, 1, 1) + enc["b2"], enc["bn2"]), 0.0)
    h = jnp.maximum(conv(h, enc["w3"], 1, 0, 0) + enc["b3"], 0.0)         # (N,5,5,d)

    proto_flat = proto.reshape(n_proto, d)
    x2 = jnp.sum(h * h, axis=-1, keepdims=True)
    xp = jnp.einsum("nhwc,pc->nhwp", h.astype(BF16), proto_flat.astype(BF16),
                    preferred_element_type=F32)
    p2 = jnp.sum(proto_flat ** 2, axis=1)
    dist = jnp.maximum(x2 - 2.0 * xp + p2, 0.0)
    min_d = jnp.min(dist, axis=(1, 2))                                    # (N,P)
    sm = jax.nn.softmax(-min_d, axis=1)
    z = jnp.dot(sm.astype(BF16), proto_flat.astype(BF16), preferred_element_type=F32)

    u = jnp.einsum("nc,coij->nijo", z.astype(BF16), up["w"].astype(BF16),
                   preferred_element_type=F32) + up["b"]
    u = jnp.maximum(bn(u, up["bn"]), 0.0)                                 # (N,5,5,d)

    y = jnp.maximum(bn(conv(u, _deconv_weight_hwio(dec["w1"]), 1, 2, 2) + dec["b1"],
                       dec["bn1"]), 0.0)
    y = jnp.maximum(bn(conv(y, _deconv_weight_hwio(dec["w2"]), 1, 1, 2, 2) + dec["b2"],
                       dec["bn2"]), 0.0)
    y = jax.nn.sigmoid(conv(y, _deconv_weight_hwio(dec["w3"]), 1, 1, 2, 2) + dec["b3"])
    return jnp.transpose(y, (0, 3, 1, 2)), min_d


# ----------------------------- parameters -----------------------------

def make_params(key, *, latent_dim=16, n_prototypes=32, up_dim=5):
    def w_init(k, shape, fan_in):
        return jax.random.uniform(k, shape, F32, -1.0, 1.0) / np.sqrt(fan_in)

    def b_init(k, cout, fan_in):
        return jax.random.uniform(k, (cout,), F32, -1.0, 1.0) / np.sqrt(fan_in)

    def bn_init(k, c):
        k1, k2, k3, k4 = jax.random.split(k, 4)
        return {"gamma": jax.random.uniform(k1, (c,), F32, 0.5, 1.5),
                "beta": 0.1 * jax.random.normal(k2, (c,), F32),
                "mean": 0.1 * jax.random.normal(k3, (c,), F32),
                "var": jax.random.uniform(k4, (c,), F32, 0.5, 1.5)}

    d, p = latent_dim, n_prototypes
    ks = jax.random.split(key, 20)
    enc = {"w1": w_init(ks[0], (3, 3, 1, 8), 9), "b1": b_init(ks[1], 8, 9),
           "w2": w_init(ks[2], (3, 3, 8, 16), 72), "b2": b_init(ks[3], 16, 72),
           "bn2": bn_init(ks[4], 16),
           "w3": w_init(ks[5], (3, 3, 16, d), 144), "b3": b_init(ks[6], d, 144)}
    up = {"w": w_init(ks[7], (d, d, up_dim, up_dim), d),   # ConvTranspose (Cin,Cout,kh,kw)
          "b": b_init(ks[8], d, d),
          "bn": bn_init(ks[9], d)}
    dec = {"w1": w_init(ks[10], (d, 16, 3, 3), 9 * d), "b1": b_init(ks[11], 16, 9 * d),
           "bn1": bn_init(ks[12], 16),
           "w2": w_init(ks[13], (16, 8, 3, 3), 144), "b2": b_init(ks[14], 8, 144),
           "bn2": bn_init(ks[15], 8),
           "w3": w_init(ks[16], (8, 1, 3, 3), 72), "b3": b_init(ks[17], 1, 72)}
    protolayer = jax.random.uniform(ks[18], (p, d, 1, 1), F32)             # torch.rand
    return {"enc": enc, "up": up, "dec": dec, "protolayer": protolayer}


# ----------------------------- main -----------------------------

if __name__ == "__main__":
    key = jax.random.PRNGKey(0)
    pkey, xkey = jax.random.split(key)
    latent_dim, n_prototypes = 16, 32
    params = make_params(pkey, latent_dim=latent_dim, n_prototypes=n_prototypes)

    # MNIST-like input: batch=2, 1 channel, 28x28, NCHW as in PyTorch.
    x = jax.random.uniform(xkey, (2, 1, 28, 28), F32)

    prep = prepare_inputs(params)                     # one-time parameter prep

    fwd = jax.jit(proto_autoencoder_forward)
    out, min_d = fwd(x, prep)
    out = jax.block_until_ready(out)
    min_d = jax.block_until_ready(min_d)

    ref_out, ref_min_d = jax.jit(reference_forward)(x, params)
    ref_out = jax.block_until_ready(ref_out)
    ref_min_d = jax.block_until_ready(ref_min_d)

    assert out.shape == (2, 1, 28, 28), out.shape
    assert min_d.shape == (2, n_prototypes), min_d.shape

    if not np.allclose(np.asarray(out), np.asarray(ref_out), rtol=1e-2, atol=1e-2):
        raise AssertionError(
            "reconstruction mismatch: max abs diff = "
            f"{np.max(np.abs(np.asarray(out) - np.asarray(ref_out)))}")
    if not np.allclose(np.asarray(min_d), np.asarray(ref_min_d), rtol=2e-2, atol=2e-2):
        raise AssertionError(
            "min_distances mismatch: max abs diff = "
            f"{np.max(np.abs(np.asarray(min_d) - np.asarray(ref_min_d)))}")

    print("KERNEL_OK")
</pallas_src>

<mosaic_0001>
module attributes {stable_mosaic.version = 11 : i64} {
  func.func @_fused_kernel(%arg0: i32, %arg1: memref<1x9x196xbf16, #tpu.memory_space<vmem>>, %arg2: memref<8x9xbf16, #tpu.memory_space<vmem>>, %arg3: memref<8x1xf32, #tpu.memory_space<vmem>>, %arg4: memref<9x196x49xbf16, #tpu.memory_space<vmem>>, %arg5: memref<9x16x8xbf16, #tpu.memory_space<vmem>>, %arg6: memref<16x1xf32, #tpu.memory_space<vmem>>, %arg7: memref<9x49x25xbf16, #tpu.memory_space<vmem>>, %arg8: memref<9x16x16xbf16, #tpu.memory_space<vmem>>, %arg9: memref<16x1xf32, #tpu.memory_space<vmem>>, %arg10: memref<32x16xbf16, #tpu.memory_space<vmem>>, %arg11: memref<32x1xf32, #tpu.memory_space<vmem>>, %arg12: memref<16x32xbf16, #tpu.memory_space<vmem>>, %arg13: memref<400x16xbf16, #tpu.memory_space<vmem>>, %arg14: memref<400x1xf32, #tpu.memory_space<vmem>>, %arg15: memref<9x25x49xbf16, #tpu.memory_space<vmem>>, %arg16: memref<9x16x16xbf16, #tpu.memory_space<vmem>>, %arg17: memref<16x1xf32, #tpu.memory_space<vmem>>, %arg18: memref<9x49x196xbf16, #tpu.memory_space<vmem>>, %arg19: memref<9x8x16xbf16, #tpu.memory_space<vmem>>, %arg20: memref<8x1xf32, #tpu.memory_space<vmem>>, %arg21: memref<3x196x196xbf16, #tpu.memory_space<vmem>>, %arg22: memref<4x4x8xbf16, #tpu.memory_space<vmem>>, %arg23: memref<1x1xf32, #tpu.memory_space<vmem>>, %arg24: memref<1x4x196xf32, #tpu.memory_space<vmem>>, %arg25: memref<1x32x1xf32, #tpu.memory_space<vmem>>) attributes {dimension_semantics = [#tpu.dimension_semantics<parallel>], iteration_bounds = array<i64: 2>, scalar_prefetch = 0 : i64, scratch_operands = 0 : i64, tpu.core_type = #tpu.core_type<tc>, window_params = [{transform_indices = @transform_0, window_bounds = array<i64: 1, 9, 196>}, {pipeline_mode = #tpu.pipeline_mode<synchronous>, transform_indices = @transform_1, window_bounds = array<i64: 8, 9>}, {pipeline_mode = #tpu.pipeline_mode<synchronous>, transform_indices = @transform_2, window_bounds = array<i64: 8, 1>}, {pipeline_mode = #tpu.pipeline_mode<synchronous>, transform_indices = @transform_3, window_bounds = array<i64: 9, 196, 49>}, {pipeline_mode = #tpu.pipeline_mode<synchronous>, transform_indices = @transform_4, window_bounds = array<i64: 9, 16, 8>}, {pipeline_mode = #tpu.pipeline_mode<synchronous>, transform_indices = @transform_5, window_bounds = array<i64: 16, 1>}, {pipeline_mode = #tpu.pipeline_mode<synchronous>, transform_indices = @transform_6, window_bounds = array<i64: 9, 49, 25>}, {pipeline_mode = #tpu.pipeline_mode<synchronous>, transform_indices = @transform_7, window_bounds = array<i64: 9, 16, 16>}, {pipeline_mode = #tpu.pipeline_mode<synchronous>, transform_indices = @transform_8, window_bounds = array<i64: 16, 1>}, {pipeline_mode = #tpu.pipeline_mode<synchronous>, transform_indices = @transform_9, window_bounds = array<i64: 32, 16>}, {pipeline_mode = #tpu.pipeline_mode<synchronous>, transform_indices = @transform_10, window_bounds = array<i64: 32, 1>}, {pipeline_mode = #tpu.pipeline_mode<synchronous>, transform_indices = @transform_11, window_bounds = array<i64: 16, 32>}, {pipeline_mode = #tpu.pipeline_mode<synchronous>, transform_indices = @transform_12, window_bounds = array<i64: 400, 16>}, {pipeline_mode = #tpu.pipeline_mode<synchronous>, transform_indices = @transform_13, window_bounds = array<i64: 400, 1>}, {pipeline_mode = #tpu.pipeline_mode<synchronous>, transform_indices = @transform_14, window_bounds = array<i64: 9, 25, 49>}, {pipeline_mode = #tpu.pipeline_mode<synchronous>, transform_indices = @transform_15, window_bounds = array<i64: 9, 16, 16>}, {pipeline_mode = #tpu.pipeline_mode<synchronous>, transform_indices = @transform_16, window_bounds = array<i64: 16, 1>}, {pipeline_mode = #tpu.pipeline_mode<synchronous>, transform_indices = @transform_17, window_bounds = array<i64: 9, 49, 196>}, {pipeline_mode = #tpu.pipeline_mode<synchronous>, transform_indices = @transform_18, window_bounds = array<i64: 9, 8, 16>}, {pipeline_mode = #tpu.pipeline_mode<synchronous>, transform_indices = @transform_19, window_bounds = array<i64: 8, 1>}, {pipeline_mode = #tpu.pipeline_mode<synchronous>, transform_indices = @transform_20, window_bounds = array<i64: 3, 196, 196>}, {pipeline_mode = #tpu.pipeline_mode<synchronous>, transform_indices = @transform_21, window_bounds = array<i64: 4, 4, 8>}, {pipeline_mode = #tpu.pipeline_mode<synchronous>, transform_indices = @transform_22, window_bounds = array<i64: 1, 1>}, {transform_indices = @transform_23, window_bounds = array<i64: 1, 4, 196>}, {transform_indices = @transform_24, window_bounds = array<i64: 1, 32, 1>}]} {
    %c0 = arith.constant 0 : index
    %c0_0 = arith.constant 0 : index
    %0 = vector.load %arg2[%c0, %c0_0] : memref<8x9xbf16, #tpu.memory_space<vmem>>, vector<8x9xbf16>
    %c0_1 = arith.constant 0 : index
    %c0_2 = arith.constant 0 : index
    %c0_3 = arith.constant 0 : index
    %1 = vector.load %arg1[%c0_1, %c0_2, %c0_3] : memref<1x9x196xbf16, #tpu.memory_space<vmem>>, vector<1x9x196xbf16>
    %2 = vector.shape_cast %1 : vector<1x9x196xbf16> to vector<9x196xbf16>
    %cst = arith.constant dense<0.000000e+00> : vector<8x196xf32>
    %3 = tpu.matmul %0, %2, %cst {dimension_numbers = #tpu.dot_dimension_numbers<[1], [0], [0], [1], [0, 0, 1, 1], [], []>} : vector<8x9xbf16>, vector<9x196xbf16>, vector<8x196xf32> -> vector<8x196xf32>
    %c0_4 = arith.constant 0 : index
    %c0_5 = arith.constant 0 : index
    %4 = vector.load %arg3[%c0_4, %c0_5] : memref<8x1xf32, #tpu.memory_space<vmem>>, vector<8x1xf32>
    %5 = vector.broadcast %4 : vector<8x1xf32> to vector<8x196xf32>
    %6 = arith.addf %3, %5 : vector<8x196xf32>
    %cst_6 = arith.constant 0.000000e+00 : f32
    %7 = vector.broadcast %cst_6 : f32 to vector<8x196xf32>
    %8 = arith.maximumf %6, %7 : vector<8x196xf32>
    %9 = arith.truncf %8 : vector<8x196xf32> to vector<8x196xbf16>
    %cst_7 = arith.constant 0.000000e+00 : f32
    %10 = vector.broadcast %cst_7 : f32 to vector<16x49xf32>
    %c0_8 = arith.constant 0 : index
    %c0_9 = arith.constant 0 : index
    %c0_10 = arith.constant 0 : index
    %11 = vector.load %arg4[%c0_8, %c0_9, %c0_10] : memref<9x196x49xbf16, #tpu.memory_space<vmem>>, vector<1x196x49xbf16>
    %12 = vector.shape_cast %11 : vector<1x196x49xbf16> to vector<196x49xbf16>
    %cst_11 = arith.constant dense<0.000000e+00> : vector<8x49xf32>
    %13 = tpu.matmul %9, %12, %cst_11 {dimension_numbers = #tpu.dot_dimension_numbers<[1], [0], [0], [1], [0, 0, 1, 1], [], []>} : vector<8x196xbf16>, vector<196x49xbf16>, vector<8x49xf32> -> vector<8x49xf32>
    %14 = arith.truncf %13 : vector<8x49xf32> to vector<8x49xbf16>
    %c0_12 = arith.constant 0 : index
    %c0_13 = arith.constant 0 : index
    %c0_14 = arith.constant 0 : index
    %15 = vector.load %arg5[%c0_12, %c0_13, %c0_14] : memref<9x16x8xbf16, #tpu.memory_space<vmem>>, vector<1x16x8xbf16>
    %16 = vector.shape_cast %15 : vector<1x16x8xbf16> to vector<16x8xbf16>
    %cst_15 = arith.constant dense<0.000000e+00> : vector<16x49xf32>
    %17 = tpu.matmul %16, %14, %cst_15 {dimension_numbers = #tpu.dot_dimension_numbers<[1], [0], [0], [1], [0, 0, 1, 1], [], []>} : vector<16x8xbf16>, vector<8x49xbf16>, vector<16x49xf32> -> vector<16x49xf32>
    %18 = arith.addf %10, %17 : vector<16x49xf32>
    %c1 = arith.constant 1 : index
    %c0_16 = arith.constant 0 : index
    %c0_17 = arith.constant 0 : index
    %19 = vector.load %arg4[%c1, %c0_16, %c0_17] : memref<9x196x49xbf16, #tpu.memory_space<vmem>>, vector<1x196x49xbf16>
    %20 = vector.shape_cast %19 : vector<1x196x49xbf16> to vector<196x49xbf16>
    %cst_18 = arith.constant dense<0.000000e+00> : vector<8x49xf32>
    %21 = tpu.matmul %9, %20, %cst_18 {dimension_numbers = #tpu.dot_dimension_numbers<[1], [0], [0], [1], [0, 0, 1, 1], [], []>} : vector<8x196xbf16>, vector<196x49xbf16>, vector<8x49xf32> -> vector<8x49xf32>
    %22 = arith.truncf %21 : vector<8x49xf32> to vector<8x49xbf16>
    %c1_19 = arith.constant 1 : index
    %c0_20 = arith.constant 0 : index
    %c0_21 = arith.constant 0 : index
    %23 = vector.load %arg5[%c1_19, %c0_20, %c0_21] : memref<9x16x8xbf16, #tpu.memory_space<vmem>>, vector<1x16x8xbf16>
    %24 = vector.shape_cast %23 : vector<1x16x8xbf16> to vector<16x8xbf16>
    %cst_22 = arith.constant dense<0.000000e+00> : vector<16x49xf32>
    %25 = tpu.matmul %24, %22, %cst_22 {dimension_numbers = #tpu.dot_dimension_numbers<[1], [0], [0], [1], [0, 0, 1, 1], [], []>} : vector<16x8xbf16>, vector<8x49xbf16>, vector<16x49xf32> -> vector<16x49xf32>
    %26 = arith.addf %18, %25 : vector<16x49xf32>
    %c2 = arith.constant 2 : index
    %c0_23 = arith.constant 0 : index
    %c0_24 = arith.constant 0 : index
    %27 = vector.load %arg4[%c2, %c0_23, %c0_24] : memref<9x196x49xbf16, #tpu.memory_space<vmem>>, vector<1x196x49xbf16>
    %28 = vector.shape_cast %27 : vector<1x196x49xbf16> to vector<196x49xbf16>
    %cst_25 = arith.constant dense<0.000000e+00> : vector<8x49xf32>
    %29 = tpu.matmul %9, %28, %cst_25 {dimension_numbers = #tpu.dot_dimension_numbers<[1], [0], [0], [1], [0, 0, 1, 1], [], []>} : vector<8x196xbf16>, vector<196x49xbf16>, vector<8x49xf32> -> vector<8x49xf32>
    %30 = arith.truncf %29 : vector<8x49xf32> to vector<8x49xbf16>
    %c2_26 = arith.constant 2 : index
    %c0_27 = arith.constant 0 : index
    %c0_28 = arith.constant 0 : index
    %31 = vector.load %arg5[%c2_26, %c0_27, %c0_28] : memref<9x16x8xbf16, #tpu.memory_space<vmem>>, vector<1x16x8xbf16>
    %32 = vector.shape_cast %31 : vector<1x16x8xbf16> to vector<16x8xbf16>
    %cst_29 = arith.constant dense<0.000000e+00> : vector<16x49xf32>
    %33 = tpu.matmul %32, %30, %cst_29 {dimension_numbers = #tpu.dot_dimension_numbers<[1], [0], [0], [1], [0, 0, 1, 1], [], []>} : vector<16x8xbf16>, vector<8x49xbf16>, vector<16x49xf32> -> vector<16x49xf32>
    %34 = arith.addf %26, %33 : vector<16x49xf32>
    %c3 = arith.constant 3 : index
    %c0_30 = arith.constant 0 : index
    %c0_31 = arith.constant 0 : index
    %35 = vector.load %arg4[%c3, %c0_30, %c0_31] : memref<9x196x49xbf16, #tpu.memory_space<vmem>>, vector<1x196x49xbf16>
    %36 = vector.shape_cast %35 : vector<1x196x49xbf16> to vector<196x49xbf16>
    %cst_32 = arith.constant dense<0.000000e+00> : vector<8x49xf32>
    %37 = tpu.matmul %9, %36, %cst_32 {dimension_numbers = #tpu.dot_dimension_numbers<[1], [0], [0], [1], [0, 0, 1, 1], [], []>} : vector<8x196xbf16>, vector<196x49xbf16>, vector<8x49xf32> -> vector<8x49xf32>
    %38 = arith.truncf %37 : vector<8x49xf32> to vector<8x49xbf16>
    %c3_33 = arith.constant 3 : index
    %c0_34 = arith.constant 0 : index
    %c0_35 = arith.constant 0 : index
    %39 = vector.load %arg5[%c3_33, %c0_34, %c0_35] : memref<9x16x8xbf16, #tpu.memory_space<vmem>>, vector<1x16x8xbf16>
    %40 = vector.shape_cast %39 : vector<1x16x8xbf16> to vector<16x8xbf16>
    %cst_36 = arith.constant dense<0.000000e+00> : vector<16x49xf32>
    %41 = tpu.matmul %40, %38, %cst_36 {dimension_numbers = #tpu.dot_dimension_numbers<[1], [0], [0], [1], [0, 0, 1, 1], [], []>} : vector<16x8xbf16>, vector<8x49xbf16>, vector<16x49xf32> -> vector<16x49xf32>
    %42 = arith.addf %34, %41 : vector<16x49xf32>
    %c4 = arith.constant 4 : index
    %c0_37 = arith.constant 0 : index
    %c0_38 = arith.constant 0 : index
    %43 = vector.load %arg4[%c4, %c0_37, %c0_38] : memref<9x196x49xbf16, #tpu.memory_space<vmem>>, vector<1x196x49xbf16>
    %44 = vector.shape_cast %43 : vector<1x196x49xbf16> to vector<196x49xbf16>
    %cst_39 = arith.constant dense<0.000000e+00> : vector<8x49xf32>
    %45 = tpu.matmul %9, %44, %cst_39 {dimension_numbers = #tpu.dot_dimension_numbers<[1], [0], [0], [1], [0, 0, 1, 1], [], []>} : vector<8x196xbf16>, vector<196x49xbf16>, vector<8x49xf32> -> vector<8x49xf32>
    %46 = arith.truncf %45 : vector<8x49xf32> to vector<8x49xbf16>
    %c4_40 = arith.constant 4 : index
    %c0_41 = arith.constant 0 : index
    %c0_42 = arith.constant 0 : index
    %47 = vector.load %arg5[%c4_40, %c0_41, %c0_42] : memref<9x16x8xbf16, #tpu.memory_space<vmem>>, vector<1x16x8xbf16>
    %48 = vector.shape_cast %47 : vector<1x16x8xbf16> to vector<16x8xbf16>
    %cst_43 = arith.constant dense<0.000000e+00> : vector<16x49xf32>
    %49 = tpu.matmul %48, %46, %cst_43 {dimension_numbers = #tpu.dot_dimension_numbers<[1], [0], [0], [1], [0, 0, 1, 1], [], []>} : vector<16x8xbf16>, vector<8x49xbf16>, vector<16x49xf32> -> vector<16x49xf32>
    %50 = arith.addf %42, %49 : vector<16x49xf32>
    %c5 = arith.constant 5 : index
    %c0_44 = arith.constant 0 : index
    %c0_45 = arith.constant 0 : index
    %51 = vector.load %arg4[%c5, %c0_44, %c0_45] : memref<9x196x49xbf16, #tpu.memory_space<vmem>>, vector<1x196x49xbf16>
    %52 = vector.shape_cast %51 : vector<1x196x49xbf16> to vector<196x49xbf16>
    %cst_46 = arith.constant dense<0.000000e+00> : vector<8x49xf32>
    %53 = tpu.matmul %9, %52, %cst_46 {dimension_numbers = #tpu.dot_dimension_numbers<[1], [0], [0], [1], [0, 0, 1, 1], [], []>} : vector<8x196xbf16>, vector<196x49xbf16>, vector<8x49xf32> -> vector<8x49xf32>
    %54 = arith.truncf %53 : vector<8x49xf32> to vector<8x49xbf16>
    %c5_47 = arith.constant 5 : index
    %c0_48 = arith.constant 0 : index
    %c0_49 = arith.constant 0 : index
    %55 = vector.load %arg5[%c5_47, %c0_48, %c0_49] : memref<9x16x8xbf16, #tpu.memory_space<vmem>>, vector<1x16x8xbf16>
    %56 = vector.shape_cast %55 : vector<1x16x8xbf16> to vector<16x8xbf16>
    %cst_50 = arith.constant dense<0.000000e+00> : vector<16x49xf32>
    %57 = tpu.matmul %56, %54, %cst_50 {dimension_numbers = #tpu.dot_dimension_numbers<[1], [0], [0], [1], [0, 0, 1, 1], [], []>} : vector<16x8xbf16>, vector<8x49xbf16>, vector<16x49xf32> -> vector<16x49xf32>
    %58 = arith.addf %50, %57 : vector<16x49xf32>
    %c6 = arith.constant 6 : index
    %c0_51 = arith.constant 0 : index
    %c0_52 = arith.constant 0 : index
    %59 = vector.load %arg4[%c6, %c0_51, %c0_52] : memref<9x196x49xbf16, #tpu.memory_space<vmem>>, vector<1x196x49xbf16>
    %60 = vector.shape_cast %59 : vector<1x196x49xbf16> to vector<196x49xbf16>
    %cst_53 = arith.constant dense<0.000000e+00> : vector<8x49xf32>
    %61 = tpu.matmul %9, %60, %cst_53 {dimension_numbers = #tpu.dot_dimension_numbers<[1], [0], [0], [1], [0, 0, 1, 1], [], []>} : vector<8x196xbf16>, vector<196x49xbf16>, vector<8x49xf32> -> vector<8x49xf32>
    %62 = arith.truncf %61 : vector<8x49xf32> to vector<8x49xbf16>
    %c6_54 = arith.constant 6 : index
    %c0_55 = arith.constant 0 : index
    %c0_56 = arith.constant 0 : index
    %63 = vector.load %arg5[%c6_54, %c0_55, %c0_56] : memref<9x16x8xbf16, #tpu.memory_space<vmem>>, vector<1x16x8xbf16>
    %64 = vector.shape_cast %63 : vector<1x16x8xbf16> to vector<16x8xbf16>
    %cst_57 = arith.constant dense<0.000000e+00> : vector<16x49xf32>
    %65 = tpu.matmul %64, %62, %cst_57 {dimension_numbers = #tpu.dot_dimension_numbers<[1], [0], [0], [1], [0, 0, 1, 1], [], []>} : vector<16x8xbf16>, vector<8x49xbf16>, vector<16x49xf32> -> vector<16x49xf32>
    %66 = arith.addf %58, %65 : vector<16x49xf32>
    %c7 = arith.constant 7 : index
    %c0_58 = arith.constant 0 : index
    %c0_59 = arith.constant 0 : index
    %67 = vector.load %arg4[%c7, %c0_58, %c0_59] : memref<9x196x49xbf16, #tpu.memory_space<vmem>>, vector<1x196x49xbf16>
    %68 = vector.shape_cast %67 : vector<1x196x49xbf16> to vector<196x49xbf16>
    %cst_60 = arith.constant dense<0.000000e+00> : vector<8x49xf32>
    %69 = tpu.matmul %9, %68, %cst_60 {dimension_numbers = #tpu.dot_dimension_numbers<[1], [0], [0], [1], [0, 0, 1, 1], [], []>} : vector<8x196xbf16>, vector<196x49xbf16>, vector<8x49xf32> -> vector<8x49xf32>
    %70 = arith.truncf %69 : vector<8x49xf32> to vector<8x49xbf16>
    %c7_61 = arith.constant 7 : index
    %c0_62 = arith.constant 0 : index
    %c0_63 = arith.constant 0 : index
    %71 = vector.load %arg5[%c7_61, %c0_62, %c0_63] : memref<9x16x8xbf16, #tpu.memory_space<vmem>>, vector<1x16x8xbf16>
    %72 = vector.shape_cast %71 : vector<1x16x8xbf16> to vector<16x8xbf16>
    %cst_64 = arith.constant dense<0.000000e+00> : vector<16x49xf32>
    %73 = tpu.matmul %72, %70, %cst_64 {dimension_numbers = #tpu.dot_dimension_numbers<[1], [0], [0], [1], [0, 0, 1, 1], [], []>} : vector<16x8xbf16>, vector<8x49xbf16>, vector<16x49xf32> -> vector<16x49xf32>
    %74 = arith.addf %66, %73 : vector<16x49xf32>
    %c8 = arith.constant 8 : index
    %c0_65 = arith.constant 0 : index
    %c0_66 = arith.constant 0 : index
    %75 = vector.load %arg4[%c8, %c0_65, %c0_66] : memref<9x196x49xbf16, #tpu.memory_space<vmem>>, vector<1x196x49xbf16>
    %76 = vector.shape_cast %75 : vector<1x196x49xbf16> to vector<196x49xbf16>
    %cst_67 = arith.constant dense<0.000000e+00> : vector<8x49xf32>
    %77 = tpu.matmul %9, %76, %cst_67 {dimension_numbers = #tpu.dot_dimension_numbers<[1], [0], [0], [1], [0, 0, 1, 1], [], []>} : vector<8x196xbf16>, vector<196x49xbf16>, vector<8x49xf32> -> vector<8x49xf32>
    %78 = arith.truncf %77 : vector<8x49xf32> to vector<8x49xbf16>
    %c8_68 = arith.constant 8 : index
    %c0_69 = arith.constant 0 : index
    %c0_70 = arith.constant 0 : index
    %79 = vector.load %arg5[%c8_68, %c0_69, %c0_70] : memref<9x16x8xbf16, #tpu.memory_space<vmem>>, vector<1x16x8xbf16>
    %80 = vector.shape_cast %79 : vector<1x16x8xbf16> to vector<16x8xbf16>
    %cst_71 = arith.constant dense<0.000000e+00> : vector<16x49xf32>
    %81 = tpu.matmul %80, %78, %cst_71 {dimension_numbers = #tpu.dot_dimension_numbers<[1], [0], [0], [1], [0, 0, 1, 1], [], []>} : vector<16x8xbf16>, vector<8x49xbf16>, vector<16x49xf32> -> vector<16x49xf32>
    %82 = arith.addf %74, %81 : vector<16x49xf32>
    %c0_72 = arith.constant 0 : index
    %c0_73 = arith.constant 0 : index
    %83 = vector.load %arg6[%c0_72, %c0_73] : memref<16x1xf32, #tpu.memory_space<vmem>>, vector<16x1xf32>
    %84 = vector.broadcast %83 : vector<16x1xf32> to vector<16x49xf32>
    %85 = arith.addf %82, %84 : vector<16x49xf32>
    %cst_74 = arith.constant 0.000000e+00 : f32
    %86 = vector.broadcast %cst_74 : f32 to vector<16x49xf32>
    %87 = arith.maximumf %85, %86 : vector<16x49xf32>
    %88 = arith.truncf %87 : vector<16x49xf32> to vector<16x49xbf16>
    %cst_75 = arith.constant 0.000000e+00 : f32
    %89 = vector.broadcast %cst_75 : f32 to vector<16x25xf32>
    %c0_76 = arith.constant 0 : index
    %c0_77 = arith.constant 0 : index
    %c0_78 = arith.constant 0 : index
    %90 = vector.load %arg7[%c0_76, %c0_77, %c0_78] : memref<9x49x25xbf16, #tpu.memory_space<vmem>>, vector<1x49x25xbf16>
    %91 = vector.shape_cast %90 : vector<1x49x25xbf16> to vector<49x25xbf16>
    %cst_79 = arith.constant dense<0.000000e+00> : vector<16x25xf32>
    %92 = tpu.matmul %88, %91, %cst_79 {dimension_numbers = #tpu.dot_dimension_numbers<[1], [0], [0], [1], [0, 0, 1, 1], [], []>} : vector<16x49xbf16>, vector<49x25xbf16>, vector<16x25xf32> -> vector<16x25xf32>
    %93 = arith.truncf %92 : vector<16x25xf32> to vector<16x25xbf16>
    %c0_80 = arith.constant 0 : index
    %c0_81 = arith.constant 0 : index
    %c0_82 = arith.constant 0 : index
    %94 = vector.load %arg8[%c0_80, %c0_81, %c0_82] : memref<9x16x16xbf16, #tpu.memory_space<vmem>>, vector<1x16x16xbf16>
    %95 = vector.shape_cast %94 : vector<1x16x16xbf16> to vector<16x16xbf16>
    %cst_83 = arith.constant dense<0.000000e+00> : vector<16x25xf32>
    %96 = tpu.matmul %95, %93, %cst_83 {dimension_numbers = #tpu.dot_dimension_numbers<[1], [0], [0], [1], [0, 0, 1, 1], [], []>} : vector<16x16xbf16>, vector<16x25xbf16>, vector<16x25xf32> -> vector<16x25xf32>
    %97 = arith.addf %89, %96 : vector<16x25xf32>
    %c1_84 = arith.constant 1 : index
    %c0_85 = arith.constant 0 : index
    %c0_86 = arith.constant 0 : index
    %98 = vector.load %arg7[%c1_84, %c0_85, %c0_86] : memref<9x49x25xbf16, #tpu.memory_space<vmem>>, vector<1x49x25xbf16>
    %99 = vector.shape_cast %98 : vector<1x49x25xbf16> to vector<49x25xbf16>
    %cst_87 = arith.constant dense<0.000000e+00> : vector<16x25xf32>
    %100 = tpu.matmul %88, %99, %cst_87 {dimension_numbers = #tpu.dot_dimension_numbers<[1], [0], [0], [1], [0, 0, 1, 1], [], []>} : vector<16x49xbf16>, vector<49x25xbf16>, vector<16x25xf32> -> vector<16x25xf32>
    %101 = arith.truncf %100 : vector<16x25xf32> to vector<16x25xbf16>
    %c1_88 = arith.constant 1 : index
    %c0_89 = arith.constant 0 : index
    %c0_90 = arith.constant 0 : index
    %102 = vector.load %arg8[%c1_88, %c0_89, %c0_90] : memref<9x16x16xbf16, #tpu.memory_space<vmem>>, vector<1x16x16xbf16>
    %103 = vector.shape_cast %102 : vector<1x16x16xbf16> to vector<16x16xbf16>
    %cst_91 = arith.constant dense<0.000000e+00> : vector<16x25xf32>
    %104 = tpu.matmul %103, %101, %cst_91 {dimension_numbers = #tpu.dot_dimension_numbers<[1], [0], [0], [1], [0, 0, 1, 1], [], []>} : vector<16x16xbf16>, vector<16x25xbf16>, vector<16x25xf32> -> vector<16x25xf32>
    %105 = arith.addf %97, %104 : vector<16x25xf32>
    %c2_92 = arith.constant 2 : index
    %c0_93 = arith.constant 0 : index
    %c0_94 = arith.constant 0 : index
    %106 = vector.load %arg7[%c2_92, %c0_93, %c0_94] : memref<9x49x25xbf16, #tpu.memory_space<vmem>>, vector<1x49x25xbf16>
    %107 = vector.shape_cast %106 : vector<1x49x25xbf16> to vector<49x25xbf16>
    %cst_95 = arith.constant dense<0.000000e+00> : vector<16x25xf32>
    %108 = tpu.matmul %88, %107, %cst_95 {dimension_numbers = #tpu.dot_dimension_numbers<[1], [0], [0], [1], [0, 0, 1, 1], [], []>} : vector<16x49xbf16>, vector<49x25xbf16>, vector<16x25xf32> -> vector<16x25xf32>
    %109 = arith.truncf %108 : vector<16x25xf32> to vector<16x25xbf16>
    %c2_96 = arith.constant 2 : index
    %c0_97 = arith.constant 0 : index
    %c0_98 = arith.constant 0 : index
    %110 = vector.load %arg8[%c2_96, %c0_97, %c0_98] : memref<9x16x16xbf16, #tpu.memory_space<vmem>>, vector<1x16x16xbf16>
    %111 = vector.shape_cast %110 : vector<1x16x16xbf16> to vector<16x16xbf16>
    %cst_99 = arith.constant dense<0.000000e+00> : vector<16x25xf32>
    %112 = tpu.matmul %111, %109, %cst_99 {dimension_numbers = #tpu.dot_dimension_numbers<[1], [0], [0], [1], [0, 0, 1, 1], [], []>} : vector<16x16xbf16>, vector<16x25xbf16>, vector<16x25xf32> -> vector<16x25xf32>
    %113 = arith.addf %105, %112 : vector<16x25xf32>
    %c3_100 = arith.constant 3 : index
    %c0_101 = arith.constant 0 : index
    %c0_102 = arith.constant 0 : index
    %114 = vector.load %arg7[%c3_100, %c0_101, %c0_102] : memref<9x49x25xbf16, #tpu.memory_space<vmem>>, vector<1x49x25xbf16>
    %115 = vector.shape_cast %114 : vector<1x49x25xbf16> to vector<49x25xbf16>
    %cst_103 = arith.constant dense<0.000000e+00> : vector<16x25xf32>
    %116 = tpu.matmul %88, %115, %cst_103 {dimension_numbers = #tpu.dot_dimension_numbers<[1], [0], [0], [1], [0, 0, 1, 1], [], []>} : vector<16x49xbf16>, vector<49x25xbf16>, vector<16x25xf32> -> vector<16x25xf32>
    %117 = arith.truncf %116 : vector<16x25xf32> to vector<16x25xbf16>
    %c3_104 = arith.constant 3 : index
    %c0_105 = arith.constant 0 : index
    %c0_106 = arith.constant 0 : index
    %118 = vector.load %arg8[%c3_104, %c0_105, %c0_106] : memref<9x16x16xbf16, #tpu.memory_space<vmem>>, vector<1x16x16xbf16>
    %119 = vector.shape_cast %118 : vector<1x16x16xbf16> to vector<16x16xbf16>
    %cst_107 = arith.constant dense<0.000000e+00> : vector<16x25xf32>
    %120 = tpu.matmul %119, %117, %cst_107 {dimension_numbers = #tpu.dot_dimension_numbers<[1], [0], [0], [1], [0, 0, 1, 1], [], []>} : vector<16x16xbf16>, vector<16x25xbf16>, vector<16x25xf32> -> vector<16x25xf32>
    %121 = arith.addf %113, %120 : vector<16x25xf32>
    %c4_108 = arith.constant 4 : index
    %c0_109 = arith.constant 0 : index
    %c0_110 = arith.constant 0 : index
    %122 = vector.load %arg7[%c4_108, %c0_109, %c0_110] : memref<9x49x25xbf16, #tpu.memory_space<vmem>>, vector<1x49x25xbf16>
    %123 = vector.shape_cast %122 : vector<1x49x25xbf16> to vector<49x25xbf16>
    %cst_111 = arith.constant dense<0.000000e+00> : vector<16x25xf32>
    %124 = tpu.matmul %88, %123, %cst_111 {dimension_numbers = #tpu.dot_dimension_numbers<[1], [0], [0], [1], [0, 0, 1, 1], [], []>} : vector<16x49xbf16>, vector<49x25xbf16>, vector<16x25xf32> -> vector<16x25xf32>
    %125 = arith.truncf %124 : vector<16x25xf32> to vector<16x25xbf16>
    %c4_112 = arith.constant 4 : index
    %c0_113 = arith.constant 0 : index
    %c0_114 = arith.constant 0 : index
    %126 = vector.load %arg8[%c4_112, %c0_113, %c0_114] : memref<9x16x16xbf16, #tpu.memory_space<vmem>>, vector<1x16x16xbf16>
    %127 = vector.shape_cast %126 : vector<1x16x16xbf16> to vector<16x16xbf16>
    %cst_115 = arith.constant dense<0.000000e+00> : vector<16x25xf32>
    %128 = tpu.matmul %127, %125, %cst_115 {dimension_numbers = #tpu.dot_dimension_numbers<[1], [0], [0], [1], [0, 0, 1, 1], [], []>} : vector<16x16xbf16>, vector<16x25xbf16>, vector<16x25xf32> -> vector<16x25xf32>
    %129 = arith.addf %121, %128 : vector<16x25xf32>
    %c5_116 = arith.constant 5 : index
    %c0_117 = arith.constant 0 : index
    %c0_118 = arith.constant 0 : index
    %130 = vector.load %arg7[%c5_116, %c0_117, %c0_118] : memref<9x49x25xbf16, #tpu.memory_space<vmem>>, vector<1x49x25xbf16>
    %131 = vector.shape_cast %130 : vector<1x49x25xbf16> to vector<49x25xbf16>
    %cst_119 = arith.constant dense<0.000000e+00> : vector<16x25xf32>
    %132 = tpu.matmul %88, %131, %cst_119 {dimension_numbers = #tpu.dot_dimension_numbers<[1], [0], [0], [1], [0, 0, 1, 1], [], []>} : vector<16x49xbf16>, vector<49x25xbf16>, vector<16x25xf32> -> vector<16x25xf32>
    %133 = arith.truncf %132 : vector<16x25xf32> to vector<16x25xbf16>
    %c5_120 = arith.constant 5 : index
    %c0_121 = arith.constant 0 : index
    %c0_122 = arith.constant 0 : index
    %134 = vector.load %arg8[%c5_120, %c0_121, %c0_122] : memref<9x16x16xbf16, #tpu.memory_space<vmem>>, vector<1x16x16xbf16>
    %135 = vector.shape_cast %134 : vector<1x16x16xbf16> to vector<16x16xbf16>
    %cst_123 = arith.constant dense<0.000000e+00> : vector<16x25xf32>
    %136 = tpu.matmul %135, %133, %cst_123 {dimension_numbers = #tpu.dot_dimension_numbers<[1], [0], [0], [1], [0, 0, 1, 1], [], []>} : vector<16x16xbf16>, vector<16x25xbf16>, vector<16x25xf32> -> vector<16x25xf32>
    %137 = arith.addf %129, %136 : vector<16x25xf32>
    %c6_124 = arith.constant 6 : index
    %c0_125 = arith.constant 0 : index
    %c0_126 = arith.constant 0 : index
    %138 = vector.load %arg7[%c6_124, %c0_125, %c0_126] : memref<9x49x25xbf16, #tpu.memory_space<vmem>>, vector<1x49x25xbf16>
    %139 = vector.shape_cast %138 : vector<1x49x25xbf16> to vector<49x25xbf16>
    %cst_127 = arith.constant dense<0.000000e+00> : vector<16x25xf32>
    %140 = tpu.matmul %88, %139, %cst_127 {dimension_numbers = #tpu.dot_dimension_numbers<[1], [0], [0], [1], [0, 0, 1, 1], [], []>} : vector<16x49xbf16>, vector<49x25xbf16>, vector<16x25xf32> -> vector<16x25xf32>
    %141 = arith.truncf %140 : vector<16x25xf32> to vector<16x25xbf16>
    %c6_128 = arith.constant 6 : index
    %c0_129 = arith.constant 0 : index
    %c0_130 = arith.constant 0 : index
    %142 = vector.load %arg8[%c6_128, %c0_129, %c0_130] : memref<9x16x16xbf16, #tpu.memory_space<vmem>>, vector<1x16x16xbf16>
    %143 = vector.shape_cast %142 : vector<1x16x16xbf16> to vector<16x16xbf16>
    %cst_131 = arith.constant dense<0.000000e+00> : vector<16x25xf32>
    %144 = tpu.matmul %143, %141, %cst_131 {dimension_numbers = #tpu.dot_dimension_numbers<[1], [0], [0], [1], [0, 0, 1, 1], [], []>} : vector<16x16xbf16>, vector<16x25xbf16>, vector<16x25xf32> -> vector<16x25xf32>
    %145 = arith.addf %137, %144 : vector<16x25xf32>
    %c7_132 = arith.constant 7 : index
    %c0_133 = arith.constant 0 : index
    %c0_134 = arith.constant 0 : index
    %146 = vector.load %arg7[%c7_132, %c0_133, %c0_134] : memref<9x49x25xbf16, #tpu.memory_space<vmem>>, vector<1x49x25xbf16>
    %147 = vector.shape_cast %146 : vector<1x49x25xbf16> to vector<49x25xbf16>
    %cst_135 = arith.constant dense<0.000000e+00> : vector<16x25xf32>
    %148 = tpu.matmul %88, %147, %cst_135 {dimension_numbers = #tpu.dot_dimension_numbers<[1], [0], [0], [1], [0, 0, 1, 1], [], []>} : vector<16x49xbf16>, vector<49x25xbf16>, vector<16x25xf32> -> vector<16x25xf32>
    %149 = arith.truncf %148 : vector<16x25xf32> to vector<16x25xbf16>
    %c7_136 = arith.constant 7 : index
    %c0_137 = arith.constant 0 : index
    %c0_138 = arith.constant 0 : index
    %150 = vector.load %arg8[%c7_136, %c0_137, %c0_138] : memref<9x16x16xbf16, #tpu.memory_space<vmem>>, vector<1x16x16xbf16>
    %151 = vector.shape_cast %150 : vector<1x16x16xbf16> to vector<16x16xbf16>
    %cst_139 = arith.constant dense<0.000000e+00> : vector<16x25xf32>
    %152 = tpu.matmul %151, %149, %cst_139 {dimension_numbers = #tpu.dot_dimension_numbers<[1], [0], [0], [1], [0, 0, 1, 1], [], []>} : vector<16x16xbf16>, vector<16x25xbf16>, vector<16x25xf32> -> vector<16x25xf32>
    %153 = arith.addf %145, %152 : vector<16x25xf32>
    %c8_140 = arith.constant 8 : index
    %c0_141 = arith.constant 0 : index
    %c0_142 = arith.constant 0 : index
    %154 = vector.load %arg7[%c8_140, %c0_141, %c0_142] : memref<9x49x25xbf16, #tpu.memory_space<vmem>>, vector<1x49x25xbf16>
    %155 = vector.shape_cast %154 : vector<1x49x25xbf16> to vector<49x25xbf16>
    %cst_143 = arith.constant dense<0.000000e+00> : vector<16x25xf32>
    %156 = tpu.matmul %88, %155, %cst_143 {dimension_numbers = #tpu.dot_dimension_numbers<[1], [0], [0], [1], [0, 0, 1, 1], [], []>} : vector<16x49xbf16>, vector<49x25xbf16>, vector<16x25xf32> -> vector<16x25xf32>
    %157 = arith.truncf %156 : vector<16x25xf32> to vector<16x25xbf16>
    %c8_144 = arith.constant 8 : index
    %c0_145 = arith.constant 0 : index
    %c0_146 = arith.constant 0 : index
    %158 = vector.load %arg8[%c8_144, %c0_145, %c0_146] : memref<9x16x16xbf16, #tpu.memory_space<vmem>>, vector<1x16x16xbf16>
    %159 = vector.shape_cast %158 : vector<1x16x16xbf16> to vector<16x16xbf16>
    %cst_147 = arith.constant dense<0.000000e+00> : vector<16x25xf32>
    %160 = tpu.matmul %159, %157, %cst_147 {dimension_numbers = #tpu.dot_dimension_numbers<[1], [0], [0], [1], [0, 0, 1, 1], [], []>} : vector<16x16xbf16>, vector<16x25xbf16>, vector<16x25xf32> -> vector<16x25xf32>
    %161 = arith.addf %153, %160 : vector<16x25xf32>
    %c0_148 = arith.constant 0 : index
    %c0_149 = arith.constant 0 : index
    %162 = vector.load %arg9[%c0_148, %c0_149] : memref<16x1xf32, #tpu.memory_space<vmem>>, vector<16x1xf32>
    %163 = vector.broadcast %162 : vector<16x1xf32> to vector<16x25xf32>
    %164 = arith.addf %161, %163 : vector<16x25xf32>
    %cst_150 = arith.constant 0.000000e+00 : f32
    %165 = vector.broadcast %cst_150 : f32 to vector<16x25xf32>
    %166 = arith.maximumf %164, %165 : vector<16x25xf32>
    %167 = arith.mulf %166, %166 : vector<16x25xf32>
    %cst_151 = arith.constant dense<0.000000e+00> : vector<25xf32>
    %168 = vector.multi_reduction <add>, %167, %cst_151 [0] : vector<16x25xf32> to vector<25xf32>
    %169 = vector.shape_cast %168 : vector<25xf32> to vector<1x25xf32>
    %c0_152 = arith.constant 0 : index
    %c0_153 = arith.constant 0 : index
    %170 = vector.load %arg10[%c0_152, %c0_153] : memref<32x16xbf16, #tpu.memory_space<vmem>>, vector<32x16xbf16>
    %171 = arith.truncf %166 : vector<16x25xf32> to vector<16x25xbf16>
    %cst_154 = arith.constant dense<0.000000e+00> : vector<32x25xf32>
    %172 = tpu.matmul %170, %171, %cst_154 {dimension_numbers = #tpu.dot_dimension_numbers<[1], [0], [0], [1], [0, 0, 1, 1], [], []>} : vector<32x16xbf16>, vector<16x25xbf16>, vector<32x25xf32> -> vector<32x25xf32>
    %cst_155 = arith.constant 2.000000e+00 : f32
    %173 = vector.broadcast %cst_155 : f32 to vector<32x25xf32>
    %174 = arith.mulf %173, %172 : vector<32x25xf32>
    %175 = vector.broadcast %169 : vector<1x25xf32> to vector<32x25xf32>
    %176 = arith.subf %175, %174 : vector<32x25xf32>
    %c0_156 = arith.constant 0 : index
    %c0_157 = arith.constant 0 : index
    %177 = vector.load %arg11[%c0_156, %c0_157] : memref<32x1xf32, #tpu.memory_space<vmem>>, vector<32x1xf32>
    %178 = vector.broadcast %177 : vector<32x1xf32> to vector<32x25xf32>
    %179 = arith.addf %176, %178 : vector<32x25xf32>
    %cst_158 = arith.constant 0.000000e+00 : f32
    %180 = vector.broadcast %cst_158 : f32 to vector<32x25xf32>
    %181 = arith.maximumf %179, %180 : vector<32x25xf32>
    %cst_159 = arith.constant dense<0x7F800000> : vector<32xf32>
    %182 = vector.multi_reduction <minimumf>, %181, %cst_159 [1] : vector<32x25xf32> to vector<32xf32>
    %183 = vector.shape_cast %182 : vector<32xf32> to vector<32x1xf32>
    %c0_160 = arith.constant 0 : index
    %c0_161 = arith.constant 0 : index
    %c0_162 = arith.constant 0 : index
    %184 = vector.load %arg25[%c0_160, %c0_161, %c0_162] : memref<1x32x1xf32, #tpu.memory_space<vmem>>, vector<1x32x1xf32>
    %185 = vector.shape_cast %184 : vector<1x32x1xf32> to vector<32x1xf32>
    %186 = vector.shape_cast %183 : vector<32x1xf32> to vector<1x32x1xf32>
    tpu.vector_store %arg25[%c0_160, %c0_161, %c0_162], %186 {strides = array<i32>} : memref<1x32x1xf32, #tpu.memory_space<vmem>>, vector<1x32x1xf32>,
    %cst_163 = arith.constant 0.000000e+00 : f32
    %187 = vector.broadcast %cst_163 : f32 to vector<32x1xf32>
    %188 = arith.subf %187, %183 : vector<32x1xf32>
    %cst_164 = arith.constant dense<0xFF800000> : vector<1xf32>
    %189 = vector.multi_reduction <maximumf>, %188, %cst_164 [0] : vector<32x1xf32> to vector<1xf32>
    %190 = vector.shape_cast %189 : vector<1xf32> to vector<1x1xf32>
    %191 = vector.broadcast %190 : vector<1x1xf32> to vector<32x1xf32>
    %192 = arith.subf %188, %191 : vector<32x1xf32>
    %193 = math.exp %192 : vector<32x1xf32>
    %cst_165 = arith.constant dense<0.000000e+00> : vector<1xf32>
    %194 = vector.multi_reduction <add>, %193, %cst_165 [0] : vector<32x1xf32> to vector<1xf32>
    %195 = vector.shape_cast %194 : vector<1xf32> to vector<1x1xf32>
    %196 = vector.broadcast %195 : vector<1x1xf32> to vector<32x1xf32>
    %197 = arith.divf %193, %196 : vector<32x1xf32>
    %c0_166 = arith.constant 0 : index
    %c0_167 = arith.constant 0 : index
    %198 = vector.load %arg12[%c0_166, %c0_167] : memref<16x32xbf16, #tpu.memory_space<vmem>>, vector<16x32xbf16>
    %199 = arith.truncf %197 : vector<32x1xf32> to vector<32x1xbf16>
    %cst_168 = arith.constant dense<0.000000e+00> : vector<16x1xf32>
    %200 = tpu.matmul %198, %199, %cst_168 {dimension_numbers = #tpu.dot_dimension_numbers<[1], [0], [0], [1], [0, 0, 1, 1], [], []>} : vector<16x32xbf16>, vector<32x1xbf16>, vector<16x1xf32> -> vector<16x1xf32>
    %c0_169 = arith.constant 0 : index
    %c0_170 = arith.constant 0 : index
    %201 = vector.load %arg13[%c0_169, %c0_170] : memref<400x16xbf16, #tpu.memory_space<vmem>>, vector<400x16xbf16>
    %202 = arith.truncf %200 : vector<16x1xf32> to vector<16x1xbf16>
    %cst_171 = arith.constant dense<0.000000e+00> : vector<400x1xf32>
    %203 = tpu.matmul %201, %202, %cst_171 {dimension_numbers = #tpu.dot_dimension_numbers<[1], [0], [0], [1], [0, 0, 1, 1], [], []>} : vector<400x16xbf16>, vector<16x1xbf16>, vector<400x1xf32> -> vector<400x1xf32>
    %c0_172 = arith.constant 0 : index
    %c0_173 = arith.constant 0 : index
    %204 = vector.load %arg14[%c0_172, %c0_173] : memref<400x1xf32, #tpu.memory_space<vmem>>, vector<400x1xf32>
    %205 = arith.addf %203, %204 : vector<400x1xf32>
    %cst_174 = arith.constant 0.000000e+00 : f32
    %206 = vector.broadcast %cst_174 : f32 to vector<400x1xf32>
    %207 = arith.maximumf %205, %206 : vector<400x1xf32>
    %208 = tpu.iota {dimensions = array<i32: 1>} : vector<16x25xi32>
    %cst_175 = arith.constant 0.000000e+00 : f32
    %209 = vector.broadcast %cst_175 : f32 to vector<16x25xf32>
    %c0_i32 = arith.constant 0 : i32
    %210 = vector.broadcast %c0_i32 : i32 to vector<16x25xi32>
    %211 = arith.cmpi eq, %208, %210 : vector<16x25xi32>
    %212 = vector.extract_strided_slice %207 {offsets = [0, 0], sizes = [16, 1], strides = [1, 1]} : vector<400x1xf32> to vector<16x1xf32>
    %cst_176 = arith.constant 0.000000e+00 : f32
    %213 = vector.shape_cast %212 : vector<16x1xf32> to vector<16x1xf32>
    %214 = vector.broadcast %213 : vector<16x1xf32> to vector<16x25xf32>
    %215 = vector.broadcast %cst_176 : f32 to vector<16x25xf32>
    %216 = arith.select %211, %214, %215 : vector<16x25xi1>, vector<16x25xf32>
    %217 = arith.addf %209, %216 : vector<16x25xf32>
    %c1_i32 = arith.constant 1 : i32
    %218 = vector.broadcast %c1_i32 : i32 to vector<16x25xi32>
    %219 = arith.cmpi eq, %208, %218 : vector<16x25xi32>
    %220 = vector.extract_strided_slice %207 {offsets = [16, 0], sizes = [16, 1], strides = [1, 1]} : vector<400x1xf32> to vector<16x1xf32>
    %cst_177 = arith.constant 0.000000e+00 : f32
    %221 = vector.shape_cast %220 : vector<16x1xf32> to vector<16x1xf32>
    %222 = vector.broadcast %221 : vector<16x1xf32> to vector<16x25xf32>
    %223 = vector.broadcast %cst_177 : f32 to vector<16x25xf32>
    %224 = arith.select %219, %222, %223 : vector<16x25xi1>, vector<16x25xf32>
    %225 = arith.addf %217, %224 : vector<16x25xf32>
    %c2_i32 = arith.constant 2 : i32
    %226 = vector.broadcast %c2_i32 : i32 to vector<16x25xi32>
    %227 = arith.cmpi eq, %208, %226 : vector<16x25xi32>
    %228 = vector.extract_strided_slice %207 {offsets = [32, 0], sizes = [16, 1], strides = [1, 1]} : vector<400x1xf32> to vector<16x1xf32>
    %cst_178 = arith.constant 0.000000e+00 : f32
    %229 = vector.shape_cast %228 : vector<16x1xf32> to vector<16x1xf32>
    %230 = vector.broadcast %229 : vector<16x1xf32> to vector<16x25xf32>
    %231 = vector.broadcast %cst_178 : f32 to vector<16x25xf32>
    %232 = arith.select %227, %230, %231 : vector<16x25xi1>, vector<16x25xf32>
    %233 = arith.addf %225, %232 : vector<16x25xf32>
    %c3_i32 = arith.constant 3 : i32
    %234 = vector.broadcast %c3_i32 : i32 to vector<16x25xi32>
    %235 = arith.cmpi eq, %208, %234 : vector<16x25xi32>
    %236 = vector.extract_strided_slice %207 {offsets = [48, 0], sizes = [16, 1], strides = [1, 1]} : vector<400x1xf32> to vector<16x1xf32>
    %cst_179 = arith.constant 0.000000e+00 : f32
    %237 = vector.shape_cast %236 : vector<16x1xf32> to vector<16x1xf32>
    %238 = vector.broadcast %237 : vector<16x1xf32> to vector<16x25xf32>
    %239 = vector.broadcast %cst_179 : f32 to vector<16x25xf32>
    %240 = arith.select %235, %238, %239 : vector<16x25xi1>, vector<16x25xf32>
    %241 = arith.addf %233, %240 : vector<16x25xf32>
    %c4_i32 = arith.constant 4 : i32
    %242 = vector.broadcast %c4_i32 : i32 to vector<16x25xi32>
    %243 = arith.cmpi eq, %208, %242 : vector<16x25xi32>
    %244 = vector.extract_strided_slice %207 {offsets = [64, 0], sizes = [16, 1], strides = [1, 1]} : vector<400x1xf32> to vector<16x1xf32>
    %cst_180 = arith.constant 0.000000e+00 : f32
    %245 = vector.shape_cast %244 : vector<16x1xf32> to vector<16x1xf32>
    %246 = vector.broadcast %245 : vector<16x1xf32> to vector<16x25xf32>
    %247 = vector.broadcast %cst_180 : f32 to vector<16x25xf32>
    %248 = arith.select %243, %246, %247 : vector<16x25xi1>, vector<16x25xf32>
    %249 = arith.addf %241, %248 : vector<16x25xf32>
    %c5_i32 = arith.constant 5 : i32
    %250 = vector.broadcast %c5_i32 : i32 to vector<16x25xi32>
    %251 = arith.cmpi eq, %208, %250 : vector<16x25xi32>
    %252 = vector.extract_strided_slice %207 {offsets = [80, 0], sizes = [16, 1], strides = [1, 1]} : vector<400x1xf32> to vector<16x1xf32>
    %cst_181 = arith.constant 0.000000e+00 : f32
    %253 = vector.shape_cast %252 : vector<16x1xf32> to vector<16x1xf32>
    %254 = vector.broadcast %253 : vector<16x1xf32> to vector<16x25xf32>
    %255 = vector.broadcast %cst_181 : f32 to vector<16x25xf32>
    %256 = arith.select %251, %254, %255 : vector<16x25xi1>, vector<16x25xf32>
    %257 = arith.addf %249, %256 : vector<16x25xf32>
    %c6_i32 = arith.constant 6 : i32
    %258 = vector.broadcast %c6_i32 : i32 to vector<16x25xi32>
    %259 = arith.cmpi eq, %208, %258 : vector<16x25xi32>
    %260 = vector.extract_strided_slice %207 {offsets = [96, 0], sizes = [16, 1], strides = [1, 1]} : vector<400x1xf32> to vector<16x1xf32>
    %cst_182 = arith.constant 0.000000e+00 : f32
    %261 = vector.shape_cast %260 : vector<16x1xf32> to vector<16x1xf32>
    %262 = vector.broadcast %261 : vector<16x1xf32> to vector<16x25xf32>
    %263 = vector.broadcast %cst_182 : f32 to vector<16x25xf32>
    %264 = arith.select %259, %262, %263 : vector<16x25xi1>, vector<16x25xf32>
    %265 = arith.addf %257, %264 : vector<16x25xf32>
    %c7_i32 = arith.constant 7 : i32
    %266 = vector.broadcast %c7_i32 : i32 to vector<16x25xi32>
    %267 = arith.cmpi eq, %208, %266 : vector<16x25xi32>
    %268 = vector.extract_strided_slice %207 {offsets = [112, 0], sizes = [16, 1], strides = [1, 1]} : vector<400x1xf32> to vector<16x1xf32>
    %cst_183 = arith.constant 0.000000e+00 : f32
    %269 = vector.shape_cast %268 : vector<16x1xf32> to vector<16x1xf32>
    %270 = vector.broadcast %269 : vector<16x1xf32> to vector<16x25xf32>
    %271 = vector.broadcast %cst_183 : f32 to vector<16x25xf32>
    %272 = arith.select %267, %270, %271 : vector<16x25xi1>, vector<16x25xf32>
    %273 = arith.addf %265, %272 : vector<16x25xf32>
    %c8_i32 = arith.constant 8 : i32
    %274 = vector.broadcast %c8_i32 : i32 to vector<16x25xi32>
    %275 = arith.cmpi eq, %208, %274 : vector<16x25xi32>
    %276 = vector.extract_strided_slice %207 {offsets = [128, 0], sizes = [16, 1], strides = [1, 1]} : vector<400x1xf32> to vector<16x1xf32>
    %cst_184 = arith.constant 0.000000e+00 : f32
    %277 = vector.shape_cast %276 : vector<16x1xf32> to vector<16x1xf32>
    %278 = vector.broadcast %277 : vector<16x1xf32> to vector<16x25xf32>
    %279 = vector.broadcast %cst_184 : f32 to vector<16x25xf32>
    %280 = arith.select %275, %278, %279 : vector<16x25xi1>, vector<16x25xf32>
    %281 = arith.addf %273, %280 : vector<16x25xf32>
    %c9_i32 = arith.constant 9 : i32
    %282 = vector.broadcast %c9_i32 : i32 to vector<16x25xi32>
    %283 = arith.cmpi eq, %208, %282 : vector<16x25xi32>
    %284 = vector.extract_strided_slice %207 {offsets = [144, 0], sizes = [16, 1], strides = [1, 1]} : vector<400x1xf32> to vector<16x1xf32>
    %cst_185 = arith.constant 0.000000e+00 : f32
    %285 = vector.shape_cast %284 : vector<16x1xf32> to vector<16x1xf32>
    %286 = vector.broadcast %285 : vector<16x1xf32> to vector<16x25xf32>
    %287 = vector.broadcast %cst_185 : f32 to vector<16x25xf32>
    %288 = arith.select %283, %286, %287 : vector<16x25xi1>, vector<16x25xf32>
    %289 = arith.addf %281, %288 : vector<16x25xf32>
    %c10_i32 = arith.constant 10 : i32
    %290 = vector.broadcast %c10_i32 : i32 to vector<16x25xi32>
    %291 = arith.cmpi eq, %208, %290 : vector<16x25xi32>
    %292 = vector.extract_strided_slice %207 {offsets = [160, 0], sizes = [16, 1], strides = [1, 1]} : vector<400x1xf32> to vector<16x1xf32>
    %cst_186 = arith.constant 0.000000e+00 : f32
    %293 = vector.shape_cast %292 : vector<16x1xf32> to vector<16x1xf32>
    %294 = vector.broadcast %293 : vector<16x1xf32> to vector<16x25xf32>
    %295 = vector.broadcast %cst_186 : f32 to vector<16x25xf32>
    %296 = arith.select %291, %294, %295 : vector<16x25xi1>, vector<16x25xf32>
    %297 = arith.addf %289, %296 : vector<16x25xf32>
    %c11_i32 = arith.constant 11 : i32
    %298 = vector.broadcast %c11_i32 : i32 to vector<16x25xi32>
    %299 = arith.cmpi eq, %208, %298 : vector<16x25xi32>
    %300 = vector.extract_strided_slice %207 {offsets = [176, 0], sizes = [16, 1], strides = [1, 1]} : vector<400x1xf32> to vector<16x1xf32>
    %cst_187 = arith.constant 0.000000e+00 : f32
    %301 = vector.shape_cast %300 : vector<16x1xf32> to vector<16x1xf32>
    %302 = vector.broadcast %301 : vector<16x1xf32> to vector<16x25xf32>
    %303 = vector.broadcast %cst_187 : f32 to vector<16x25xf32>
    %304 = arith.select %299, %302, %303 : vector<16x25xi1>, vector<16x25xf32>
    %305 = arith.addf %297, %304 : vector<16x25xf32>
    %c12_i32 = arith.constant 12 : i32
    %306 = vector.broadcast %c12_i32 : i32 to vector<16x25xi32>
    %307 = arith.cmpi eq, %208, %306 : vector<16x25xi32>
    %308 = vector.extract_strided_slice %207 {offsets = [192, 0], sizes = [16, 1], strides = [1, 1]} : vector<400x1xf32> to vector<16x1xf32>
    %cst_188 = arith.constant 0.000000e+00 : f32
    %309 = vector.shape_cast %308 : vector<16x1xf32> to vector<16x1xf32>
    %310 = vector.broadcast %309 : vector<16x1xf32> to vector<16x25xf32>
    %311 = vector.broadcast %cst_188 : f32 to vector<16x25xf32>
    %312 = arith.select %307, %310, %311 : vector<16x25xi1>, vector<16x25xf32>
    %313 = arith.addf %305, %312 : vector<16x25xf32>
    %c13_i32 = arith.constant 13 : i32
    %314 = vector.broadcast %c13_i32 : i32 to vector<16x25xi32>
    %315 = arith.cmpi eq, %208, %314 : vector<16x25xi32>
    %316 = vector.extract_strided_slice %207 {offsets = [208, 0], sizes = [16, 1], strides = [1, 1]} : vector<400x1xf32> to vector<16x1xf32>
    %cst_189 = arith.constant 0.000000e+00 : f32
    %317 = vector.shape_cast %316 : vector<16x1xf32> to vector<16x1xf32>
    %318 = vector.broadcast %317 : vector<16x1xf32> to vector<16x25xf32>
    %319 = vector.broadcast %cst_189 : f32 to vector<16x25xf32>
    %320 = arith.select %315, %318, %319 : vector<16x25xi1>, vector<16x25xf32>
    %321 = arith.addf %313, %320 : vector<16x25xf32>
    %c14_i32 = arith.constant 14 : i32
    %322 = vector.broadcast %c14_i32 : i32 to vector<16x25xi32>
    %323 = arith.cmpi eq, %208, %322 : vector<16x25xi32>
    %324 = vector.extract_strided_slice %207 {offsets = [224, 0], sizes = [16, 1], strides = [1, 1]} : vector<400x1xf32> to vector<16x1xf32>
    %cst_190 = arith.constant 0.000000e+00 : f32
    %325 = vector.shape_cast %324 : vector<16x1xf32> to vector<16x1xf32>
    %326 = vector.broadcast %325 : vector<16x1xf32> to vector<16x25xf32>
    %327 = vector.broadcast %cst_190 : f32 to vector<16x25xf32>
    %328 = arith.select %323, %326, %327 : vector<16x25xi1>, vector<16x25xf32>
    %329 = arith.addf %321, %328 : vector<16x25xf32>
    %c15_i32 = arith.constant 15 : i32
    %330 = vector.broadcast %c15_i32 : i32 to vector<16x25xi32>
    %331 = arith.cmpi eq, %208, %330 : vector<16x25xi32>
    %332 = vector.extract_strided_slice %207 {offsets = [240, 0], sizes = [16, 1], strides = [1, 1]} : vector<400x1xf32> to vector<16x1xf32>
    %cst_191 = arith.constant 0.000000e+00 : f32
    %333 = vector.shape_cast %332 : vector<16x1xf32> to vector<16x1xf32>
    %334 = vector.broadcast %333 : vector<16x1xf32> to vector<16x25xf32>
    %335 = vector.broadcast %cst_191 : f32 to vector<16x25xf32>
    %336 = arith.select %331, %334, %335 : vector<16x25xi1>, vector<16x25xf32>
    %337 = arith.addf %329, %336 : vector<16x25xf32>
    %c16_i32 = arith.constant 16 : i32
    %338 = vector.broadcast %c16_i32 : i32 to vector<16x25xi32>
    %339 = arith.cmpi eq, %208, %338 : vector<16x25xi32>
    %340 = vector.extract_strided_slice %207 {offsets = [256, 0], sizes = [16, 1], strides = [1, 1]} : vector<400x1xf32> to vector<16x1xf32>
    %cst_192 = arith.constant 0.000000e+00 : f32
    %341 = vector.shape_cast %340 : vector<16x1xf32> to vector<16x1xf32>
    %342 = vector.broadcast %341 : vector<16x1xf32> to vector<16x25xf32>
    %343 = vector.broadcast %cst_192 : f32 to vector<16x25xf32>
    %344 = arith.select %339, %342, %343 : vector<16x25xi1>, vector<16x25xf32>
    %345 = arith.addf %337, %344 : vector<16x25xf32>
    %c17_i32 = arith.constant 17 : i32
    %346 = vector.broadcast %c17_i32 : i32 to vector<16x25xi32>
    %347 = arith.cmpi eq, %208, %346 : vector<16x25xi32>
    %348 = vector.extract_strided_slice %207 {offsets = [272, 0], sizes = [16, 1], strides = [1, 1]} : vector<400x1xf32> to vector<16x1xf32>
    %cst_193 = arith.constant 0.000000e+00 : f32
    %349 = vector.shape_cast %348 : vector<16x1xf32> to vector<16x1xf32>
    %350 = vector.broadcast %349 : vector<16x1xf32> to vector<16x25xf32>
    %351 = vector.broadcast %cst_193 : f32 to vector<16x25xf32>
    %352 = arith.select %347, %350, %351 : vector<16x25xi1>, vector<16x25xf32>
    %353 = arith.addf %345, %352 : vector<16x25xf32>
    %c18_i32 = arith.constant 18 : i32
    %354 = vector.broadcast %c18_i32 : i32 to vector<16x25xi32>
    %355 = arith.cmpi eq, %208, %354 : vector<16x25xi32>
    %356 = vector.extract_strided_slice %207 {offsets = [288, 0], sizes = [16, 1], strides = [1, 1]} : vector<400x1xf32> to vector<16x1xf32>
    %cst_194 = arith.constant 0.000000e+00 : f32
    %357 = vector.shape_cast %356 : vector<16x1xf32> to vector<16x1xf32>
    %358 = vector.broadcast %357 : vector<16x1xf32> to vector<16x25xf32>
    %359 = vector.broadcast %cst_194 : f32 to vector<16x25xf32>
    %360 = arith.select %355, %358, %359 : vector<16x25xi1>, vector<16x25xf32>
    %361 = arith.addf %353, %360 : vector<16x25xf32>
    %c19_i32 = arith.constant 19 : i32
    %362 = vector.broadcast %c19_i32 : i32 to vector<16x25xi32>
    %363 = arith.cmpi eq, %208, %362 : vector<16x25xi32>
    %364 = vector.extract_strided_slice %207 {offsets = [304, 0], sizes = [16, 1], strides = [1, 1]} : vector<400x1xf32> to vector<16x1xf32>
    %cst_195 = arith.constant 0.000000e+00 : f32
    %365 = vector.shape_cast %364 : vector<16x1xf32> to vector<16x1xf32>
    %366 = vector.broadcast %365 : vector<16x1xf32> to vector<16x25xf32>
    %367 = vector.broadcast %cst_195 : f32 to vector<16x25xf32>
    %368 = arith.select %363, %366, %367 : vector<16x25xi1>, vector<16x25xf32>
    %369 = arith.addf %361, %368 : vector<16x25xf32>
    %c20_i32 = arith.constant 20 : i32
    %370 = vector.broadcast %c20_i32 : i32 to vector<16x25xi32>
    %371 = arith.cmpi eq, %208, %370 : vector<16x25xi32>
    %372 = vector.extract_strided_slice %207 {offsets = [320, 0], sizes = [16, 1], strides = [1, 1]} : vector<400x1xf32> to vector<16x1xf32>
    %cst_196 = arith.constant 0.000000e+00 : f32
    %373 = vector.shape_cast %372 : vector<16x1xf32> to vector<16x1xf32>
    %374 = vector.broadcast %373 : vector<16x1xf32> to vector<16x25xf32>
    %375 = vector.broadcast %cst_196 : f32 to vector<16x25xf32>
    %376 = arith.select %371, %374, %375 : vector<16x25xi1>, vector<16x25xf32>
    %377 = arith.addf %369, %376 : vector<16x25xf32>
    %c21_i32 = arith.constant 21 : i32
    %378 = vector.broadcast %c21_i32 : i32 to vector<16x25xi32>
    %379 = arith.cmpi eq, %208, %378 : vector<16x25xi32>
    %380 = vector.extract_strided_slice %207 {offsets = [336, 0], sizes = [16, 1], strides = [1, 1]} : vector<400x1xf32> to vector<16x1xf32>
    %cst_197 = arith.constant 0.000000e+00 : f32
    %381 = vector.shape_cast %380 : vector<16x1xf32> to vector<16x1xf32>
    %382 = vector.broadcast %381 : vector<16x1xf32> to vector<16x25xf32>
    %383 = vector.broadcast %cst_197 : f32 to vector<16x25xf32>
    %384 = arith.select %379, %382, %383 : vector<16x25xi1>, vector<16x25xf32>
    %385 = arith.addf %377, %384 : vector<16x25xf32>
    %c22_i32 = arith.constant 22 : i32
    %386 = vector.broadcast %c22_i32 : i32 to vector<16x25xi32>
    %387 = arith.cmpi eq, %208, %386 : vector<16x25xi32>
    %388 = vector.extract_strided_slice %207 {offsets = [352, 0], sizes = [16, 1], strides = [1, 1]} : vector<400x1xf32> to vector<16x1xf32>
    %cst_198 = arith.constant 0.000000e+00 : f32
    %389 = vector.shape_cast %388 : vector<16x1xf32> to vector<16x1xf32>
    %390 = vector.broadcast %389 : vector<16x1xf32> to vector<16x25xf32>
    %391 = vector.broadcast %cst_198 : f32 to vector<16x25xf32>
    %392 = arith.select %387, %390, %391 : vector<16x25xi1>, vector<16x25xf32>
    %393 = arith.addf %385, %392 : vector<16x25xf32>
    %c23_i32 = arith.constant 23 : i32
    %394 = vector.broadcast %c23_i32 : i32 to vector<16x25xi32>
    %395 = arith.cmpi eq, %208, %394 : vector<16x25xi32>
    %396 = vector.extract_strided_slice %207 {offsets = [368, 0], sizes = [16, 1], strides = [1, 1]} : vector<400x1xf32> to vector<16x1xf32>
    %cst_199 = arith.constant 0.000000e+00 : f32
    %397 = vector.shape_cast %396 : vector<16x1xf32> to vector<16x1xf32>
    %398 = vector.broadcast %397 : vector<16x1xf32> to vector<16x25xf32>
    %399 = vector.broadcast %cst_199 : f32 to vector<16x25xf32>
    %400 = arith.select %395, %398, %399 : vector<16x25xi1>, vector<16x25xf32>
    %401 = arith.addf %393, %400 : vector<16x25xf32>
    %c24_i32 = arith.constant 24 : i32
    %402 = vector.broadcast %c24_i32 : i32 to vector<16x25xi32>
    %403 = arith.cmpi eq, %208, %402 : vector<16x25xi32>
    %404 = vector.extract_strided_slice %207 {offsets = [384, 0], sizes = [16, 1], strides = [1, 1]} : vector<400x1xf32> to vector<16x1xf32>
    %cst_200 = arith.constant 0.000000e+00 : f32
    %405 = vector.shape_cast %404 : vector<16x1xf32> to vector<16x1xf32>
    %406 = vector.broadcast %405 : vector<16x1xf32> to vector<16x25xf32>
    %407 = vector.broadcast %cst_200 : f32 to vector<16x25xf32>
    %408 = arith.select %403, %406, %407 : vector<16x25xi1>, vector<16x25xf32>
    %409 = arith.addf %401, %408 : vector<16x25xf32>
    %410 = arith.truncf %409 : vector<16x25xf32> to vector<16x25xbf16>
    %cst_201 = arith.constant 0.000000e+00 : f32
    %411 = vector.broadcast %cst_201 : f32 to vector<16x49xf32>
    %c0_202 = arith.constant 0 : index
    %c0_203 = arith.constant 0 : index
    %c0_204 = arith.constant 0 : index
    %412 = vector.load %arg15[%c0_202, %c0_203, %c0_204] : memref<9x25x49xbf16, #tpu.memory_space<vmem>>, vector<1x25x49xbf16>
    %413 = vector.shape_cast %412 : vector<1x25x49xbf16> to vector<25x49xbf16>
    %cst_205 = arith.constant dense<0.000000e+00> : vector<16x49xf32>
    %414 = tpu.matmul %410, %413, %cst_205 {dimension_numbers = #tpu.dot_dimension_numbers<[1], [0], [0], [1], [0, 0, 1, 1], [], []>} : vector<16x25xbf16>, vector<25x49xbf16>, vector<16x49xf32> -> vector<16x49xf32>
    %415 = arith.truncf %414 : vector<16x49xf32> to vector<16x49xbf16>
    %c0_206 = arith.constant 0 : index
    %c0_207 = arith.constant 0 : index
    %c0_208 = arith.constant 0 : index
    %416 = vector.load %arg16[%c0_206, %c0_207, %c0_208] : memref<9x16x16xbf16, #tpu.memory_space<vmem>>, vector<1x16x16xbf16>
    %417 = vector.shape_cast %416 : vector<1x16x16xbf16> to vector<16x16xbf16>
    %cst_209 = arith.constant dense<0.000000e+00> : vector<16x49xf32>
    %418 = tpu.matmul %417, %415, %cst_209 {dimension_numbers = #tpu.dot_dimension_numbers<[1], [0], [0], [1], [0, 0, 1, 1], [], []>} : vector<16x16xbf16>, vector<16x49xbf16>, vector<16x49xf32> -> vector<16x49xf32>
    %419 = arith.addf %411, %418 : vector<16x49xf32>
    %c1_210 = arith.constant 1 : index
    %c0_211 = arith.constant 0 : index
    %c0_212 = arith.constant 0 : index
    %420 = vector.load %arg15[%c1_210, %c0_211, %c0_212] : memref<9x25x49xbf16, #tpu.memory_space<vmem>>, vector<1x25x49xbf16>
    %421 = vector.shape_cast %420 : vector<1x25x49xbf16> to vector<25x49xbf16>
    %cst_213 = arith.constant dense<0.000000e+00> : vector<16x49xf32>
    %422 = tpu.matmul %410, %421, %cst_213 {dimension_numbers = #tpu.dot_dimension_numbers<[1], [0], [0], [1], [0, 0, 1, 1], [], []>} : vector<16x25xbf16>, vector<25x49xbf16>, vector<16x49xf32> -> vector<16x49xf32>
    %423 = arith.truncf %422 : vector<16x49xf32> to vector<16x49xbf16>
    %c1_214 = arith.constant 1 : index
    %c0_215 = arith.constant 0 : index
    %c0_216 = arith.constant 0 : index
    %424 = vector.load %arg16[%c1_214, %c0_215, %c0_216] : memref<9x16x16xbf16, #tpu.memory_space<vmem>>, vector<1x16x16xbf16>
    %425 = vector.shape_cast %424 : vector<1x16x16xbf16> to vector<16x16xbf16>
    %cst_217 = arith.constant dense<0.000000e+00> : vector<16x49xf32>
    %426 = tpu.matmul %425, %423, %cst_217 {dimension_numbers = #tpu.dot_dimension_numbers<[1], [0], [0], [1], [0, 0, 1, 1], [], []>} : vector<16x16xbf16>, vector<16x49xbf16>, vector<16x49xf32> -> vector<16x49xf32>
    %427 = arith.addf %419, %426 : vector<16x49xf32>
    %c2_218 = arith.constant 2 : index
    %c0_219 = arith.constant 0 : index
    %c0_220 = arith.constant 0 : index
    %428 = vector.load %arg15[%c2_218, %c0_219, %c0_220] : memref<9x25x49xbf16, #tpu.memory_space<vmem>>, vector<1x25x49xbf16>
    %429 = vector.shape_cast %428 : vector<1x25x49xbf16> to vector<25x49xbf16>
    %cst_221 = arith.constant dense<0.000000e+00> : vector<16x49xf32>
    %430 = tpu.matmul %410, %429, %cst_221 {dimension_numbers = #tpu.dot_dimension_numbers<[1], [0], [0], [1], [0, 0, 1, 1], [], []>} : vector<16x25xbf16>, vector<25x49xbf16>, vector<16x49xf32> -> vector<16x49xf32>
    %431 = arith.truncf %430 : vector<16x49xf32> to vector<16x49xbf16>
    %c2_222 = arith.constant 2 : index
    %c0_223 = arith.constant 0 : index
    %c0_224 = arith.constant 0 : index
    %432 = vector.load %arg16[%c2_222, %c0_223, %c0_224] : memref<9x16x16xbf16, #tpu.memory_space<vmem>>, vector<1x16x16xbf16>
    %433 = vector.shape_cast %432 : vector<1x16x16xbf16> to vector<16x16xbf16>
    %cst_225 = arith.constant dense<0.000000e+00> : vector<16x49xf32>
    %434 = tpu.matmul %433, %431, %cst_225 {dimension_numbers = #tpu.dot_dimension_numbers<[1], [0], [0], [1], [0, 0, 1, 1], [], []>} : vector<16x16xbf16>, vector<16x49xbf16>, vector<16x49xf32> -> vector<16x49xf32>
    %435 = arith.addf %427, %434 : vector<16x49xf32>
    %c3_226 = arith.constant 3 : index
    %c0_227 = arith.constant 0 : index
    %c0_228 = arith.constant 0 : index
    %436 = vector.load %arg15[%c3_226, %c0_227, %c0_228] : memref<9x25x49xbf16, #tpu.memory_space<vmem>>, vector<1x25x49xbf16>
    %437 = vector.shape_cast %436 : vector<1x25x49xbf16> to vector<25x49xbf16>
    %cst_229 = arith.constant dense<0.000000e+00> : vector<16x49xf32>
    %438 = tpu.matmul %410, %437, %cst_229 {dimension_numbers = #tpu.dot_dimension_numbers<[1], [0], [0], [1], [0, 0, 1, 1], [], []>} : vector<16x25xbf16>, vector<25x49xbf16>, vector<16x49xf32> -> vector<16x49xf32>
    %439 = arith.truncf %438 : vector<16x49xf32> to vector<16x49xbf16>
    %c3_230 = arith.constant 3 : index
    %c0_231 = arith.constant 0 : index
    %c0_232 = arith.constant 0 : index
    %440 = vector.load %arg16[%c3_230, %c0_231, %c0_232] : memref<9x16x16xbf16, #tpu.memory_space<vmem>>, vector<1x16x16xbf16>
    %441 = vector.shape_cast %440 : vector<1x16x16xbf16> to vector<16x16xbf16>
    %cst_233 = arith.constant dense<0.000000e+00> : vector<16x49xf32>
    %442 = tpu.matmul %441, %439, %cst_233 {dimension_numbers = #tpu.dot_dimension_numbers<[1], [0], [0], [1], [0, 0, 1, 1], [], []>} : vector<16x16xbf16>, vector<16x49xbf16>, vector<16x49xf32> -> vector<16x49xf32>
    %443 = arith.addf %435, %442 : vector<16x49xf32>
    %c4_234 = arith.constant 4 : index
    %c0_235 = arith.constant 0 : index
    %c0_236 = arith.constant 0 : index
    %444 = vector.load %arg15[%c4_234, %c0_235, %c0_236] : memref<9x25x49xbf16, #tpu.memory_space<vmem>>, vector<1x25x49xbf16>
    %445 = vector.shape_cast %444 : vector<1x25x49xbf16> to vector<25x49xbf16>
    %cst_237 = arith.constant dense<0.000000e+00> : vector<16x49xf32>
    %446 = tpu.matmul %410, %445, %cst_237 {dimension_numbers = #tpu.dot_dimension_numbers<[1], [0], [0], [1], [0, 0, 1, 1], [], []>} : vector<16x25xbf16>, vector<25x49xbf16>, vector<16x49xf32> -> vector<16x49xf32>
    %447 = arith.truncf %446 : vector<16x49xf32> to vector<16x49xbf16>
    %c4_238 = arith.constant 4 : index
    %c0_239 = arith.constant 0 : index
    %c0_240 = arith.constant 0 : index
    %448 = vector.load %arg16[%c4_238, %c0_239, %c0_240] : memref<9x16x16xbf16, #tpu.memory_space<vmem>>, vector<1x16x16xbf16>
    %449 = vector.shape_cast %448 : vector<1x16x16xbf16> to vector<16x16xbf16>
    %cst_241 = arith.constant dense<0.000000e+00> : vector<16x49xf32>
    %450 = tpu.matmul %449, %447, %cst_241 {dimension_numbers = #tpu.dot_dimension_numbers<[1], [0], [0], [1], [0, 0, 1, 1], [], []>} : vector<16x16xbf16>, vector<16x49xbf16>, vector<16x49xf32> -> vector<16x49xf32>
    %451 = arith.addf %443, %450 : vector<16x49xf32>
    %c5_242 = arith.constant 5 : index
    %c0_243 = arith.constant 0 : index
    %c0_244 = arith.constant 0 : index
    %452 = vector.load %arg15[%c5_242, %c0_243, %c0_244] : memref<9x25x49xbf16, #tpu.memory_space<vmem>>, vector<1x25x49xbf16>
    %453 = vector.shape_cast %452 : vector<1x25x49xbf16> to vector<25x49xbf16>
    %cst_245 = arith.constant dense<0.000000e+00> : vector<16x49xf32>
    %454 = tpu.matmul %410, %453, %cst_245 {dimension_numbers = #tpu.dot_dimension_numbers<[1], [0], [0], [1], [0, 0, 1, 1], [], []>} : vector<16x25xbf16>, vector<25x49xbf16>, vector<16x49xf32> -> vector<16x49xf32>
    %455 = arith.truncf %454 : vector<16x49xf32> to vector<16x49xbf16>
    %c5_246 = arith.constant 5 : index
    %c0_247 = arith.constant 0 : index
    %c0_248 = arith.constant 0 : index
    %456 = vector.load %arg16[%c5_246, %c0_247, %c0_248] : memref<9x16x16xbf16, #tpu.memory_space<vmem>>, vector<1x16x16xbf16>
    %457 = vector.shape_cast %456 : vector<1x16x16xbf16> to vector<16x16xbf16>
    %cst_249 = arith.constant dense<0.000000e+00> : vector<16x49xf32>
    %458 = tpu.matmul %457, %455, %cst_249 {dimension_numbers = #tpu.dot_dimension_numbers<[1], [0], [0], [1], [0, 0, 1, 1], [], []>} : vector<16x16xbf16>, vector<16x49xbf16>, vector<16x49xf32> -> vector<16x49xf32>
    %459 = arith.addf %451, %458 : vector<16x49xf32>
    %c6_250 = arith.constant 6 : index
    %c0_251 = arith.constant 0 : index
    %c0_252 = arith.constant 0 : index
    %460 = vector.load %arg15[%c6_250, %c0_251, %c0_252] : memref<9x25x49xbf16, #tpu.memory_space<vmem>>, vector<1x25x49xbf16>
    %461 = vector.shape_cast %460 : vector<1x25x49xbf16> to vector<25x49xbf16>
    %cst_253 = arith.constant dense<0.000000e+00> : vector<16x49xf32>
    %462 = tpu.matmul %410, %461, %cst_253 {dimension_numbers = #tpu.dot_dimension_numbers<[1], [0], [0], [1], [0, 0, 1, 1], [], []>} : vector<16x25xbf16>, vector<25x49xbf16>, vector<16x49xf32> -> vector<16x49xf32>
    %463 = arith.truncf %462 : vector<16x49xf32> to vector<16x49xbf16>
    %c6_254 = arith.constant 6 : index
    %c0_255 = arith.constant 0 : index
    %c0_256 = arith.constant 0 : index
    %464 = vector.load %arg16[%c6_254, %c0_255, %c0_256] : memref<9x16x16xbf16, #tpu.memory_space<vmem>>, vector<1x16x16xbf16>
    %465 = vector.shape_cast %464 : vector<1x16x16xbf16> to vector<16x16xbf16>
    %cst_257 = arith.constant dense<0.000000e+00> : vector<16x49xf32>
    %466 = tpu.matmul %465, %463, %cst_257 {dimension_numbers = #tpu.dot_dimension_numbers<[1], [0], [0], [1], [0, 0, 1, 1], [], []>} : vector<16x16xbf16>, vector<16x49xbf16>, vector<16x49xf32> -> vector<16x49xf32>
    %467 = arith.addf %459, %466 : vector<16x49xf32>
    %c7_258 = arith.constant 7 : index
    %c0_259 = arith.constant 0 : index
    %c0_260 = arith.constant 0 : index
    %468 = vector.load %arg15[%c7_258, %c0_259, %c0_260] : memref<9x25x49xbf16, #tpu.memory_space<vmem>>, vector<1x25x49xbf16>
    %469 = vector.shape_cast %468 : vector<1x25x49xbf16> to vector<25x49xbf16>
    %cst_261 = arith.constant dense<0.000000e+00> : vector<16x49xf32>
    %470 = tpu.matmul %410, %469, %cst_261 {dimension_numbers = #tpu.dot_dimension_numbers<[1], [0], [0], [1], [0, 0, 1, 1], [], []>} : vector<16x25xbf16>, vector<25x49xbf16>, vector<16x49xf32> -> vector<16x49xf32>
    %471 = arith.truncf %470 : vector<16x49xf32> to vector<16x49xbf16>
    %c7_262 = arith.constant 7 : index
    %c0_263 = arith.constant 0 : index
    %c0_264 = arith.constant 0 : index
    %472 = vector.load %arg16[%c7_262, %c0_263, %c0_264] : memref<9x16x16xbf16, #tpu.memory_space<vmem>>, vector<1x16x16xbf16>
    %473 = vector.shape_cast %472 : vector<1x16x16xbf16> to vector<16x16xbf16>
    %cst_265 = arith.constant dense<0.000000e+00> : vector<16x49xf32>
    %474 = tpu.matmul %473, %471, %cst_265 {dimension_numbers = #tpu.dot_dimension_numbers<[1], [0], [0], [1], [0, 0, 1, 1], [], []>} : vector<16x16xbf16>, vector<16x49xbf16>, vector<16x49xf32> -> vector<16x49xf32>
    %475 = arith.addf %467, %474 : vector<16x49xf32>
    %c8_266 = arith.constant 8 : index
    %c0_267 = arith.constant 0 : index
    %c0_268 = arith.constant 0 : index
    %476 = vector.load %arg15[%c8_266, %c0_267, %c0_268] : memref<9x25x49xbf16, #tpu.memory_space<vmem>>, vector<1x25x49xbf16>
    %477 = vector.shape_cast %476 : vector<1x25x49xbf16> to vector<25x49xbf16>
    %cst_269 = arith.constant dense<0.000000e+00> : vector<16x49xf32>
    %478 = tpu.matmul %410, %477, %cst_269 {dimension_numbers = #tpu.dot_dimension_numbers<[1], [0], [0], [1], [0, 0, 1, 1], [], []>} : vector<16x25xbf16>, vector<25x49xbf16>, vector<16x49xf32> -> vector<16x49xf32>
    %479 = arith.truncf %478 : vector<16x49xf32> to vector<16x49xbf16>
    %c8_270 = arith.constant 8 : index
    %c0_271 = arith.constant 0 : index
    %c0_272 = arith.constant 0 : index
    %480 = vector.load %arg16[%c8_270, %c0_271, %c0_272] : memref<9x16x16xbf16, #tpu.memory_space<vmem>>, vector<1x16x16xbf16>
    %481 = vector.shape_cast %480 : vector<1x16x16xbf16> to vector<16x16xbf16>
    %cst_273 = arith.constant dense<0.000000e+00> : vector<16x49xf32>
    %482 = tpu.matmul %481, %479, %cst_273 {dimension_numbers = #tpu.dot_dimension_numbers<[1], [0], [0], [1], [0, 0, 1, 1], [], []>} : vector<16x16xbf16>, vector<16x49xbf16>, vector<16x49xf32> -> vector<16x49xf32>
    %483 = arith.addf %475, %482 : vector<16x49xf32>
    %c0_274 = arith.constant 0 : index
    %c0_275 = arith.constant 0 : index
    %484 = vector.load %arg17[%c0_274, %c0_275] : memref<16x1xf32, #tpu.memory_space<vmem>>, vector<16x1xf32>
    %485 = vector.broadcast %484 : vector<16x1xf32> to vector<16x49xf32>
    %486 = arith.addf %483, %485 : vector<16x49xf32>
    %cst_276 = arith.constant 0.000000e+00 : f32
    %487 = vector.broadcast %cst_276 : f32 to vector<16x49xf32>
    %488 = arith.maximumf %486, %487 : vector<16x49xf32>
    %489 = arith.truncf %488 : vector<16x49xf32> to vector<16x49xbf16>
    %cst_277 = arith.constant 0.000000e+00 : f32
    %490 = vector.broadcast %cst_277 : f32 to vector<8x196xf32>
    %c0_278 = arith.constant 0 : index
    %c0_279 = arith.constant 0 : index
    %c0_280 = arith.constant 0 : index
    %491 = vector.load %arg18[%c0_278, %c0_279, %c0_280] : memref<9x49x196xbf16, #tpu.memory_space<vmem>>, vector<1x49x196xbf16>
    %492 = vector.shape_cast %491 : vector<1x49x196xbf16> to vector<49x196xbf16>
    %cst_281 = arith.constant dense<0.000000e+00> : vector<16x196xf32>
    %493 = tpu.matmul %489, %492, %cst_281 {dimension_numbers = #tpu.dot_dimension_numbers<[1], [0], [0], [1], [0, 0, 1, 1], [], []>} : vector<16x49xbf16>, vector<49x196xbf16>, vector<16x196xf32> -> vector<16x196xf32>
    %494 = arith.truncf %493 : vector<16x196xf32> to vector<16x196xbf16>
    %c0_282 = arith.constant 0 : index
    %c0_283 = arith.constant 0 : index
    %c0_284 = arith.constant 0 : index
    %495 = vector.load %arg19[%c0_282, %c0_283, %c0_284] : memref<9x8x16xbf16, #tpu.memory_space<vmem>>, vector<1x8x16xbf16>
    %496 = vector.shape_cast %495 : vector<1x8x16xbf16> to vector<8x16xbf16>
    %cst_285 = arith.constant dense<0.000000e+00> : vector<8x196xf32>
    %497 = tpu.matmul %496, %494, %cst_285 {dimension_numbers = #tpu.dot_dimension_numbers<[1], [0], [0], [1], [0, 0, 1, 1], [], []>} : vector<8x16xbf16>, vector<16x196xbf16>, vector<8x196xf32> -> vector<8x196xf32>
    %498 = arith.addf %490, %497 : vector<8x196xf32>
    %c1_286 = arith.constant 1 : index
    %c0_287 = arith.constant 0 : index
    %c0_288 = arith.constant 0 : index
    %499 = vector.load %arg18[%c1_286, %c0_287, %c0_288] : memref<9x49x196xbf16, #tpu.memory_space<vmem>>, vector<1x49x196xbf16>
    %500 = vector.shape_cast %499 : vector<1x49x196xbf16> to vector<49x196xbf16>
    %cst_289 = arith.constant dense<0.000000e+00> : vector<16x196xf32>
    %501 = tpu.matmul %489, %500, %cst_289 {dimension_numbers = #tpu.dot_dimension_numbers<[1], [0], [0], [1], [0, 0, 1, 1], [], []>} : vector<16x49xbf16>, vector<49x196xbf16>, vector<16x196xf32> -> vector<16x196xf32>
    %502 = arith.truncf %501 : vector<16x196xf32> to vector<16x196xbf16>
    %c1_290 = arith.constant 1 : index
    %c0_291 = arith.constant 0 : index
    %c0_292 = arith.constant 0 : index
    %503 = vector.load %arg19[%c1_290, %c0_291, %c0_292] : memref<9x8x16xbf16, #tpu.memory_space<vmem>>, vector<1x8x16xbf16>
    %504 = vector.shape_cast %503 : vector<1x8x16xbf16> to vector<8x16xbf16>
    %cst_293 = arith.constant dense<0.000000e+00> : vector<8x196xf32>
    %505 = tpu.matmul %504, %502, %cst_293 {dimension_numbers = #tpu.dot_dimension_numbers<[1], [0], [0], [1], [0, 0, 1, 1], [], []>} : vector<8x16xbf16>, vector<16x196xbf16>, vector<8x196xf32> -> vector<8x196xf32>
    %506 = arith.addf %498, %505 : vector<8x196xf32>
    %c2_294 = arith.constant 2 : index
    %c0_295 = arith.constant 0 : index
    %c0_296 = arith.constant 0 : index
    %507 = vector.load %arg18[%c2_294, %c0_295, %c0_296] : memref<9x49x196xbf16, #tpu.memory_space<vmem>>, vector<1x49x196xbf16>
    %508 = vector.shape_cast %507 : vector<1x49x196xbf16> to vector<49x196xbf16>
    %cst_297 = arith.constant dense<0.000000e+00> : vector<16x196xf32>
    %509 = tpu.matmul %489, %508, %cst_297 {dimension_numbers = #tpu.dot_dimension_numbers<[1], [0], [0], [1], [0, 0, 1, 1], [], []>} : vector<16x49xbf16>, vector<49x196xbf16>, vector<16x196xf32> -> vector<16x196xf32>
    %510 = arith.truncf %509 : vector<16x196xf32> to vector<16x196xbf16>
    %c2_298 = arith.constant 2 : index
    %c0_299 = arith.constant 0 : index
    %c0_300 = arith.constant 0 : index
    %511 = vector.load %arg19[%c2_298, %c0_299, %c0_300] : memref<9x8x16xbf16, #tpu.memory_space<vmem>>, vector<1x8x16xbf16>
    %512 = vector.shape_cast %511 : vector<1x8x16xbf16> to vector<8x16xbf16>
    %cst_301 = arith.constant dense<0.000000e+00> : vector<8x196xf32>
    %513 = tpu.matmul %512, %510, %cst_301 {dimension_numbers = #tpu.dot_dimension_numbers<[1], [0], [0], [1], [0, 0, 1, 1], [], []>} : vector<8x16xbf16>, vector<16x196xbf16>, vector<8x196xf32> -> vector<8x196xf32>
    %514 = arith.addf %506, %513 : vector<8x196xf32>
    %c3_302 = arith.constant 3 : index
    %c0_303 = arith.constant 0 : index
    %c0_304 = arith.constant 0 : index
    %515 = vector.load %arg18[%c3_302, %c0_303, %c0_304] : memref<9x49x196xbf16, #tpu.memory_space<vmem>>, vector<1x49x196xbf16>
    %516 = vector.shape_cast %515 : vector<1x49x196xbf16> to vector<49x196xbf16>
    %cst_305 = arith.constant dense<0.000000e+00> : vector<16x196xf32>
    %517 = tpu.matmul %489, %516, %cst_305 {dimension_numbers = #tpu.dot_dimension_numbers<[1], [0], [0], [1], [0, 0, 1, 1], [], []>} : vector<16x49xbf16>, vector<49x196xbf16>, vector<16x196xf32> -> vector<16x196xf32>
    %518 = arith.truncf %517 : vector<16x196xf32> to vector<16x196xbf16>
    %c3_306 = arith.constant 3 : index
    %c0_307 = arith.constant 0 : index
    %c0_308 = arith.constant 0 : index
    %519 = vector.load %arg19[%c3_306, %c0_307, %c0_308] : memref<9x8x16xbf16, #tpu.memory_space<vmem>>, vector<1x8x16xbf16>
    %520 = vector.shape_cast %519 : vector<1x8x16xbf16> to vector<8x16xbf16>
    %cst_309 = arith.constant dense<0.000000e+00> : vector<8x196xf32>
    %521 = tpu.matmul %520, %518, %cst_309 {dimension_numbers = #tpu.dot_dimension_numbers<[1], [0], [0], [1], [0, 0, 1, 1], [], []>} : vector<8x16xbf16>, vector<16x196xbf16>, vector<8x196xf32> -> vector<8x196xf32>
    %522 = arith.addf %514, %521 : vector<8x196xf32>
    %c4_310 = arith.constant 4 : index
    %c0_311 = arith.constant 0 : index
    %c0_312 = arith.constant 0 : index
    %523 = vector.load %arg18[%c4_310, %c0_311, %c0_312] : memref<9x49x196xbf16, #tpu.memory_space<vmem>>, vector<1x49x196xbf16>
    %524 = vector.shape_cast %523 : vector<1x49x196xbf16> to vector<49x196xbf16>
    %cst_313 = arith.constant dense<0.000000e+00> : vector<16x196xf32>
    %525 = tpu.matmul %489, %524, %cst_313 {dimension_numbers = #tpu.dot_dimension_numbers<[1], [0], [0], [1], [0, 0, 1, 1], [], []>} : vector<16x49xbf16>, vector<49x196xbf16>, vector<16x196xf32> -> vector<16x196xf32>
    %526 = arith.truncf %525 : vector<16x196xf32> to vector<16x196xbf16>
    %c4_314 = arith.constant 4 : index
    %c0_315 = arith.constant 0 : index
    %c0_316 = arith.constant 0 : index
    %527 = vector.load %arg19[%c4_314, %c0_315, %c0_316] : memref<9x8x16xbf16, #tpu.memory_space<vmem>>, vector<1x8x16xbf16>
    %528 = vector.shape_cast %527 : vector<1x8x16xbf16> to vector<8x16xbf16>
    %cst_317 = arith.constant dense<0.000000e+00> : vector<8x196xf32>
    %529 = tpu.matmul %528, %526, %cst_317 {dimension_numbers = #tpu.dot_dimension_numbers<[1], [0], [0], [1], [0, 0, 1, 1], [], []>} : vector<8x16xbf16>, vector<16x196xbf16>, vector<8x196xf32> -> vector<8x196xf32>
    %530 = arith.addf %522, %529 : vector<8x196xf32>
    %c5_318 = arith.constant 5 : index
    %c0_319 = arith.constant 0 : index
    %c0_320 = arith.constant 0 : index
    %531 = vector.load %arg18[%c5_318, %c0_319, %c0_320] : memref<9x49x196xbf16, #tpu.memory_space<vmem>>, vector<1x49x196xbf16>
    %532 = vector.shape_cast %531 : vector<1x49x196xbf16> to vector<49x196xbf16>
    %cst_321 = arith.constant dense<0.000000e+00> : vector<16x196xf32>
    %533 = tpu.matmul %489, %532, %cst_321 {dimension_numbers = #tpu.dot_dimension_numbers<[1], [0], [0], [1], [0, 0, 1, 1], [], []>} : vector<16x49xbf16>, vector<49x196xbf16>, vector<16x196xf32> -> vector<16x196xf32>
    %534 = arith.truncf %533 : vector<16x196xf32> to vector<16x196xbf16>
    %c5_322 = arith.constant 5 : index
    %c0_323 = arith.constant 0 : index
    %c0_324 = arith.constant 0 : index
    %535 = vector.load %arg19[%c5_322, %c0_323, %c0_324] : memref<9x8x16xbf16, #tpu.memory_space<vmem>>, vector<1x8x16xbf16>
    %536 = vector.shape_cast %535 : vector<1x8x16xbf16> to vector<8x16xbf16>
    %cst_325 = arith.constant dense<0.000000e+00> : vector<8x196xf32>
    %537 = tpu.matmul %536, %534, %cst_325 {dimension_numbers = #tpu.dot_dimension_numbers<[1], [0], [0], [1], [0, 0, 1, 1], [], []>} : vector<8x16xbf16>, vector<16x196xbf16>, vector<8x196xf32> -> vector<8x196xf32>
    %538 = arith.addf %530, %537 : vector<8x196xf32>
    %c6_326 = arith.constant 6 : index
    %c0_327 = arith.constant 0 : index
    %c0_328 = arith.constant 0 : index
    %539 = vector.load %arg18[%c6_326, %c0_327, %c0_328] : memref<9x49x196xbf16, #tpu.memory_space<vmem>>, vector<1x49x196xbf16>
    %540 = vector.shape_cast %539 : vector<1x49x196xbf16> to vector<49x196xbf16>
    %cst_329 = arith.constant dense<0.000000e+00> : vector<16x196xf32>
    %541 = tpu.matmul %489, %540, %cst_329 {dimension_numbers = #tpu.dot_dimension_numbers<[1], [0], [0], [1], [0, 0, 1, 1], [], []>} : vector<16x49xbf16>, vector<49x196xbf16>, vector<16x196xf32> -> vector<16x196xf32>
    %542 = arith.truncf %541 : vector<16x196xf32> to vector<16x196xbf16>
    %c6_330 = arith.constant 6 : index
    %c0_331 = arith.constant 0 : index
    %c0_332 = arith.constant 0 : index
    %543 = vector.load %arg19[%c6_330, %c0_331, %c0_332] : memref<9x8x16xbf16, #tpu.memory_space<vmem>>, vector<1x8x16xbf16>
    %544 = vector.shape_cast %543 : vector<1x8x16xbf16> to vector<8x16xbf16>
    %cst_333 = arith.constant dense<0.000000e+00> : vector<8x196xf32>
    %545 = tpu.matmul %544, %542, %cst_333 {dimension_numbers = #tpu.dot_dimension_numbers<[1], [0], [0], [1], [0, 0, 1, 1], [], []>} : vector<8x16xbf16>, vector<16x196xbf16>, vector<8x196xf32> -> vector<8x196xf32>
    %546 = arith.addf %538, %545 : vector<8x196xf32>
    %c7_334 = arith.constant 7 : index
    %c0_335 = arith.constant 0 : index
    %c0_336 = arith.constant 0 : index
    %547 = vector.load %arg18[%c7_334, %c0_335, %c0_336] : memref<9x49x196xbf16, #tpu.memory_space<vmem>>, vector<1x49x196xbf16>
    %548 = vector.shape_cast %547 : vector<1x49x196xbf16> to vector<49x196xbf16>
    %cst_337 = arith.constant dense<0.000000e+00> : vector<16x196xf32>
    %549 = tpu.matmul %489, %548, %cst_337 {dimension_numbers = #tpu.dot_dimension_numbers<[1], [0], [0], [1], [0, 0, 1, 1], [], []>} : vector<16x49xbf16>, vector<49x196xbf16>, vector<16x196xf32> -> vector<16x196xf32>
    %550 = arith.truncf %549 : vector<16x196xf32> to vector<16x196xbf16>
    %c7_338 = arith.constant 7 : index
    %c0_339 = arith.constant 0 : index
    %c0_340 = arith.constant 0 : index
    %551 = vector.load %arg19[%c7_338, %c0_339, %c0_340] : memref<9x8x16xbf16, #tpu.memory_space<vmem>>, vector<1x8x16xbf16>
    %552 = vector.shape_cast %551 : vector<1x8x16xbf16> to vector<8x16xbf16>
    %cst_341 = arith.constant dense<0.000000e+00> : vector<8x196xf32>
    %553 = tpu.matmul %552, %550, %cst_341 {dimension_numbers = #tpu.dot_dimension_numbers<[1], [0], [0], [1], [0, 0, 1, 1], [], []>} : vector<8x16xbf16>, vector<16x196xbf16>, vector<8x196xf32> -> vector<8x196xf32>
    %554 = arith.addf %546, %553 : vector<8x196xf32>
    %c8_342 = arith.constant 8 : index
    %c0_343 = arith.constant 0 : index
    %c0_344 = arith.constant 0 : index
    %555 = vector.load %arg18[%c8_342, %c0_343, %c0_344] : memref<9x49x196xbf16, #tpu.memory_space<vmem>>, vector<1x49x196xbf16>
    %556 = vector.shape_cast %555 : vector<1x49x196xbf16> to vector<49x196xbf16>
    %cst_345 = arith.constant dense<0.000000e+00> : vector<16x196xf32>
    %557 = tpu.matmul %489, %556, %cst_345 {dimension_numbers = #tpu.dot_dimension_numbers<[1], [0], [0], [1], [0, 0, 1, 1], [], []>} : vector<16x49xbf16>, vector<49x196xbf16>, vector<16x196xf32> -> vector<16x196xf32>
    %558 = arith.truncf %557 : vector<16x196xf32> to vector<16x196xbf16>
    %c8_346 = arith.constant 8 : index
    %c0_347 = arith.constant 0 : index
    %c0_348 = arith.constant 0 : index
    %559 = vector.load %arg19[%c8_346, %c0_347, %c0_348] : memref<9x8x16xbf16, #tpu.memory_space<vmem>>, vector<1x8x16xbf16>
    %560 = vector.shape_cast %559 : vector<1x8x16xbf16> to vector<8x16xbf16>
    %cst_349 = arith.constant dense<0.000000e+00> : vector<8x196xf32>
    %561 = tpu.matmul %560, %558, %cst_349 {dimension_numbers = #tpu.dot_dimension_numbers<[1], [0], [0], [1], [0, 0, 1, 1], [], []>} : vector<8x16xbf16>, vector<16x196xbf16>, vector<8x196xf32> -> vector<8x196xf32>
    %562 = arith.addf %554, %561 : vector<8x196xf32>
    %c0_350 = arith.constant 0 : index
    %c0_351 = arith.constant 0 : index
    %563 = vector.load %arg20[%c0_350, %c0_351] : memref<8x1xf32, #tpu.memory_space<vmem>>, vector<8x1xf32>
    %564 = vector.broadcast %563 : vector<8x1xf32> to vector<8x196xf32>
    %565 = arith.addf %562, %564 : vector<8x196xf32>
    %cst_352 = arith.constant 0.000000e+00 : f32
    %566 = vector.broadcast %cst_352 : f32 to vector<8x196xf32>
    %567 = arith.maximumf %565, %566 : vector<8x196xf32>
    %568 = arith.truncf %567 : vector<8x196xf32> to vector<8x196xbf16>
    %c0_353 = arith.constant 0 : index
    %c0_354 = arith.constant 0 : index
    %c0_355 = arith.constant 0 : index
    %569 = vector.load %arg21[%c0_353, %c0_354, %c0_355] : memref<3x196x196xbf16, #tpu.memory_space<vmem>>, vector<1x196x196xbf16>
    %570 = vector.shape_cast %569 : vector<1x196x196xbf16> to vector<196x196xbf16>
    %cst_356 = arith.constant dense<0.000000e+00> : vector<8x196xf32>
    %571 = tpu.matmul %568, %570, %cst_356 {dimension_numbers = #tpu.dot_dimension_numbers<[1], [0], [0], [1], [0, 0, 1, 1], [], []>} : vector<8x196xbf16>, vector<196x196xbf16>, vector<8x196xf32> -> vector<8x196xf32>
    %572 = arith.truncf %571 : vector<8x196xf32> to vector<8x196xbf16>
    %c1_357 = arith.constant 1 : index
    %c0_358 = arith.constant 0 : index
    %c0_359 = arith.constant 0 : index
    %573 = vector.load %arg21[%c1_357, %c0_358, %c0_359] : memref<3x196x196xbf16, #tpu.memory_space<vmem>>, vector<1x196x196xbf16>
    %574 = vector.shape_cast %573 : vector<1x196x196xbf16> to vector<196x196xbf16>
    %cst_360 = arith.constant dense<0.000000e+00> : vector<8x196xf32>
    %575 = tpu.matmul %568, %574, %cst_360 {dimension_numbers = #tpu.dot_dimension_numbers<[1], [0], [0], [1], [0, 0, 1, 1], [], []>} : vector<8x196xbf16>, vector<196x196xbf16>, vector<8x196xf32> -> vector<8x196xf32>
    %576 = arith.truncf %575 : vector<8x196xf32> to vector<8x196xbf16>
    %c2_361 = arith.constant 2 : index
    %c0_362 = arith.constant 0 : index
    %c0_363 = arith.constant 0 : index
    %577 = vector.load %arg21[%c2_361, %c0_362, %c0_363] : memref<3x196x196xbf16, #tpu.memory_space<vmem>>, vector<1x196x196xbf16>
    %578 = vector.shape_cast %577 : vector<1x196x196xbf16> to vector<196x196xbf16>
    %cst_364 = arith.constant dense<0.000000e+00> : vector<8x196xf32>
    %579 = tpu.matmul %568, %578, %cst_364 {dimension_numbers = #tpu.dot_dimension_numbers<[1], [0], [0], [1], [0, 0, 1, 1], [], []>} : vector<8x196xbf16>, vector<196x196xbf16>, vector<8x196xf32> -> vector<8x196xf32>
    %580 = arith.truncf %579 : vector<8x196xf32> to vector<8x196xbf16>
    %cst_365 = arith.constant 0.000000e+00 : f32
    %581 = vector.broadcast %cst_365 : f32 to vector<4x196xf32>
    %c0_366 = arith.constant 0 : index
    %c0_367 = arith.constant 0 : index
    %c0_368 = arith.constant 0 : index
    %582 = vector.load %arg22[%c0_366, %c0_367, %c0_368] : memref<4x4x8xbf16, #tpu.memory_space<vmem>>, vector<1x4x8xbf16>
    %583 = vector.shape_cast %582 : vector<1x4x8xbf16> to vector<4x8xbf16>
    %cst_369 = arith.constant dense<0.000000e+00> : vector<4x196xf32>
    %584 = tpu.matmul %583, %568, %cst_369 {dimension_numbers = #tpu.dot_dimension_numbers<[1], [0], [0], [1], [0, 0, 1, 1], [], []>} : vector<4x8xbf16>, vector<8x196xbf16>, vector<4x196xf32> -> vector<4x196xf32>
    %585 = arith.addf %581, %584 : vector<4x196xf32>
    %c1_370 = arith.constant 1 : index
    %c0_371 = arith.constant 0 : index
    %c0_372 = arith.constant 0 : index
    %586 = vector.load %arg22[%c1_370, %c0_371, %c0_372] : memref<4x4x8xbf16, #tpu.memory_space<vmem>>, vector<1x4x8xbf16>
    %587 = vector.shape_cast %586 : vector<1x4x8xbf16> to vector<4x8xbf16>
    %cst_373 = arith.constant dense<0.000000e+00> : vector<4x196xf32>
    %588 = tpu.matmul %587, %572, %cst_373 {dimension_numbers = #tpu.dot_dimension_numbers<[1], [0], [0], [1], [0, 0, 1, 1], [], []>} : vector<4x8xbf16>, vector<8x196xbf16>, vector<4x196xf32> -> vector<4x196xf32>
    %589 = arith.addf %585, %588 : vector<4x196xf32>
    %c2_374 = arith.constant 2 : index
    %c0_375 = arith.constant 0 : index
    %c0_376 = arith.constant 0 : index
    %590 = vector.load %arg22[%c2_374, %c0_375, %c0_376] : memref<4x4x8xbf16, #tpu.memory_space<vmem>>, vector<1x4x8xbf16>
    %591 = vector.shape_cast %590 : vector<1x4x8xbf16> to vector<4x8xbf16>
    %cst_377 = arith.constant dense<0.000000e+00> : vector<4x196xf32>
    %592 = tpu.matmul %591, %576, %cst_377 {dimension_numbers = #tpu.dot_dimension_numbers<[1], [0], [0], [1], [0, 0, 1, 1], [], []>} : vector<4x8xbf16>, vector<8x196xbf16>, vector<4x196xf32> -> vector<4x196xf32>
    %593 = arith.addf %589, %592 : vector<4x196xf32>
    %c3_378 = arith.constant 3 : index
    %c0_379 = arith.constant 0 : index
    %c0_380 = arith.constant 0 : index
    %594 = vector.load %arg22[%c3_378, %c0_379, %c0_380] : memref<4x4x8xbf16, #tpu.memory_space<vmem>>, vector<1x4x8xbf16>
    %595 = vector.shape_cast %594 : vector<1x4x8xbf16> to vector<4x8xbf16>
    %cst_381 = arith.constant dense<0.000000e+00> : vector<4x196xf32>
    %596 = tpu.matmul %595, %580, %cst_381 {dimension_numbers = #tpu.dot_dimension_numbers<[1], [0], [0], [1], [0, 0, 1, 1], [], []>} : vector<4x8xbf16>, vector<8x196xbf16>, vector<4x196xf32> -> vector<4x196xf32>
    %597 = arith.addf %593, %596 : vector<4x196xf32>
    %c0_382 = arith.constant 0 : index
    %c0_383 = arith.constant 0 : index
    %598 = vector.load %arg23[%c0_382, %c0_383] : memref<1x1xf32, #tpu.memory_space<vmem>>, vector<1x1xf32>
    %599 = vector.broadcast %598 : vector<1x1xf32> to vector<4x196xf32>
    %600 = arith.addf %597, %599 : vector<4x196xf32>
    %cst_384 = arith.constant 0.000000e+00 : f32
    %601 = vector.broadcast %cst_384 : f32 to vector<4x196xf32>
    %602 = arith.subf %601, %600 : vector<4x196xf32>
    %603 = math.exp %602 : vector<4x196xf32>
    %cst_385 = arith.constant 1.000000e+00 : f32
    %604 = vector.broadcast %cst_385 : f32 to vector<4x196xf32>
    %605 = arith.addf %604, %603 : vector<4x196xf32>
    %cst_386 = arith.constant 1.000000e+00 : f32
    %606 = vector.broadcast %cst_386 : f32 to vector<4x196xf32>
    %607 = arith.divf %606, %605 : vector<4x196xf32>
    %c0_387 = arith.constant 0 : index
    %c0_388 = arith.constant 0 : index
    %c0_389 = arith.constant 0 : index
    %608 = vector.load %arg24[%c0_387, %c0_388, %c0_389] : memref<1x4x196xf32, #tpu.memory_space<vmem>>, vector<1x4x196xf32>
    %609 = vector.shape_cast %608 : vector<1x4x196xf32> to vector<4x196xf32>
    %610 = vector.shape_cast %607 : vector<4x196xf32> to vector<1x4x196xf32>
    tpu.vector_store %arg24[%c0_387, %c0_388, %c0_389], %610 {strides = array<i32>} : memref<1x4x196xf32, #tpu.memory_space<vmem>>, vector<1x4x196xf32>,
    return
  }
  func.func @transform_0(%arg0: i32) -> (i32, i32, i32) {
    %c0_i32 = arith.constant 0 : i32
    %c0_i32_0 = arith.constant 0 : i32
    %c0_i32_1 = arith.constant 0 : i32
    return %arg0, %c0_i32, %c0_i32_0 : i32, i32, i32
  }
  func.func @transform_1(%arg0: i32) -> (i32, i32) {
    %c0_i32 = arith.constant 0 : i32
    %c0_i32_0 = arith.constant 0 : i32
    %c0_i32_1 = arith.constant 0 : i32
    return %c0_i32, %c0_i32_0 : i32, i32
  }
  func.func @transform_2(%arg0: i32) -> (i32, i32) {
    %c0_i32 = arith.constant 0 : i32
    %c0_i32_0 = arith.constant 0 : i32
    %c0_i32_1 = arith.constant 0 : i32
    return %c0_i32, %c0_i32_0 : i32, i32
  }
  func.func @transform_3(%arg0: i32) -> (i32, i32, i32) {
    %c0_i32 = arith.constant 0 : i32
    %c0_i32_0 = arith.constant 0 : i32
    %c0_i32_1 = arith.constant 0 : i32
    %c0_i32_2 = arith.constant 0 : i32
    return %c0_i32, %c0_i32_0, %c0_i32_1 : i32, i32, i32
  }
  func.func @transform_4(%arg0: i32) -> (i32, i32, i32) {
    %c0_i32 = arith.constant 0 : i32
    %c0_i32_0 = arith.constant 0 : i32
    %c0_i32_1 = arith.constant 0 : i32
    %c0_i32_2 = arith.constant 0 : i32
    return %c0_i32, %c0_i32_0, %c0_i32_1 : i32, i32, i32
  }
  func.func @transform_5(%arg0: i32) -> (i32, i32) {
    %c0_i32 = arith.constant 0 : i32
    %c0_i32_0 = arith.constant 0 : i32
    %c0_i32_1 = arith.constant 0 : i32
    return %c0_i32, %c0_i32_0 : i32, i32
  }
  func.func @transform_6(%arg0: i32) -> (i32, i32, i32) {
    %c0_i32 = arith.constant 0 : i32
    %c0_i32_0 = arith.constant 0 : i32
    %c0_i32_1 = arith.constant 0 : i32
    %c0_i32_2 = arith.constant 0 : i32
    return %c0_i32, %c0_i32_0, %c0_i32_1 : i32, i32, i32
  }
  func.func @transform_7(%arg0: i32) -> (i32, i32, i32) {
    %c0_i32 = arith.constant 0 : i32
    %c0_i32_0 = arith.constant 0 : i32
    %c0_i32_1 = arith.constant 0 : i32
    %c0_i32_2 = arith.constant 0 : i32
    return %c0_i32, %c0_i32_0, %c0_i32_1 : i32, i32, i32
  }
  func.func @transform_8(%arg0: i32) -> (i32, i32) {
    %c0_i32 = arith.constant 0 : i32
    %c0_i32_0 = arith.constant 0 : i32
    %c0_i32_1 = arith.constant 0 : i32
    return %c0_i32, %c0_i32_0 : i32, i32
  }
  func.func @transform_9(%arg0: i32) -> (i32, i32) {
    %c0_i32 = arith.constant 0 : i32
    %c0_i32_0 = arith.constant 0 : i32
    %c0_i32_1 = arith.constant 0 : i32
    return %c0_i32, %c0_i32_0 : i32, i32
  }
  func.func @transform_10(%arg0: i32) -> (i32, i32) {
    %c0_i32 = arith.constant 0 : i32
    %c0_i32_0 = arith.constant 0 : i32
    %c0_i32_1 = arith.constant 0 : i32
    return %c0_i32, %c0_i32_0 : i32, i32
  }
  func.func @transform_11(%arg0: i32) -> (i32, i32) {
    %c0_i32 = arith.constant 0 : i32
    %c0_i32_0 = arith.constant 0 : i32
    %c0_i32_1 = arith.constant 0 : i32
    return %c0_i32, %c0_i32_0 : i32, i32
  }
  func.func @transform_12(%arg0: i32) -> (i32, i32) {
    %c0_i32 = arith.constant 0 : i32
    %c0_i32_0 = arith.constant 0 : i32
    %c0_i32_1 = arith.constant 0 : i32
    return %c0_i32, %c0_i32_0 : i32, i32
  }
  func.func @transform_13(%arg0: i32) -> (i32, i32) {
    %c0_i32 = arith.constant 0 : i32
    %c0_i32_0 = arith.constant 0 : i32
    %c0_i32_1 = arith.constant 0 : i32
    return %c0_i32, %c0_i32_0 : i32, i32
  }
  func.func @transform_14(%arg0: i32) -> (i32, i32, i32) {
    %c0_i32 = arith.constant 0 : i32
    %c0_i32_0 = arith.constant 0 : i32
    %c0_i32_1 = arith.constant 0 : i32
    %c0_i32_2 = arith.constant 0 : i32
    return %c0_i32, %c0_i32_0, %c0_i32_1 : i32, i32, i32
  }
  func.func @transform_15(%arg0: i32) -> (i32, i32, i32) {
    %c0_i32 = arith.constant 0 : i32
    %c0_i32_0 = arith.constant 0 : i32
    %c0_i32_1 = arith.constant 0 : i32
    %c0_i32_2 = arith.constant 0 : i32
    return %c0_i32, %c0_i32_0, %c0_i32_1 : i32, i32, i32
  }
  func.func @transform_16(%arg0: i32) -> (i32, i32) {
    %c0_i32 = arith.constant 0 : i32
    %c0_i32_0 = arith.constant 0 : i32
    %c0_i32_1 = arith.constant 0 : i32
    return %c0_i32, %c0_i32_0 : i32, i32
  }
  func.func @transform_17(%arg0: i32) -> (i32, i32, i32) {
    %c0_i32 = arith.constant 0 : i32
    %c0_i32_0 = arith.constant 0 : i32
    %c0_i32_1 = arith.constant 0 : i32
    %c0_i32_2 = arith.constant 0 : i32
    return %c0_i32, %c0_i32_0, %c0_i32_1 : i32, i32, i32
  }
  func.func @transform_18(%arg0: i32) -> (i32, i32, i32) {
    %c0_i32 = arith.constant 0 : i32
    %c0_i32_0 = arith.constant 0 : i32
    %c0_i32_1 = arith.constant 0 : i32
    %c0_i32_2 = arith.constant 0 : i32
    return %c0_i32, %c0_i32_0, %c0_i32_1 : i32, i32, i32
  }
  func.func @transform_19(%arg0: i32) -> (i32, i32) {
    %c0_i32 = arith.constant 0 : i32
    %c0_i32_0 = arith.constant 0 : i32
    %c0_i32_1 = arith.constant 0 : i32
    return %c0_i32, %c0_i32_0 : i32, i32
  }
  func.func @transform_20(%arg0: i32) -> (i32, i32, i32) {
    %c0_i32 = arith.constant 0 : i32
    %c0_i32_0 = arith.constant 0 : i32
    %c0_i32_1 = arith.constant 0 : i32
    %c0_i32_2 = arith.constant 0 : i32
    return %c0_i32, %c0_i32_0, %c0_i32_1 : i32, i32, i32
  }
  func.func @transform_21(%arg0: i32) -> (i32, i32, i32) {
    %c0_i32 = arith.constant 0 : i32
    %c0_i32_0 = arith.constant 0 : i32
    %c0_i32_1 = arith.constant 0 : i32
    %c0_i32_2 = arith.constant 0 : i32
    return %c0_i32, %c0_i32_0, %c0_i32_1 : i32, i32, i32
  }
  func.func @transform_22(%arg0: i32) -> (i32, i32) {
    %c0_i32 = arith.constant 0 : i32
    %c0_i32_0 = arith.constant 0 : i32
    %c0_i32_1 = arith.constant 0 : i32
    return %c0_i32, %c0_i32_0 : i32, i32
  }
  func.func @transform_23(%arg0: i32) -> (i32, i32, i32) {
    %c0_i32 = arith.constant 0 : i32
    %c0_i32_0 = arith.constant 0 : i32
    %c0_i32_1 = arith.constant 0 : i32
    return %arg0, %c0_i32, %c0_i32_0 : i32, i32, i32
  }
  func.func @transform_24(%arg0: i32) -> (i32, i32, i32) {
    %c0_i32 = arith.constant 0 : i32
    %c0_i32_0 = arith.constant 0 : i32
    %c0_i32_1 = arith.constant 0 : i32
    return %arg0, %c0_i32, %c0_i32_0 : i32, i32, i32
  }
}

</mosaic_0001>

<bundles_post_ra>
// kernel: proto_autoencoder_forward.1
= control target key start
LH: loop header
LB: loop body
LE: loop exit
PB: predicated region body
PF: predicated region fallthrough
CT: control target
= control target key end

     0   :  { %s10489_s27 = smov 0   ;;  %s12527_s0 = inlined_call_operand.vmem [shape: bf16[2,9,196], index: 0, kind: input, shape index: {}]   ;;  %s12528_s1 = inlined_call_operand.vmem [shape: bf16[8,9], index: 1, kind: input, shape index: {}]   ;;  %s12529_s2 = inlined_call_operand.vmem [shape: f32[8,1], index: 2, kind: input, shape index: {}]   ;;  %s12530_s3 = inlined_call_operand.vmem [shape: bf16[9,196,49], index: 3, kind: input, shape index: {}]   ;;  %s12531_s4 = inlined_call_operand.vmem [shape: bf16[9,16,8], index: 4, kind: input, shape index: {}]   ;;  %s12532_s5 = inlined_call_operand.vmem [shape: f32[16,1], index: 5, kind: input, shape index: {}]   ;;  %s12533_s6 = inlined_call_operand.vmem [shape: bf16[9,49,25], index: 6, kind: input, shape index: {}]   ;;  %s12534_s7 = inlined_call_operand.vmem [shape: bf16[9,16,16], index: 7, kind: input, shape index: {}]   ;;  %s12535_s8 = inlined_call_operand.vmem [shape: f32[16,1], index: 8, kind: input, shape index: {}]   ;;  %s12536_s9 = inlined_call_operand.vmem [shape: bf16[32,16], index: 9, kind: input, shape index: {}]   ;;  %s12537_s10 = inlined_call_operand.vmem [shape: f32[32,1], index: 10, kind: input, shape index: {}]   ;;  %s12538_s11 = inlined_call_operand.vmem [shape: bf16[16,32], index: 11, kind: input, shape index: {}]   ;;  %s12539_s12 = inlined_call_operand.vmem [shape: bf16[400,16], index: 12, kind: input, shape index: {}]   ;;  %s12540_s13 = inlined_call_operand.vmem [shape: f32[400,1], index: 13, kind: input, shape index: {}]   ;;  %s12541_s14 = inlined_call_operand.vmem [shape: bf16[9,25,49], index: 14, kind: input, shape index: {}]   ;;  %s12542_s15 = inlined_call_operand.vmem [shape: bf16[9,16,16], index: 15, kind: input, shape index: {}]   ;;  %s12543_s16 = inlined_call_operand.vmem [shape: f32[16,1], index: 16, kind: input, shape index: {}]   ;;  %s12544_s17 = inlined_call_operand.vmem [shape: bf16[9,49,196], index: 17, kind: input, shape index: {}]   ;;  %s12545_s18 = inlined_call_operand.vmem [shape: bf16[9,8,16], index: 18, kind: input, shape index: {}]   ;;  %s12546_s19 = inlined_call_operand.vmem [shape: f32[8,1], index: 19, kind: input, shape index: {}]   ;;  %s12547_s20 = inlined_call_operand.vmem [shape: bf16[3,196,196], index: 20, kind: input, shape index: {}]   ;;  %s12548_s21 = inlined_call_operand.vmem [shape: bf16[4,4,8], index: 21, kind: input, shape index: {}]   ;;  %s12549_s22 = inlined_call_operand.<no memory space> [shape: f32[1,1], index: 22, kind: input, shape index: {}]   ;;  %s12550_s23 = inlined_call_operand.vmem [shape: f32[2,4,196], index: 23, kind: output, shape index: {0}]   ;;  %s12551_s24 = inlined_call_operand.vmem [shape: f32[2,32,1], index: 24, kind: output, shape index: {1}]  }
   0x1   :  { %12560 = sst [smem:[#allocation3_spill]] %s12527_s0  ;;  %v30_v0 = vstv %s12549_s22 }
   0x2   :  { %12561 = sst [smem:[#allocation4_spill]] %s12528_s1  ;;  %31 = vst [vmem:[#allocation2] sm:$0x1] %v30_v0 }
   0x3   :  { %12562 = sst [smem:[#allocation5_spill]] %s12529_s2 }
   0x4   :  { %12563 = sst [smem:[#allocation6_spill]] %s12530_s3 }
   0x5   :  { %12564 = sst [smem:[#allocation7_spill]] %s12531_s4 }
   0x6   :  { %12565 = sst [smem:[#allocation8_spill]] %s12532_s5 }
   0x7   :  { %12566 = sst [smem:[#allocation9_spill]] %s12533_s6 }
   0x8   :  { %12567 = sst [smem:[#allocation10_spill]] %s12534_s7 }
   0x9   :  { %12568 = sst [smem:[#allocation11_spill]] %s12535_s8 }
   0xa LB: > { %s8296_s28 = sadd.s32 4294967295, %s10355_s27   ;;  %p8300_p0 = scmp.ge.s32.totalorder %s10355_s27, 1  ;;  %s10355_s27 = sphi %s10489_s27, %s37_s27  }
   0xb   : > { %p667_p1 = scmp.lt.s32.totalorder %s10355_s27, 3 }
   0xd   : > { %p668_p2 = pnand %p8300_p0, %p667_p1 }
   0xe   : > { %p738_p3 = scmp.lt.s32.totalorder (!%p668_p2), %s8296_s28, 1  ;;  %vm775_vm0 = vcmask (!%p668_p2), 1043456   ;;  %s12569_s2 = sld [smem:[#allocation5_spill]] (!%p668_p2)  ;;  %vm776_vm1 = vcmask (!%p668_p2), 1044480   ;;  %v10357_v2 = vmov (!%p668_p2), 65535   ;;  %v10358_v4 = vmov (!%p668_p2), 0  }
   0xf   : > { %671 = sbr.rel (%p668_p2) target bundleno = 9919 (0x26bf), region = 112  ;;  %v777_v3 = vsel (!%p668_p2), %vm775_vm0, 4294967295, %v10357_v2  ;;  %817 = vmatprep.mubr.bf16.mxu0 (!%p668_p2), %v10358_v4  ;;  %9887 = vset.pattern.permute.xlu0 (!%p668_p2), %v10358_v4  ;;  %s12570_s7 = sld [smem:[#allocation8_spill]] (!%p668_p2)  ;;  %v3926_v16 = vld [vmem:[%s12537_s10 + $0x8] sm:$0xff] (!%p668_p2)  ;;  %vm771_vm2 = vcmask (!%p668_p2), 72704   ;;  %v3928_v19 = vld [vmem:[%s12537_s10 + $0x18] sm:$0xff] (!%p668_p2) }
  0x10   : > { %938 = vmatprep.subr.bf16.mxu1 (!%p668_p2), %v10358_v4  ;;  %s12571_s25 = sld [smem:[#allocation6_spill]] (!%p668_p2)  ;;  %9888 = vset.pattern.permute.xlu1 (!%p668_p2), %v10358_v4  ;;  %v10514_v7 = vsel (!%p668_p2), %vm776_vm1, %v777_v3, 0  ;;  %s12572_s6 = sld [smem:[#allocation3_spill]] (!%p668_p2)  ;;  %vm934_vm3 = vcmask (!%p668_p2), 1041408   ;;  %vm930_vm4 = vcmask (!%p668_p2), 556032   ;;  %vm10360_vm5 = vmmov (!%p668_p2), 0  }
  0x11   : > { %s12573_s0 = sld [smem:[#allocation11_spill]] (!%p668_p2)  ;;  %s12574_s4 = sld [smem:[#allocation4_spill]] (!%p668_p2)  ;;  %vm1134_vm6 = vcmask (!%p668_p2), 64512   ;;  %vm2697_vm7 = vcmask (!%p668_p2), 1040384   ;;  %vm2693_vm8 = vcmask (!%p668_p2), 400384   ;;  %vm2829_vm9 = vcmask (!%p668_p2), 130048  }
  0x12   : > { %s12575_s26 = sld [smem:[#allocation7_spill]] (!%p668_p2)  ;;  %vm3837_vm10 = vcmask (!%p668_p2), 203776   ;;  %vm3969_vm11 = vcmask (!%p668_p2), 7168   ;;  %vm4022_vm12 = vcmask (!%p668_p2), 261120  }
  0x14   : > { %v757_v1 = vld [vmem:[%s12569_s2] sm:$0xff] (!%p668_p2) }
  0x15   : > { %760 = vperm.xlu0 (!%p668_p2), %9887, %v757_v1   ;;  %v2648_v5 = vld [vmem:[%s12570_s7] sm:$0xff] (!%p668_p2) }
  0x16   : > { %s12579_s28 = smov (!%p738_p3, %s8296_s28), 1  ;;  %v9892_v6 = vld [vmem:[%s12571_s25] sm:$0xff]   ;;  %v9894_v8 = vld [vmem:[%s12571_s25 + $0x8] sm:$0xff]   ;;  %v9896_v15 = vld [vmem:[%s12571_s25 + $0x10] sm:$0xff]  }
  0x17   : > { %s9256_s8 = sshll.u32 %s12579_s28, 4  ;;  %939 = vmatpush1.bf16.msra.mxu1 %v9892_v6  ;;  %v3820_v11 = vld [vmem:[%s12573_s0 + $0x8] sm:$0xff]  ;;  %v754_v14 = vld [vmem:[%s12574_s4] sm:$0xf]  ;;  %v9898_v18 = vld [vmem:[%s12571_s25 + $0x18] sm:$0xff]   ;;  %s12576_s4 = sld [smem:[#allocation9_spill]] }
  0x18   : > { %s742_s22 = scalar_lea.vmem %s12572_s6, %s9256_s8  ;;  %940 = vmatprep.subr.bf16.mxu1 %v10358_v4  ;;  %v9893_v17 = vld [vmem:[%s12571_s25 + $0x64] sm:$0xff]   ;;  %v9895_v20 = vld [vmem:[%s12571_s25 + $0x6c] sm:$0xff]   ;;  %v9897_v22 = vld [vmem:[%s12571_s25 + $0x74] sm:$0xff]   ;;  %s12577_s6 = sld [smem:[#allocation10_spill]] }
  0x19   : > { %v9889_v9 = vld [vmem:[%s742_s22 + $0x4] ss:$8 sps:$4 sm:$0x1f]   ;;  %2652 = vperm.xlu0 %9887, %v2648_v5   ;;  %v9891_v10 = vld [vmem:[%s742_s22] ss:$8 sps:$4 sm:$0x1f]  }
  0x1a   : > { %v783_v12 = vand.u32 %v9889_v9, %v10514_v7  ;;  %v780_v13 = vand.u32 %v9891_v10, %v10514_v7  ;;  %v9900_v21 = vld [vmem:[%s12571_s25 + $0x20] sm:$0xff]   ;;  %v9902_v23 = vld [vmem:[%s12571_s25 + $0x28] sm:$0xff]   ;;  %v9904_v26 = vld [vmem:[%s12571_s25 + $0x30] sm:$0xff]   ;;  %v10359_v5 = vmov 0.0   ;;  %s9258_s3 = sshll.u32 %s12579_s28, 5 }
  0x1b   : > { %941 = vmatpush1.bf16.msra.mxu1 %v9894_v8  ;;  %v9899_v24 = vld [vmem:[%s12571_s25 + $0x7c] sm:$0xff]   ;;  %v9901_v25 = vld [vmem:[%s12571_s25 + $0x84] sm:$0xff]   ;;  %v9903_v28 = vld [vmem:[%s12571_s25 + $0x8c] sm:$0xff]   ;;  %s752_s5 = scalar_lea.vmem %s12551_s24, %s9258_s3 }
  0x1c   : > { %785 = vmatprep.subr.bf16.mxu0 %v783_v12  ;;  %942 = vmatprep.subr.bf16.mxu1 %v10358_v4  ;;  %v9906_v27 = vld [vmem:[%s12571_s25 + $0x38] sm:$0xff]   ;;  %v9908_v29 = vld [vmem:[%s12571_s25 + $0x40] sm:$0xff]   ;;  %v9910_v31 = vld [vmem:[%s12571_s25 + $0x48] sm:$0xff]  }
  0x1d   : > { %3828 = vperm.xlu0 %9887, %v3820_v11   ;;  %786 = vmatpush1.bf16.msra.mxu0 %v780_v13  ;;  %v9905_v30 = vld [vmem:[%s12571_s25 + $0x94] sm:$0xff]   ;;  %v9907_v32 = vld [vmem:[%s12571_s25 + $0x9c] sm:$0xff]   ;;  %v9909_v34 = vld [vmem:[%s12571_s25 + $0xa4] sm:$0xff]  }
  0x1e   : > { %1085 = vmatprep.subr.bf16.mxu0 %v10358_v4  ;;  %v9912_v33 = vld [vmem:[%s12571_s25 + $0x50] sm:$0xff]   ;;  %v9914_v37 = vld [vmem:[%s12571_s25 + $0x58] sm:$0xff]   ;;  %v9916_v39 = vld [vmem:[%s12571_s25 + $0x60] ss:$0 sps:$4 sm:$0x33]  }
  0x1f   : > { %943 = vmatpush1.bf16.msra.mxu1 %v9896_v15  ;;  %v9911_v35 = vld [vmem:[%s12571_s25 + $0xac] sm:$0xff]   ;;  %v9913_v36 = vld [vmem:[%s12571_s25 + $0xb4] sm:$0xff]   ;;  %v9915_v38 = vld [vmem:[%s12571_s25 + $0xbc] sm:$0xff]   ;;  %v936_v41 = vsel %vm934_vm3, %v9916_v39, 0 }
  0x20   : > { %8309 = vmatmul.mubr.msk.bf16.vlgmr.msra.gmra.mrb[0].mxu0 %vm771_vm2, %v754_v14  ;;  %944 = vmatprep.subr.bf16.mxu1 %v10358_v4  ;;  %v9917_v40 = vld [vmem:[%s12571_s25 + $0xc4] ss:$0 sps:$4 sm:$0x33]   ;;  %v9918_v53 = vld [vmem:[%s12571_s25 + $0xc8] sm:$0xff]   ;;  %v9919_v55 = vld [vmem:[%s12571_s25 + $0xd0] sm:$0xff]  }
  0x21   : > { %3936 = vperm.xlu0 %9887, %v3926_v16   ;;  %1086 = vmatpush1.bf16.msra.mxu0 %v9893_v17  ;;  %v1083_v42 = vsel %vm934_vm3, %v9917_v40, 0  ;;  %v9920_v56 = vld [vmem:[%s12571_s25 + $0xd8] sm:$0xff]   ;;  %v9921_v57 = vld [vmem:[%s12571_s25 + $0xe0] sm:$0xff]   ;;  %v9922_v58 = vld [vmem:[%s12571_s25 + $0xe8] sm:$0xff]  }
  0x22   : > { %1087 = vmatprep.subr.bf16.mxu0 %v10358_v4  ;;  %v9923_v59 = vld [vmem:[%s12571_s25 + $0xf0] sm:$0xff]   ;;  %v9924_v60 = vld [vmem:[%s12571_s25 + $0xf8] sm:$0xff]   ;;  %v9925_v61 = vld [vmem:[%s12571_s25 + $0x100] sm:$0xff]  }
  0x23   : > { %945 = vmatpush1.bf16.msra.mxu1 %v9898_v18  ;;  %v9926_v62 = vld [vmem:[%s12571_s25 + $0x108] sm:$0xff]   ;;  %v9927_v63 = vld [vmem:[%s12571_s25 + $0x110] sm:$0xff]   ;;  %v9928_v0 = vld [vmem:[%s12571_s25 + $0x118] sm:$0xff]  }
  0x24   : > { %946 = vmatprep.subr.bf16.mxu1 %v10358_v4  ;;  %v9929_v1 = vld [vmem:[%s12571_s25 + $0x120] sm:$0xff]   ;;  %v9930_v2 = vld [vmem:[%s12571_s25 + $0x128] ss:$0 sps:$4 sm:$0x33]  }
  0x25   : > { %3946 = vperm.xlu0 %9887, %v3928_v19   ;;  %1088 = vmatpush1.bf16.msra.mxu0 %v9895_v20  ;;  %v1336_v3 = vsel %vm934_vm3, %v9930_v2, 0  ;;  %v9931_v18 = vld [vmem:[%s12575_s26 + $0x8] sm:$0xff]   ;;  %v9932_v20 = vld [vmem:[%s12575_s26] sm:$0xff]   ;;  %v9947_v2 = vld [vmem:[%s12575_s26 + $0x18] sm:$0xff]  }
  0x26   : > { %1089 = vmatprep.subr.bf16.mxu0 %v10358_v4  ;;  %v9945_v39 = vld [vmem:[%s12571_s25 + $0x184] sm:$0xff]   ;;  %v9946_v40 = vld [vmem:[%s12571_s25 + $0x18c] ss:$0 sps:$4 sm:$0x33]  }
  0x27   : > { %947 = vmatpush1.bf16.msra.mxu1 %v9900_v21 }
  0x28   : > { %948 = vmatprep.subr.bf16.mxu1 %v10358_v4 }
  0x29   : > { %1090 = vmatpush1.bf16.msra.mxu0 %v9897_v22 }
  0x2a   : > { %1091 = vmatprep.subr.bf16.mxu0 %v10358_v4 }
  0x2b   : > { %949 = vmatpush1.bf16.msra.mxu1 %v9902_v23 }
  0x2c   : > { %950 = vmatprep.subr.bf16.mxu1 %v10358_v4 }
  0x2d   : > { %1092 = vmatpush1.bf16.msra.mxu0 %v9899_v24 }
  0x2e   : > { %1093 = vmatprep.subr.bf16.mxu0 %v10358_v4 }
  0x2f   : > { %951 = vmatpush1.bf16.msra.mxu1 %v9904_v26 }
  0x30   : > { %952 = vmatprep.subr.bf16.mxu1 %v10358_v4 }
  0x31   : > { %1094 = vmatpush1.bf16.msra.mxu0 %v9901_v25 }
  0x32   : > { %1095 = vmatprep.subr.bf16.mxu0 %v10358_v4 }
  0x33   : > { %953 = vmatpush1.bf16.msra.mxu1 %v9906_v27  ;;  %v9933_v27 = vld [vmem:[%s12575_s26 + $0x10] sm:$0xff]  }
  0x34   : > { %954 = vmatprep.subr.bf16.mxu1 %v10358_v4 }
  0x35   : > { %1096 = vmatpush1.bf16.msra.mxu0 %v9903_v28  ;;  %v9934_v28 = vld [vmem:[%s12571_s25 + $0x12c] sm:$0xff]  }
  0x36   : > { %1097 = vmatprep.subr.bf16.mxu0 %v10358_v4 }
  0x37   : > { %955 = vmatpush1.bf16.msra.mxu1 %v9908_v29  ;;  %v9935_v29 = vld [vmem:[%s12571_s25 + $0x134] sm:$0xff]  }
  0x38   : > { %956 = vmatprep.subr.bf16.mxu1 %v10358_v4 }
  0x39   : > { %1098 = vmatpush1.bf16.msra.mxu0 %v9905_v30  ;;  %v9936_v30 = vld [vmem:[%s12571_s25 + $0x13c] sm:$0xff]  }
  0x3a   : > { %1099 = vmatprep.subr.bf16.mxu0 %v10358_v4 }
  0x3b   : > { %957 = vmatpush1.bf16.msra.mxu1 %v9910_v31  ;;  %v9937_v31 = vld [vmem:[%s12571_s25 + $0x144] sm:$0xff]  }
  0x3c   : > { %958 = vmatprep.subr.bf16.mxu1 %v10358_v4 }
  0x3d   : > { %1100 = vmatpush1.bf16.msra.mxu0 %v9907_v32  ;;  %v9938_v32 = vld [vmem:[%s12571_s25 + $0x14c] sm:$0xff]  }
  0x3e   : > { %1101 = vmatprep.subr.bf16.mxu0 %v10358_v4 }
  0x3f   : > { %959 = vmatpush1.bf16.msra.mxu1 %v9912_v33  ;;  %v9939_v33 = vld [vmem:[%s12571_s25 + $0x154] sm:$0xff]  }
  0x40   : > { %960 = vmatprep.subr.bf16.mxu1 %v10358_v4 }
  0x41   : > { %1102 = vmatpush1.bf16.msra.mxu0 %v9909_v34  ;;  %v9940_v34 = vld [vmem:[%s12571_s25 + $0x15c] sm:$0xff]  }
  0x42   : > { %1103 = vmatprep.subr.bf16.mxu0 %v10358_v4 }
  0x43   : > { %961 = vmatpush1.bf16.msra.mxu1 %v9914_v37  ;;  %v9943_v37 = vld [vmem:[%s12571_s25 + $0x174] sm:$0xff]  }
  0x44   : > { %962 = vmatprep.subr.bf16.mxu1 %v10358_v4 }
  0x45   : > { %1104 = vmatpush1.bf16.msra.mxu0 %v9911_v35  ;;  %v9941_v35 = vld [vmem:[%s12571_s25 + $0x164] sm:$0xff]  }
  0x46   : > { %1105 = vmatprep.subr.bf16.mxu0 %v10358_v4 }
  0x47   : > { %963 = vmatpush1.bf16.msra.mxu1 %v936_v41  ;;  %v1538_v41 = vsel %vm934_vm3, %v9946_v40, 0  ;;  %v9969_v40 = vld [vmem:[%s12571_s25 + $0x22c] sm:$0xff]  }
  0x48   : > { %1338 = vmatprep.subr.bf16.mxu1 %v10358_v4 }
  0x49   : > { %1106 = vmatpush1.bf16.msra.mxu0 %v9913_v36  ;;  %v9942_v36 = vld [vmem:[%s12571_s25 + $0x16c] sm:$0xff]  }
  0x4a   : > { %1107 = vmatprep.subr.bf16.mxu0 %v10358_v4 }
  0x4d   : > { %1108 = vmatpush1.bf16.msra.mxu0 %v9915_v38  ;;  %v9944_v38 = vld [vmem:[%s12571_s25 + $0x17c] sm:$0xff]  }
  0x4e   : > { %1109 = vmatprep.subr.bf16.mxu0 %v10358_v4 }
  0x51   : > { %1110 = vmatpush1.bf16.msra.mxu0 %v1083_v42 }
  0x52   : > { %9417 = vmatprep.subr.bf16.mxu0 %v10359_v5 }
  0x94   : > { %v761_v43 = vpop.permute.xlu0 %760 }
  0xf3   : > { %v819_v44 = vpop.f32.mrb[0].mxu0 }
  0xf4   : > { %v820_v45 = vadd.f32 %v819_v44, %v761_v43  ;;  %v821_v46 = vpop.f32.mrb[1].mxu0 }
  0xf5   : > { %v822_v47 = vadd.f32 %v821_v46, %v761_v43  ;;  %v823_v48 = vpop.f32.mrb[2].mxu0 }
  0xf6   : > { %v826_v49 = vmax.f32 %v820_v45, 0.0  ;;  %v824_v50 = vpop.f32.mrb[3].mxu0 }
  0xf7   : > { %v827_v51 = vmax.f32 %v822_v47, 0.0 }
  0xf8   : > { %v10641_v54 = vpack.c.bf16 %v826_v49, %v826_v49 }
  0xf9   : > { %v10636_v52 = vpack.c.bf16 %v827_v51, %v827_v51 }
  0xfb   : > { %8323 = vmatprep.mubr.msk.bf16.mxu1 %vm930_vm4, %v10636_v52  ;;  %8362 = vmatprep.mubr.msk.bf16.mxu0 %vm930_vm4, %v10636_v52 }
  0xfc   : > { %971 = vmatmul.mubr.bf16.vlgmr.msra.gmra.mrb[0].mxu1 %v10641_v54  ;;  %1118 = vmatmul.mubr.bf16.vlgmr.msra.gmra.mrb[4].mxu0 %v10641_v54 }
  0xfd   : > { %1339 = vmatpush1.bf16.msra.mxu1 %v9918_v53  ;;  %8407 = vmatprep.mubr.msk.bf16.mxu1 %vm930_vm4, %v10636_v52 }
  0xfe   : > { %1340 = vmatprep.subr.bf16.mxu1 %v10358_v4  ;;  %9419 = vmatprep.mubr.msk.bf16.mxu0 %vm10360_vm5, %v10359_v5 }
 0x101   : > { %1341 = vmatpush1.bf16.msra.mxu1 %v9919_v55 }
 0x102   : > { %1342 = vmatprep.subr.bf16.mxu1 %v10358_v4 }
 0x105   : > { %1343 = vmatpush1.bf16.msra.mxu1 %v9920_v56 }
 0x106   : > { %1344 = vmatprep.subr.bf16.mxu1 %v10358_v4 }
 0x109   : > { %1345 = vmatpush1.bf16.msra.mxu1 %v9921_v57 }
 0x10a   : > { %1346 = vmatprep.subr.bf16.mxu1 %v10358_v4 }
 0x10d   : > { %1347 = vmatpush1.bf16.msra.mxu1 %v9922_v58 }
 0x10e   : > { %1348 = vmatprep.subr.bf16.mxu1 %v10358_v4 }
 0x111   : > { %1349 = vmatpush1.bf16.msra.mxu1 %v9923_v59 }
 0x112   : > { %1350 = vmatprep.subr.bf16.mxu1 %v10358_v4 }
 0x115   : > { %1351 = vmatpush1.bf16.msra.mxu1 %v9924_v60 }
 0x116   : > { %1352 = vmatprep.subr.bf16.mxu1 %v10358_v4 }
 0x119   : > { %1353 = vmatpush1.bf16.msra.mxu1 %v9925_v61 }
 0x11a   : > { %1354 = vmatprep.subr.bf16.mxu1 %v10358_v4 }
 0x11d   : > { %1355 = vmatpush1.bf16.msra.mxu1 %v9926_v62 }
 0x11e   : > { %1356 = vmatprep.subr.bf16.mxu1 %v10358_v4 }
 0x121   : > { %1357 = vmatpush1.bf16.msra.mxu1 %v9927_v63 }
 0x122   : > { %1358 = vmatprep.subr.bf16.mxu1 %v10358_v4 }
 0x125   : > { %1359 = vmatpush1.bf16.msra.mxu1 %v9928_v0 }
 0x126   : > { %1360 = vmatprep.subr.bf16.mxu1 %v10358_v4 }
 0x129   : > { %1361 = vmatpush1.bf16.msra.mxu1 %v9929_v1 }
 0x12a   : > { %1362 = vmatprep.subr.bf16.mxu1 %v10358_v4 }
 0x12d   : > { %1363 = vmatpush1.bf16.msra.mxu1 %v1336_v3  ;;  %v9948_v3 = vld [vmem:[%s12571_s25 + $0x190] sm:$0xff]  }
 0x12e   : > { %9435 = vmatprep.subr.bf16.mxu1 %v10359_v5 }
 0x130   : > { %1371 = vmatmul.mubr.bf16.vlgmr.msra.gmra.mrb[4].mxu1 %v10641_v54 }
 0x131   : > { %9437 = vmatprep.mubr.msk.bf16.mxu1 %vm10360_vm5, %v10359_v5 }
 0x1cf   : > { %v972_v6 = vpop.f32.mrb[0].mxu1  ;;  %v1119_v8 = vpop.f32.mrb[4].mxu0 }
 0x1d0   : > { %v1125_v9 = vpack.c.bf16 %v1119_v8, %v1119_v8  ;;  %v974_v10 = vpop.f32.mrb[1].mxu1  ;;  %v1121_v11 = vpop.f32.mrb[5].mxu0  ;;  %v978_v14 = vpack.c.bf16 %v972_v6, %v972_v6  ;;  %v9949_v6 = vld [vmem:[%s12571_s25 + $0x198] sm:$0xff]   ;;  %v9950_v8 = vld [vmem:[%s12571_s25 + $0x1a0] sm:$0xff]  }
 0x1d1   : > { %v975_v12 = vpop.f32.mrb[2].mxu1  ;;  %v1122_v13 = vpop.f32.mrb[6].mxu0  ;;  %v9952_v10 = vld [vmem:[%s12571_s25 + $0x1b0] sm:$0xff]   ;;  %v9953_v11 = vld [vmem:[%s12571_s25 + $0x1b8] sm:$0xff]  }
 0x1d2   : > { %v1139_v15 = vsel %vm775_vm0, %v1125_v9, 0  ;;  %v976_v16 = vpop.f32.mrb[3].mxu1  ;;  %v1123_v17 = vpop.f32.mrb[7].mxu0  ;;  %v1191_v19 = vsel %vm775_vm0, %v978_v14, 0  ;;  %v9951_v9 = vld [vmem:[%s12571_s25 + $0x1a8] sm:$0xff]   ;;  %v9954_v12 = vld [vmem:[%s12571_s25 + $0x1c0] sm:$0xff]  }
 0x1d3   : > { %9418 = vmatpush3.bf16.msra.mxu0 %v1139_v15  ;;  %v9955_v13 = vld [vmem:[%s12571_s25 + $0x1c8] sm:$0xff]   ;;  %v9956_v14 = vld [vmem:[%s12571_s25 + $0x1d0] sm:$0xff]   ;;  %v9957_v15 = vld [vmem:[%s12571_s25 + $0x1d8] sm:$0xff]  }
 0x1d4   : > { %9423 = vmatprep.subr.bf16.mxu0 %v10359_v5  ;;  %v9958_v16 = vld [vmem:[%s12571_s25 + $0x1e0] sm:$0xff]   ;;  %v9959_v17 = vld [vmem:[%s12571_s25 + $0x1e8] sm:$0xff]  }
 0x1d6   : > { %9420 = vmatmul.mubr.msk.bf16.vlgmr.msra.gmra.mrb[8].mxu0 %vm1134_vm6, %v9931_v18  ;;  %v9960_v18 = vld [vmem:[%s12571_s25 + $0x1f0] ss:$0 sps:$4 sm:$0x33]  }
 0x1d7   : > { %9424 = vmatpush3.bf16.msra.mxu0 %v1191_v19  ;;  %9425 = vmatprep.mubr.msk.bf16.mxu0 %vm10360_vm5, %v10359_v5  ;;  %v1740_v19 = vsel %vm934_vm3, %v9960_v18, 0 }
 0x1d8   : > { %9429 = vmatprep.subr.bf16.mxu0 %v10359_v5 }
 0x1de   : > { %9426 = vmatmul.mubr.msk.bf16.vlgmr.msra.gmra.mrb[12].mxu0 %vm1134_vm6, %v9932_v20 }
 0x1df   : > { %9431 = vmatprep.mubr.msk.bf16.mxu0 %vm10360_vm5, %v10359_v5 }
 0x203   : > { %v1372_v21 = vpop.f32.mrb[4].mxu1 }
 0x204   : > { %v1378_v22 = vpack.c.bf16 %v1372_v21, %v1372_v21  ;;  %v1374_v23 = vpop.f32.mrb[5].mxu1 }
 0x205   : > { %v1375_v24 = vpop.f32.mrb[6].mxu1 }
 0x206   : > { %v1391_v25 = vsel %vm775_vm0, %v1378_v22, 0  ;;  %v1376_v26 = vpop.f32.mrb[7].mxu1 }
 0x207   : > { %9430 = vmatpush3.bf16.msra.mxu0 %v1391_v25 }
 0x208   : > { %1540 = vmatprep.subr.bf16.mxu0 %v10358_v4 }
 0x20a   : > { %9432 = vmatmul.mubr.msk.bf16.vlgmr.msra.gmra.mrb[16].mxu0 %vm1134_vm6, %v9933_v27 }
 0x20b   : > { %1541 = vmatpush1.bf16.msra.mxu0 %v9934_v28  ;;  %8450 = vmatprep.mubr.msk.bf16.mxu0 %vm930_vm4, %v10636_v52 }
 0x20c   : > { %1542 = vmatprep.subr.bf16.mxu0 %v10358_v4 }
 0x20f   : > { %1543 = vmatpush1.bf16.msra.mxu0 %v9935_v29 }
 0x210   : > { %1544 = vmatprep.subr.bf16.mxu0 %v10358_v4 }
 0x213   : > { %1545 = vmatpush1.bf16.msra.mxu0 %v9936_v30 }
 0x214   : > { %1546 = vmatprep.subr.bf16.mxu0 %v10358_v4 }
 0x217   : > { %1547 = vmatpush1.bf16.msra.mxu0 %v9937_v31 }
 0x218   : > { %1548 = vmatprep.subr.bf16.mxu0 %v10358_v4 }
 0x21b   : > { %1549 = vmatpush1.bf16.msra.mxu0 %v9938_v32  ;;  %v9961_v32 = vld [vmem:[%s12575_s26 + $0x20] sm:$0xff]  }
 0x21c   : > { %1550 = vmatprep.subr.bf16.mxu0 %v10358_v4 }
 0x21f   : > { %1551 = vmatpush1.bf16.msra.mxu0 %v9939_v33  ;;  %v9962_v33 = vld [vmem:[%s12571_s25 + $0x1f4] sm:$0xff]  }
 0x220   : > { %1552 = vmatprep.subr.bf16.mxu0 %v10358_v4 }
 0x223   : > { %1553 = vmatpush1.bf16.msra.mxu0 %v9940_v34  ;;  %v9963_v34 = vld [vmem:[%s12571_s25 + $0x1fc] sm:$0xff]  }
 0x224   : > { %1554 = vmatprep.subr.bf16.mxu0 %v10358_v4 }
 0x227   : > { %1555 = vmatpush1.bf16.msra.mxu0 %v9941_v35  ;;  %v9964_v35 = vld [vmem:[%s12571_s25 + $0x204] sm:$0xff]  }
 0x228   : > { %1556 = vmatprep.subr.bf16.mxu0 %v10358_v4 }
 0x22b   : > { %1557 = vmatpush1.bf16.msra.mxu0 %v9942_v36  ;;  %v9965_v36 = vld [vmem:[%s12571_s25 + $0x20c] sm:$0xff]  }
 0x22c   : > { %1558 = vmatprep.subr.bf16.mxu0 %v10358_v4 }
 0x22f   : > { %1559 = vmatpush1.bf16.msra.mxu0 %v9943_v37  ;;  %v9966_v37 = vld [vmem:[%s12571_s25 + $0x214] sm:$0xff]  }
 0x230   : > { %1560 = vmatprep.subr.bf16.mxu0 %v10358_v4 }
 0x233   : > { %1561 = vmatpush1.bf16.msra.mxu0 %v9944_v38  ;;  %v9967_v38 = vld [vmem:[%s12571_s25 + $0x21c] sm:$0xff]  }
 0x234   : > { %1562 = vmatprep.subr.bf16.mxu0 %v10358_v4 }
 0x237   : > { %1563 = vmatpush1.bf16.msra.mxu0 %v9945_v39  ;;  %v9968_v39 = vld [vmem:[%s12571_s25 + $0x224] sm:$0xff]  }
 0x238   : > { %1564 = vmatprep.subr.bf16.mxu0 %v10358_v4 }
 0x23b   : > { %1565 = vmatpush1.bf16.msra.mxu0 %v1538_v41  ;;  %v9970_v41 = vld [vmem:[%s12571_s25 + $0x234] sm:$0xff]  }
 0x23c   : > { %9441 = vmatprep.subr.bf16.mxu0 %v10359_v5 }
 0x23e   : > { %1573 = vmatmul.mubr.bf16.vlgmr.msra.gmra.mrb[20].mxu0 %v10641_v54 }
 0x23f   : > { %9443 = vmatprep.mubr.msk.bf16.mxu0 %vm10360_vm5, %v10359_v5 }
 0x2a9   : > { %v1175_v42 = vpop.f32.mrb[8].mxu0 }
 0x2aa   : > { %v9421_v43 = vpop.f32.mrb[9].mxu0 }
 0x2ab   : > { %v1178_v44 = vpop.f32.mrb[10].mxu0  ;;  %v9972_v43 = vld [vmem:[%s12571_s25 + $0x244] sm:$0xff]  }
 0x2ac   : > { %v9422_v45 = vpop.f32.mrb[11].mxu0 }
 0x2ad   : > { %v9974_v45 = vld [vmem:[%s12571_s25 + $0x254] ss:$0 sps:$4 sm:$0x33]  }
 0x2b1   : > { %v1227_v46 = vpop.f32.mrb[12].mxu0 }
 0x2b2   : > { %v1228_v47 = vadd.f32 %v1227_v46, %v1175_v42  ;;  %v9427_v48 = vpop.f32.mrb[13].mxu0  ;;  %v9971_v42 = vld [vmem:[%s12571_s25 + $0x23c] sm:$0xff]   ;;  %v1942_v46 = vsel %vm934_vm3, %v9974_v45, 0 }
 0x2b3   : > { %v1230_v49 = vpop.f32.mrb[14].mxu0 }
 0x2b4   : > { %v1231_v50 = vadd.f32 %v1230_v49, %v1178_v44  ;;  %v9428_v51 = vpop.f32.mrb[15].mxu0  ;;  %v9973_v44 = vld [vmem:[%s12571_s25 + $0x24c] sm:$0xff]  }
 0x2dd   : > { %v1427_v53 = vpop.f32.mrb[16].mxu0 }
 0x2de   : > { %v1434_v55 = vadd.f32 %v1427_v53, %v1228_v47  ;;  %v9433_v56 = vpop.f32.mrb[17].mxu0 }
 0x2df   : > { %v1430_v57 = vpop.f32.mrb[18].mxu0 }
 0x2e0   : > { %v1435_v58 = vadd.f32 %v1430_v57, %v1231_v50  ;;  %v9434_v59 = vpop.f32.mrb[19].mxu0 }
 0x311   : > { %v1574_v60 = vpop.f32.mrb[20].mxu0 }
 0x312   : > { %v1580_v61 = vpack.c.bf16 %v1574_v60, %v1574_v60  ;;  %v1576_v62 = vpop.f32.mrb[21].mxu0 }
 0x313   : > { %v1577_v63 = vpop.f32.mrb[22].mxu0  ;;  %v9976_v62 = vld [vmem:[%s12571_s25 + $0x258] sm:$0xff]  }
 0x314   : > { %v1593_v0 = vsel %vm775_vm0, %v1580_v61, 0  ;;  %v1578_v1 = vpop.f32.mrb[23].mxu0  ;;  %v9975_v61 = vld [vmem:[%s12575_s26 + $0x28] sm:$0xff]   ;;  %v9977_v63 = vld [vmem:[%s12571_s25 + $0x260] sm:$0xff]  }
 0x315   : > { %9436 = vmatpush3.bf16.msra.mxu1 %v1593_v0  ;;  %v9978_v0 = vld [vmem:[%s12571_s25 + $0x268] sm:$0xff]   ;;  %v9979_v1 = vld [vmem:[%s12571_s25 + $0x270] sm:$0xff]  }
 0x316   : > { %1742 = vmatprep.subr.bf16.mxu1 %v10358_v4 }
 0x318   : > { %9438 = vmatmul.mubr.msk.bf16.vlgmr.msra.gmra.mrb[8].mxu1 %vm1134_vm6, %v9947_v2  ;;  %v9980_v2 = vld [vmem:[%s12571_s25 + $0x278] sm:$0xff]  }
 0x319   : > { %1743 = vmatpush1.bf16.msra.mxu1 %v9948_v3  ;;  %8493 = vmatprep.mubr.msk.bf16.mxu1 %vm930_vm4, %v10636_v52  ;;  %v9981_v3 = vld [vmem:[%s12571_s25 + $0x280] sm:$0xff]  }
 0x31a   : > { %1744 = vmatprep.subr.bf16.mxu1 %v10358_v4 }
 0x31d   : > { %1745 = vmatpush1.bf16.msra.mxu1 %v9949_v6  ;;  %v9982_v6 = vld [vmem:[%s12571_s25 + $0x288] sm:$0xff]  }
 0x31e   : > { %1746 = vmatprep.subr.bf16.mxu1 %v10358_v4 }
 0x321   : > { %1747 = vmatpush1.bf16.msra.mxu1 %v9950_v8  ;;  %v9983_v8 = vld [vmem:[%s12571_s25 + $0x290] sm:$0xff]  }
 0x322   : > { %1748 = vmatprep.subr.bf16.mxu1 %v10358_v4 }
 0x325   : > { %1749 = vmatpush1.bf16.msra.mxu1 %v9951_v9  ;;  %v9984_v9 = vld [vmem:[%s12571_s25 + $0x298] sm:$0xff]  }
 0x326   : > { %1750 = vmatprep.subr.bf16.mxu1 %v10358_v4 }
 0x329   : > { %1751 = vmatpush1.bf16.msra.mxu1 %v9952_v10  ;;  %v9985_v10 = vld [vmem:[%s12571_s25 + $0x2a0] sm:$0xff]  }
 0x32a   : > { %1752 = vmatprep.subr.bf16.mxu1 %v10358_v4 }
 0x32d   : > { %1753 = vmatpush1.bf16.msra.mxu1 %v9953_v11  ;;  %v9986_v11 = vld [vmem:[%s12571_s25 + $0x2a8] sm:$0xff]  }
 0x32e   : > { %1754 = vmatprep.subr.bf16.mxu1 %v10358_v4 }
 0x331   : > { %1755 = vmatpush1.bf16.msra.mxu1 %v9954_v12  ;;  %v9987_v12 = vld [vmem:[%s12571_s25 + $0x2b0] sm:$0xff]  }
 0x332   : > { %1756 = vmatprep.subr.bf16.mxu1 %v10358_v4 }
 0x335   : > { %1757 = vmatpush1.bf16.msra.mxu1 %v9955_v13  ;;  %v9988_v13 = vld [vmem:[%s12571_s25 + $0x2b8] ss:$0 sps:$4 sm:$0x33]  }
 0x336   : > { %1758 = vmatprep.subr.bf16.mxu1 %v10358_v4 }
 0x339   : > { %1759 = vmatpush1.bf16.msra.mxu1 %v9956_v14  ;;  %v2144_v14 = vsel %vm934_vm3, %v9988_v13, 0 }
 0x33a   : > { %1760 = vmatprep.subr.bf16.mxu1 %v10358_v4 }
 0x33d   : > { %1761 = vmatpush1.bf16.msra.mxu1 %v9957_v15 }
 0x33e   : > { %1762 = vmatprep.subr.bf16.mxu1 %v10358_v4 }
 0x341   : > { %1763 = vmatpush1.bf16.msra.mxu1 %v9958_v16 }
 0x342   : > { %1764 = vmatprep.subr.bf16.mxu1 %v10358_v4 }
 0x345   : > { %1765 = vmatpush1.bf16.msra.mxu1 %v9959_v17 }
 0x346   : > { %1766 = vmatprep.subr.bf16.mxu1 %v10358_v4 }
 0x349   : > { %1767 = vmatpush1.bf16.msra.mxu1 %v1740_v19 }
 0x34a   : > { %9447 = vmatprep.subr.bf16.mxu1 %v10359_v5 }
 0x34c   : > { %1775 = vmatmul.mubr.bf16.vlgmr.msra.gmra.mrb[12].mxu1 %v10641_v54 }
 0x34d   : > { %9449 = vmatprep.mubr.msk.bf16.mxu1 %vm10360_vm5, %v10359_v5 }
 0x3eb   : > { %v1629_v20 = vpop.f32.mrb[8].mxu1 }
 0x3ec   : > { %v1636_v21 = vadd.f32 %v1629_v20, %v1434_v55  ;;  %v9439_v22 = vpop.f32.mrb[9].mxu1 }
 0x3ed   : > { %v1632_v23 = vpop.f32.mrb[10].mxu1 }
 0x3ee   : > { %v1637_v24 = vadd.f32 %v1632_v23, %v1435_v58  ;;  %v9440_v25 = vpop.f32.mrb[11].mxu1 }
 0x41f   : > { %v1776_v26 = vpop.f32.mrb[12].mxu1 }
 0x420   : > { %v1782_v27 = vpack.c.bf16 %v1776_v26, %v1776_v26  ;;  %v1778_v28 = vpop.f32.mrb[13].mxu1 }
 0x421   : > { %v1779_v29 = vpop.f32.mrb[14].mxu1  ;;  %v9990_v28 = vld [vmem:[%s12571_s25 + $0x2bc] sm:$0xff]  }
 0x422   : > { %v1795_v30 = vsel %vm775_vm0, %v1782_v27, 0  ;;  %v1780_v31 = vpop.f32.mrb[15].mxu1  ;;  %v9989_v27 = vld [vmem:[%s12575_s26 + $0x30] sm:$0xff]   ;;  %v9991_v29 = vld [vmem:[%s12571_s25 + $0x2c4] sm:$0xff]  }
 0x423   : > { %9442 = vmatpush3.bf16.msra.mxu0 %v1795_v30  ;;  %v9992_v30 = vld [vmem:[%s12571_s25 + $0x2cc] sm:$0xff]   ;;  %v9993_v31 = vld [vmem:[%s12571_s25 + $0x2d4] sm:$0xff]  }
 0x424   : > { %1944 = vmatprep.subr.bf16.mxu0 %v10358_v4 }
 0x426   : > { %9444 = vmatmul.mubr.msk.bf16.vlgmr.msra.gmra.mrb[24].mxu0 %vm1134_vm6, %v9961_v32  ;;  %v9994_v32 = vld [vmem:[%s12571_s25 + $0x2dc] sm:$0xff]  }
 0x427   : > { %1945 = vmatpush1.bf16.msra.mxu0 %v9962_v33  ;;  %8536 = vmatprep.mubr.msk.bf16.mxu0 %vm930_vm4, %v10636_v52  ;;  %v9995_v33 = vld [vmem:[%s12571_s25 + $0x2e4] sm:$0xff]  }
 0x428   : > { %1946 = vmatprep.subr.bf16.mxu0 %v10358_v4 }
 0x42b   : > { %1947 = vmatpush1.bf16.msra.mxu0 %v9963_v34  ;;  %v9996_v34 = vld [vmem:[%s12571_s25 + $0x2ec] sm:$0xff]  }
 0x42c   : > { %1948 = vmatprep.subr.bf16.mxu0 %v10358_v4 }
 0x42f   : > { %1949 = vmatpush1.bf16.msra.mxu0 %v9964_v35  ;;  %v9997_v35 = vld [vmem:[%s12571_s25 + $0x2f4] sm:$0xff]  }
 0x430   : > { %1950 = vmatprep.subr.bf16.mxu0 %v10358_v4 }
 0x433   : > { %1951 = vmatpush1.bf16.msra.mxu0 %v9965_v36  ;;  %v9998_v36 = vld [vmem:[%s12571_s25 + $0x2fc] sm:$0xff]  }
 0x434   : > { %1952 = vmatprep.subr.bf16.mxu0 %v10358_v4 }
 0x437   : > { %1953 = vmatpush1.bf16.msra.mxu0 %v9966_v37  ;;  %v9999_v37 = vld [vmem:[%s12571_s25 + $0x304] sm:$0xff]  }
 0x438   : > { %1954 = vmatprep.subr.bf16.mxu0 %v10358_v4 }
 0x43b   : > { %1955 = vmatpush1.bf16.msra.mxu0 %v9967_v38  ;;  %v10000_v38 = vld [vmem:[%s12571_s25 + $0x30c] sm:$0xff]  }
 0x43c   : > { %1956 = vmatprep.subr.bf16.mxu0 %v10358_v4 }
 0x43f   : > { %1957 = vmatpush1.bf16.msra.mxu0 %v9968_v39  ;;  %v10001_v39 = vld [vmem:[%s12571_s25 + $0x314] sm:$0xff]  }
 0x440   : > { %1958 = vmatprep.subr.bf16.mxu0 %v10358_v4 }
 0x443   : > { %1959 = vmatpush1.bf16.msra.mxu0 %v9969_v40  ;;  %v10002_v40 = vld [vmem:[%s12571_s25 + $0x31c] ss:$0 sps:$4 sm:$0x33]  }
 0x444   : > { %1960 = vmatprep.subr.bf16.mxu0 %v10358_v4 }
 0x447   : > { %1961 = vmatpush1.bf16.msra.mxu0 %v9970_v41  ;;  %v2346_v41 = vsel %vm934_vm3, %v10002_v40, 0 }
 0x448   : > { %1962 = vmatprep.subr.bf16.mxu0 %v10358_v4 }
 0x44b   : > { %1963 = vmatpush1.bf16.msra.mxu0 %v9971_v42 }
 0x44c   : > { %1964 = vmatprep.subr.bf16.mxu0 %v10358_v4 }
 0x44f   : > { %1965 = vmatpush1.bf16.msra.mxu0 %v9972_v43 }
 0x450   : > { %1966 = vmatprep.subr.bf16.mxu0 %v10358_v4 }
 0x453   : > { %1967 = vmatpush1.bf16.msra.mxu0 %v9973_v44 }
 0x454   : > { %1968 = vmatprep.subr.bf16.mxu0 %v10358_v4 }
 0x457   : > { %1969 = vmatpush1.bf16.msra.mxu0 %v1942_v46 }
 0x458   : > { %9453 = vmatprep.subr.bf16.mxu0 %v10359_v5 }
 0x45a   : > { %1977 = vmatmul.mubr.bf16.vlgmr.msra.gmra.mrb[28].mxu0 %v10641_v54 }
 0x45b   : > { %9455 = vmatprep.mubr.msk.bf16.mxu0 %vm10360_vm5, %v10359_v5 }
 0x4f9   : > { %v1831_v47 = vpop.f32.mrb[24].mxu0 }
 0x4fa   : > { %v1838_v48 = vadd.f32 %v1831_v47, %v1636_v21  ;;  %v9445_v49 = vpop.f32.mrb[25].mxu0 }
 0x4fb   : > { %v1834_v50 = vpop.f32.mrb[26].mxu0 }
 0x4fc   : > { %v1839_v51 = vadd.f32 %v1834_v50, %v1637_v24  ;;  %v9446_v53 = vpop.f32.mrb[27].mxu0 }
 0x52d   : > { %v1978_v55 = vpop.f32.mrb[28].mxu0 }
 0x52e   : > { %v1984_v56 = vpack.c.bf16 %v1978_v55, %v1978_v55  ;;  %v1980_v57 = vpop.f32.mrb[29].mxu0 }
 0x52f   : > { %v1981_v58 = vpop.f32.mrb[30].mxu0  ;;  %v10004_v57 = vld [vmem:[%s12571_s25 + $0x320] sm:$0xff]  }
 0x530   : > { %v1997_v59 = vsel %vm775_vm0, %v1984_v56, 0  ;;  %v1982_v60 = vpop.f32.mrb[31].mxu0  ;;  %v10003_v56 = vld [vmem:[%s12575_s26 + $0x38] sm:$0xff]   ;;  %v10005_v58 = vld [vmem:[%s12571_s25 + $0x328] sm:$0xff]  }
 0x531   : > { %9448 = vmatpush3.bf16.msra.mxu1 %v1997_v59  ;;  %v10006_v59 = vld [vmem:[%s12571_s25 + $0x330] sm:$0xff]   ;;  %v10007_v60 = vld [vmem:[%s12571_s25 + $0x338] sm:$0xff]  }
 0x532   : > { %2146 = vmatprep.subr.bf16.mxu1 %v10358_v4 }
 0x534   : > { %9450 = vmatmul.mubr.msk.bf16.vlgmr.msra.gmra.mrb[16].mxu1 %vm1134_vm6, %v9975_v61  ;;  %v10009_v61 = vld [vmem:[%s12571_s25 + $0x348] sm:$0xff]  }
 0x535   : > { %2147 = vmatpush1.bf16.msra.mxu1 %v9976_v62  ;;  %8579 = vmatprep.mubr.msk.bf16.mxu1 %vm930_vm4, %v10636_v52  ;;  %v10010_v62 = vld [vmem:[%s12571_s25 + $0x350] sm:$0xff]  }
 0x536   : > { %2148 = vmatprep.subr.bf16.mxu1 %v10358_v4 }
 0x539   : > { %2149 = vmatpush1.bf16.msra.mxu1 %v9977_v63  ;;  %v10011_v63 = vld [vmem:[%s12571_s25 + $0x358] sm:$0xff]  }
 0x53a   : > { %2150 = vmatprep.subr.bf16.mxu1 %v10358_v4 }
 0x53d   : > { %2151 = vmatpush1.bf16.msra.mxu1 %v9978_v0  ;;  %v10012_v0 = vld [vmem:[%s12571_s25 + $0x360] sm:$0xff]  }
 0x53e   : > { %2152 = vmatprep.subr.bf16.mxu1 %v10358_v4 }
 0x541   : > { %2153 = vmatpush1.bf16.msra.mxu1 %v9979_v1  ;;  %v10013_v1 = vld [vmem:[%s12571_s25 + $0x368] sm:$0xff]  }
 0x542   : > { %2154 = vmatprep.subr.bf16.mxu1 %v10358_v4 }
 0x545   : > { %2155 = vmatpush1.bf16.msra.mxu1 %v9980_v2  ;;  %v10014_v2 = vld [vmem:[%s12571_s25 + $0x370] sm:$0xff]  }
 0x546   : > { %2156 = vmatprep.subr.bf16.mxu1 %v10358_v4 }
 0x549   : > { %2157 = vmatpush1.bf16.msra.mxu1 %v9981_v3  ;;  %v10015_v3 = vld [vmem:[%s12571_s25 + $0x378] sm:$0xff]  }
 0x54a   : > { %2158 = vmatprep.subr.bf16.mxu1 %v10358_v4 }
 0x54d   : > { %2159 = vmatpush1.bf16.msra.mxu1 %v9982_v6  ;;  %v10016_v6 = vld [vmem:[%s12571_s25 + $0x380] ss:$0 sps:$4 sm:$0x33]  }
 0x54e   : > { %2160 = vmatprep.subr.bf16.mxu1 %v10358_v4 }
 0x551   : > { %2161 = vmatpush1.bf16.msra.mxu1 %v9983_v8  ;;  %v2548_v8 = vsel %vm934_vm3, %v10016_v6, 0 }
 0x552   : > { %2162 = vmatprep.subr.bf16.mxu1 %v10358_v4 }
 0x555   : > { %2163 = vmatpush1.bf16.msra.mxu1 %v9984_v9  ;;  %v2649_v9 = vld [vmem:[%s12570_s7 + $0x8] sm:$0xff] }
 0x556   : > { %2164 = vmatprep.subr.bf16.mxu1 %v10358_v4  ;;  %2657 = vperm.xlu1 %9888, %v2649_v9   ;;  %v10030_v9 = vld [vmem:[%s12577_s6 + $0x8] sm:$0xff]  }
 0x559   : > { %2165 = vmatpush1.bf16.msra.mxu1 %v9985_v10  ;;  %v3819_v10 = vld [vmem:[%s12573_s0] sm:$0xff]  ;;  %s9257_s0 = sshll.u32 %s12579_s28, 3 }
 0x55a   : > { %2166 = vmatprep.subr.bf16.mxu1 %v10358_v4  ;;  %3823 = vperm.xlu1 %9888, %v3819_v10   ;;  %v10031_v10 = vld [vmem:[%s12577_s6] sm:$0xff]  }
 0x55d   : > { %2167 = vmatpush1.bf16.msra.mxu1 %v9986_v11  ;;  %v10019_v11 = vld [vmem:[%s12576_s4 + $0x38] sm:$0xff]  }
 0x55e   : > { %2168 = vmatprep.subr.bf16.mxu1 %v10358_v4 }
 0x561   : > { %2169 = vmatpush1.bf16.msra.mxu1 %v9987_v12  ;;  %v3927_v12 = vld [vmem:[%s12537_s10 + $0x10] sm:$0xff] }
 0x562   : > { %2170 = vmatprep.subr.bf16.mxu1 %v10358_v4 }
 0x565   : > { %2171 = vmatpush1.bf16.msra.mxu1 %v2144_v14 }
 0x566   : > { %9459 = vmatprep.subr.bf16.mxu1 %v10359_v5 }
 0x568   : > { %2179 = vmatmul.mubr.bf16.vlgmr.msra.gmra.mrb[20].mxu1 %v10641_v54 }
 0x569   : > { %9461 = vmatprep.mubr.msk.bf16.mxu1 %vm10360_vm5, %v10359_v5 }
 0x607   : > { %v2033_v15 = vpop.f32.mrb[16].mxu1 }
 0x608   : > { %v2040_v16 = vadd.f32 %v2033_v15, %v1838_v48  ;;  %v9451_v17 = vpop.f32.mrb[17].mxu1 }
 0x609   : > { %v2036_v18 = vpop.f32.mrb[18].mxu1 }
 0x60a   : > { %v2041_v19 = vadd.f32 %v2036_v18, %v1839_v51  ;;  %v9452_v20 = vpop.f32.mrb[19].mxu1 }
 0x63b   : > { %v2180_v21 = vpop.f32.mrb[20].mxu1 }
 0x63c   : > { %v2186_v22 = vpack.c.bf16 %v2180_v21, %v2180_v21  ;;  %v2182_v23 = vpop.f32.mrb[21].mxu1 }
 0x63d   : > { %v2183_v24 = vpop.f32.mrb[22].mxu1 }
 0x63e   : > { %v2199_v25 = vsel %vm775_vm0, %v2186_v22, 0  ;;  %v2184_v26 = vpop.f32.mrb[23].mxu1 }
 0x63f   : > { %9454 = vmatpush3.bf16.msra.mxu0 %v2199_v25  ;;  %v10017_v25 = vld [vmem:[%s12575_s26 + $0x40] sm:$0xff]  }
 0x640   : > { %2348 = vmatprep.subr.bf16.mxu0 %v10358_v4  ;;  %v10018_v26 = vld [vmem:[%s12576_s4] sm:$0xff]  }
 0x642   : > { %9456 = vmatmul.mubr.msk.bf16.vlgmr.msra.gmra.mrb[32].mxu0 %vm1134_vm6, %v9989_v27  ;;  %v10020_v27 = vld [vmem:[%s12576_s4 + $0x8] sm:$0xff]  }
 0x643   : > { %2349 = vmatpush1.bf16.msra.mxu0 %v9990_v28  ;;  %8622 = vmatprep.mubr.msk.bf16.mxu0 %vm930_vm4, %v10636_v52  ;;  %v10021_v28 = vld [vmem:[%s12576_s4 + $0x40] sm:$0xff]  }
 0x644   : > { %2350 = vmatprep.subr.bf16.mxu0 %v10358_v4 }
 0x647   : > { %2351 = vmatpush1.bf16.msra.mxu0 %v9991_v29  ;;  %v10022_v29 = vld [vmem:[%s12576_s4 + $0x10] sm:$0xff]  }
 0x648   : > { %2352 = vmatprep.subr.bf16.mxu0 %v10358_v4 }
 0x64b   : > { %2353 = vmatpush1.bf16.msra.mxu0 %v9992_v30  ;;  %v10023_v30 = vld [vmem:[%s12576_s4 + $0x48] sm:$0xff]  }
 0x64c   : > { %2354 = vmatprep.subr.bf16.mxu0 %v10358_v4 }
 0x64f   : > { %2355 = vmatpush1.bf16.msra.mxu0 %v9993_v31  ;;  %v10024_v31 = vld [vmem:[%s12576_s4 + $0x18] ss:$0 sps:$4 sm:$0x11]  }
 0x650   : > { %2356 = vmatprep.subr.bf16.mxu0 %v10358_v4 }
 0x653   : > { %2357 = vmatpush1.bf16.msra.mxu0 %v9994_v32  ;;  %v11160_v32 = vsel %vm2697_vm7, 65535, %v10358_v4 }
 0x654   : > { %2358 = vmatprep.subr.bf16.mxu0 %v10358_v4 }
 0x657   : > { %2359 = vmatpush1.bf16.msra.mxu0 %v9995_v33  ;;  %v10025_v33 = vld [vmem:[%s12576_s4 + $0x50] ss:$0 sps:$4 sm:$0x11]  }
 0x658   : > { %2360 = vmatprep.subr.bf16.mxu0 %v10358_v4 }
 0x65b   : > { %2361 = vmatpush1.bf16.msra.mxu0 %v9996_v34  ;;  %v2701_v34 = vand.u32 %v10024_v31, %v11160_v32 }
 0x65c   : > { %2362 = vmatprep.subr.bf16.mxu0 %v10358_v4 }
 0x65f   : > { %2363 = vmatpush1.bf16.msra.mxu0 %v9997_v35  ;;  %v2953_v35 = vand.u32 %v10025_v33, %v11160_v32 }
 0x660   : > { %2364 = vmatprep.subr.bf16.mxu0 %v10358_v4 }
 0x663   : > { %2365 = vmatpush1.bf16.msra.mxu0 %v9998_v36 }
 0x664   : > { %2366 = vmatprep.subr.bf16.mxu0 %v10358_v4 }
 0x667   : > { %2367 = vmatpush1.bf16.msra.mxu0 %v9999_v37 }
 0x668   : > { %2368 = vmatprep.subr.bf16.mxu0 %v10358_v4 }
 0x66b   : > { %2369 = vmatpush1.bf16.msra.mxu0 %v10000_v38 }
 0x66c   : > { %2370 = vmatprep.subr.bf16.mxu0 %v10358_v4 }
 0x66f   : > { %2371 = vmatpush1.bf16.msra.mxu0 %v10001_v39  ;;  %v2653_v39 = vpop.permute.xlu0 %2652 }
 0x670   : > { %2372 = vmatprep.subr.bf16.mxu0 %v10358_v4 }
 0x673   : > { %2373 = vmatpush1.bf16.msra.mxu0 %v2346_v41 }
 0x674   : > { %9465 = vmatprep.subr.bf16.mxu0 %v10359_v5 }
 0x676   : > { %2381 = vmatmul.mubr.bf16.vlgmr.msra.gmra.mrb[36].mxu0 %v10641_v54 }
 0x677   : > { %9467 = vmatprep.mubr.msk.bf16.mxu0 %vm10360_vm5, %v10359_v5 }
 0x715   : > { %v2235_v42 = vpop.f32.mrb[32].mxu0 }
 0x716   : > { %v11043_v43 = vadd.f32 %v2235_v42, %v2040_v16  ;;  %v9457_v44 = vpop.f32.mrb[33].mxu0 }
 0x717   : > { %v2238_v45 = vpop.f32.mrb[34].mxu0  ;;  %v2658_v44 = vpop.permute.xlu1 %2657 }
 0x718   : > { %v11045_v46 = vadd.f32 %v2238_v45, %v2041_v19  ;;  %v9458_v47 = vpop.f32.mrb[35].mxu0 }
 0x749   : > { %v2382_v48 = vpop.f32.mrb[36].mxu0 }
 0x74a   : > { %v2388_v49 = vpack.c.bf16 %v2382_v48, %v2382_v48  ;;  %v2384_v50 = vpop.f32.mrb[37].mxu0  ;;  %v10026_v48 = vld [vmem:[%s12576_s4 + $0x1c] sm:$0xff]  }
 0x74b   : > { %v2385_v51 = vpop.f32.mrb[38].mxu0  ;;  %v10027_v50 = vld [vmem:[%s12576_s4 + $0x24] sm:$0xff]  }
 0x74c   : > { %v2401_v53 = vsel %vm775_vm0, %v2388_v49, 0  ;;  %v2386_v55 = vpop.f32.mrb[39].mxu0  ;;  %v10028_v51 = vld [vmem:[%s12576_s4 + $0x2c] sm:$0xff]  }
 0x74d   : > { %9460 = vmatpush3.bf16.msra.mxu1 %v2401_v53  ;;  %v10029_v53 = vld [vmem:[%s12576_s4 + $0x34] ss:$0 sps:$4 sm:$0x11]  }
 0x74e   : > { %2550 = vmatprep.subr.bf16.mxu1 %v10358_v4  ;;  %v2777_v55 = vand.u32 %v10029_v53, %v11160_v32 }
 0x750   : > { %9462 = vmatmul.mubr.msk.bf16.vlgmr.msra.gmra.mrb[24].mxu1 %vm1134_vm6, %v10003_v56 }
 0x751   : > { %2551 = vmatpush1.bf16.msra.mxu1 %v10004_v57  ;;  %8665 = vmatprep.mubr.msk.bf16.mxu1 %vm930_vm4, %v10636_v52  ;;  %v10008_v52 = vld [vmem:[%s12571_s25 + $0x340] sm:$0xff]  }
 0x752   : > { %2552 = vmatprep.subr.bf16.mxu1 %v10358_v4 }
 0x755   : > { %2553 = vmatpush1.bf16.msra.mxu1 %v10005_v58 }
 0x756   : > { %2554 = vmatprep.subr.bf16.mxu1 %v10358_v4 }
 0x759   : > { %2555 = vmatpush1.bf16.msra.mxu1 %v10006_v59 }
 0x75a   : > { %2556 = vmatprep.subr.bf16.mxu1 %v10358_v4 }
 0x75d   : > { %2557 = vmatpush1.bf16.msra.mxu1 %v10007_v60 }
 0x75e   : > { %2558 = vmatprep.subr.bf16.mxu1 %v10358_v4 }
 0x761   : > { %2559 = vmatpush1.bf16.msra.mxu1 %v10008_v52 }
 0x762   : > { %2560 = vmatprep.subr.bf16.mxu1 %v10358_v4 }
 0x765   : > { %2561 = vmatpush1.bf16.msra.mxu1 %v10009_v61 }
 0x766   : > { %2562 = vmatprep.subr.bf16.mxu1 %v10358_v4 }
 0x769   : > { %2563 = vmatpush1.bf16.msra.mxu1 %v10010_v62 }
 0x76a   : > { %2564 = vmatprep.subr.bf16.mxu1 %v10358_v4 }
 0x76d   : > { %2565 = vmatpush1.bf16.msra.mxu1 %v10011_v63 }
 0x76e   : > { %2566 = vmatprep.subr.bf16.mxu1 %v10358_v4 }
 0x771   : > { %2567 = vmatpush1.bf16.msra.mxu1 %v10012_v0 }
 0x772   : > { %2568 = vmatprep.subr.bf16.mxu1 %v10358_v4 }
 0x775   : > { %2569 = vmatpush1.bf16.msra.mxu1 %v10013_v1 }
 0x776   : > { %2570 = vmatprep.subr.bf16.mxu1 %v10358_v4 }
 0x779   : > { %2571 = vmatpush1.bf16.msra.mxu1 %v10014_v2 }
 0x77a   : > { %2572 = vmatprep.subr.bf16.mxu1 %v10358_v4 }
 0x77d   : > { %2573 = vmatpush1.bf16.msra.mxu1 %v10015_v3 }
 0x77e   : > { %2574 = vmatprep.subr.bf16.mxu1 %v10358_v4 }
 0x781   : > { %2575 = vmatpush1.bf16.msra.mxu1 %v2548_v8 }
 0x782   : > { %9507 = vmatprep.subr.bf16.mxu1 %v10359_v5 }
 0x784   : > { %2583 = vmatmul.mubr.bf16.vlgmr.msra.gmra.mrb[28].mxu1 %v10641_v54  ;;  %v3925_v54 = vld [vmem:[%s12537_s10] sm:$0xff] }
 0x785   : > { %9515 = vmatprep.mubr.msk.bf16.mxu1 %vm10360_vm5, %v10359_v5  ;;  %9508 = vmatpush3.bf16.msra.mxu1 %v10019_v11  ;;  %v10032_v11 = vld [vmem:[%s12577_s6 + $0x10] sm:$0xff]  }
 0x786   : > { %9509 = vmatprep.subr.bf16.mxu1 %v10359_v5  ;;  %3931 = vperm.xlu1 %9888, %v3925_v54   ;;  %v10033_v54 = vld [vmem:[%s12576_s4 + $0x54] sm:$0xff]  }
 0x789   : > { %9510 = vmatpush3.bf16.msra.mxu1 %v10021_v28 }
 0x78a   : > { %3941 = vperm.xlu1 %9888, %v3927_v12   ;;  %9511 = vmatprep.subr.bf16.mxu1 %v10359_v5  ;;  %v10034_v12 = vld [vmem:[%s12576_s4 + $0x5c] sm:$0xff]  }
 0x78d   : > { %9512 = vmatpush3.bf16.msra.mxu1 %v10023_v30 }
 0x78e   : > { %9513 = vmatprep.subr.bf16.mxu1 %v10359_v5 }
 0x791   : > { %9514 = vmatpush3.bf16.msra.mxu1 %v2953_v35 }
 0x792   : > { %9537 = vmatprep.subr.bf16.mxu1 %v10359_v5 }
 0x823   : > { %v2437_v13 = vpop.f32.mrb[24].mxu1 }
 0x824   : > { %v2444_v14 = vadd.f32 %v2437_v13, %v11043_v43  ;;  %v9463_v15 = vpop.f32.mrb[25].mxu1  ;;  %v10035_v13 = vld [vmem:[%s12576_s4 + $0x64] sm:$0xff]  }
 0x825   : > { %v2440_v16 = vpop.f32.mrb[26].mxu1 }
 0x826   : > { %v2445_v17 = vadd.f32 %v2440_v16, %v11045_v46  ;;  %v9464_v18 = vpop.f32.mrb[27].mxu1 }
 0x857   : > { %v2584_v19 = vpop.f32.mrb[28].mxu1 }
 0x858   : > { %v2590_v20 = vpack.c.bf16 %v2584_v19, %v2584_v19  ;;  %v2586_v21 = vpop.f32.mrb[29].mxu1 }
 0x859   : > { %v2587_v22 = vpop.f32.mrb[30].mxu1 }
 0x85a   : > { %v2603_v23 = vsel %vm775_vm0, %v2590_v20, 0  ;;  %v2588_v24 = vpop.f32.mrb[31].mxu1 }
 0x85b   : > { %9466 = vmatpush3.bf16.msra.mxu0 %v2603_v23 }
 0x85c   : > { %9471 = vmatprep.subr.bf16.mxu0 %v10359_v5 }
 0x85e   : > { %9468 = vmatmul.mubr.msk.bf16.vlgmr.msra.gmra.mrb[40].mxu0 %vm1134_vm6, %v10017_v25 }
 0x85f   : > { %9472 = vmatpush3.bf16.msra.mxu0 %v10018_v26  ;;  %9479 = vmatprep.mubr.msk.bf16.mxu0 %vm10360_vm5, %v10359_v5 }
 0x860   : > { %9473 = vmatprep.subr.bf16.mxu0 %v10359_v5 }
 0x863   : > { %9474 = vmatpush3.bf16.msra.mxu0 %v10020_v27 }
 0x864   : > { %9475 = vmatprep.subr.bf16.mxu0 %v10359_v5 }
 0x867   : > { %9476 = vmatpush3.bf16.msra.mxu0 %v10022_v29 }
 0x868   : > { %9477 = vmatprep.subr.bf16.mxu0 %v10359_v5 }
 0x86b   : > { %9478 = vmatpush3.bf16.msra.mxu0 %v2701_v34 }
 0x86c   : > { %9483 = vmatprep.subr.bf16.mxu0 %v10359_v5 }
 0x931   : > { %v2639_v36 = vpop.f32.mrb[40].mxu0 }
 0x932   : > { %v2646_v37 = vadd.f32 %v2639_v36, %v2444_v14  ;;  %v9469_v38 = vpop.f32.mrb[41].mxu0  ;;  %v10036_v14 = vld [vmem:[%s12576_s4 + $0x6c] ss:$0 sps:$4 sm:$0x11]  }
 0x933   : > { %v2642_v40 = vpop.f32.mrb[42].mxu0  ;;  %v3081_v15 = vand.u32 %v10036_v14, %v11160_v32  ;;  %v10037_v38 = vld [vmem:[%s12577_s6 + $0x18] sm:$0xff]   ;;  %v10049_v14 = vld [vmem:[%s12576_s4 + $0xb0] sm:$0xff]  }
 0x934   : > { %v2660_v41 = vadd.f32 %v2653_v39, %v2646_v37  ;;  %v2647_v42 = vadd.f32 %v2642_v40, %v2445_v17  ;;  %v9470_v43 = vpop.f32.mrb[43].mxu0  ;;  %v10038_v39 = vld [vmem:[%s12576_s4 + $0x70] sm:$0xff]   ;;  %v10039_v40 = vld [vmem:[%s12576_s4 + $0x78] sm:$0xff]  }
 0x936   : > { %v2661_v45 = vadd.f32 %v2658_v44, %v2647_v42  ;;  %v2662_v46 = vmax.f32 %v2660_v41, 0.0  ;;  %v10040_v41 = vld [vmem:[%s12576_s4 + $0x80] sm:$0xff]   ;;  %v10041_v42 = vld [vmem:[%s12576_s4 + $0x88] ss:$0 sps:$4 sm:$0x11]  }
 0x937   : > { %v3209_v43 = vand.u32 %v10041_v42, %v11160_v32 }
 0x938   : > { %v2663_v47 = vmax.f32 %v2661_v45, 0.0 }
 0x93a   : > { %v11173_v49 = vpack.c.bf16 %v2663_v47, %v2662_v46 }
 0x93c   : > { %9480 = vmatmul.mubr.msk.bf16.vlgmr.msra.gmra.mrb[44].mxu0 %vm2693_vm8, %v11173_v49  ;;  %9516 = vmatmul.mubr.msk.bf16.vlgmr.msra.gmra.mrb[32].mxu1 %vm2693_vm8, %v11173_v49 }
 0x93d   : > { %9484 = vmatpush3.bf16.msra.mxu0 %v10026_v48  ;;  %9491 = vmatprep.mubr.msk.bf16.mxu0 %vm10360_vm5, %v10359_v5 }
 0x93e   : > { %9485 = vmatprep.subr.bf16.mxu0 %v10359_v5  ;;  %9539 = vmatprep.mubr.msk.bf16.mxu1 %vm10360_vm5, %v10359_v5 }
 0x941   : > { %9486 = vmatpush3.bf16.msra.mxu0 %v10027_v50 }
 0x942   : > { %9487 = vmatprep.subr.bf16.mxu0 %v10359_v5 }
 0x945   : > { %9488 = vmatpush3.bf16.msra.mxu0 %v10028_v51 }
 0x946   : > { %9489 = vmatprep.subr.bf16.mxu0 %v10359_v5 }
 0x949   : > { %9490 = vmatpush3.bf16.msra.mxu0 %v2777_v55 }
 0x94a   : > { %9495 = vmatprep.subr.bf16.mxu0 %v10359_v5 }
 0x94c   : > { %9492 = vmatmul.mubr.msk.bf16.vlgmr.msra.gmra.mrb[48].mxu0 %vm2693_vm8, %v11173_v49 }
 0x94d   : > { %9497 = vmatprep.mubr.msk.bf16.mxu0 %vm10360_vm5, %v10359_v5 }
 0xa0f   : > { %v2737_v56 = vpop.f32.mrb[44].mxu0  ;;  %v2989_v57 = vpop.f32.mrb[32].mxu1 }
 0xa10   : > { %v9481_v58 = vpop.f32.mrb[45].mxu0  ;;  %v9517_v59 = vpop.f32.mrb[33].mxu1 }
 0xa11   : > { %v2740_v60 = vpop.f32.mrb[46].mxu0  ;;  %v2992_v52 = vpop.f32.mrb[34].mxu1  ;;  %v10042_v58 = vld [vmem:[%s12577_s6 + $0x20] sm:$0xff]   ;;  %v10043_v59 = vld [vmem:[%s12576_s4 + $0x8c] sm:$0xff]  }
 0xa12   : > { %v2744_v61 = vpack.c.bf16 %v2740_v60, %v2737_v56  ;;  %v2996_v62 = vpack.c.bf16 %v2992_v52, %v2989_v57  ;;  %v9482_v63 = vpop.f32.mrb[47].mxu0  ;;  %v9518_v0 = vpop.f32.mrb[35].mxu1  ;;  %v10044_v60 = vld [vmem:[%s12576_s4 + $0x94] sm:$0xff]   ;;  %v10045_v52 = vld [vmem:[%s12576_s4 + $0x9c] sm:$0xff]  }
 0xa1f   : > { %v2813_v1 = vpop.f32.mrb[48].mxu0 }
 0xa20   : > { %v9493_v2 = vpop.f32.mrb[49].mxu0 }
 0xa21   : > { %v2816_v3 = vpop.f32.mrb[50].mxu0 }
 0xa22   : > { %v2820_v6 = vpack.c.bf16 %v2816_v3, %v2813_v1  ;;  %v9494_v8 = vpop.f32.mrb[51].mxu0 }
 0xa24   : > { %9496 = vmatpush3.bf16.msra.mxu0 %v2820_v6 }
 0xa25   : > { %9501 = vmatprep.subr.bf16.mxu0 %v10359_v5 }
 0xa27   : > { %9498 = vmatmul.mubr.msk.bf16.vlgmr.msra.gmra.mrb[52].mxu0 %vm2829_vm9, %v10030_v9 }
 0xa28   : > { %9502 = vmatpush3.bf16.msra.mxu0 %v2744_v61  ;;  %9503 = vmatprep.mubr.msk.bf16.mxu0 %vm10360_vm5, %v10359_v5  ;;  %v10046_v61 = vld [vmem:[%s12576_s4 + $0xa4] ss:$0 sps:$4 sm:$0x11]  }
 0xa29   : > { %9519 = vmatprep.subr.bf16.mxu0 %v10359_v5 }
 0xa2f   : > { %9504 = vmatmul.mubr.msk.bf16.vlgmr.msra.gmra.mrb[56].mxu0 %vm2829_vm9, %v10031_v10 }
 0xa30   : > { %9520 = vmatpush3.bf16.msra.mxu0 %v2996_v62  ;;  %9521 = vmatprep.mubr.msk.bf16.mxu0 %vm10360_vm5, %v10359_v5  ;;  %v3337_v62 = vand.u32 %v10046_v61, %v11160_v32 }
 0xa31   : > { %9525 = vmatprep.subr.bf16.mxu0 %v10359_v5 }
 0xa37   : > { %9522 = vmatmul.mubr.msk.bf16.vlgmr.msra.gmra.mrb[60].mxu0 %vm2829_vm9, %v10032_v11 }
 0xa38   : > { %9526 = vmatpush3.bf16.msra.mxu0 %v10033_v54  ;;  %9533 = vmatprep.mubr.msk.bf16.mxu0 %vm10360_vm5, %v10359_v5 }
 0xa39   : > { %9527 = vmatprep.subr.bf16.mxu0 %v10359_v5 }
 0xa3c   : > { %9528 = vmatpush3.bf16.msra.mxu0 %v10034_v12  ;;  %v10047_v12 = vld [vmem:[%s12577_s6 + $0x28] sm:$0xff]  }
 0xa3d   : > { %9529 = vmatprep.subr.bf16.mxu0 %v10359_v5 }
 0xa40   : > { %9530 = vmatpush3.bf16.msra.mxu0 %v10035_v13  ;;  %v10048_v13 = vld [vmem:[%s12576_s4 + $0xa8] sm:$0xff]  }
 0xa41   : > { %9531 = vmatprep.subr.bf16.mxu0 %v10359_v5 }
 0xa44   : > { %9532 = vmatpush3.bf16.msra.mxu0 %v3081_v15  ;;  %v10050_v15 = vld [vmem:[%s12576_s4 + $0xb8] sm:$0xff]  }
 0xa45   : > { %9555 = vmatprep.subr.bf16.mxu0 %v10359_v5 }
 0xa47   : > { %9534 = vmatmul.mubr.msk.bf16.vlgmr.msra.gmra.mrb[64].mxu0 %vm2693_vm8, %v11173_v49 }
 0xa48   : > { %9557 = vmatprep.mubr.msk.bf16.mxu0 %vm10360_vm5, %v10359_v5 }
 0xafa   : > { %v2867_v16 = vpop.f32.mrb[52].mxu0 }
 0xafb   : > { %v9499_v17 = vpop.f32.mrb[53].mxu0 }
 0xafc   : > { %v2870_v18 = vpop.f32.mrb[54].mxu0 }
 0xafd   : > { %v9500_v19 = vpop.f32.mrb[55].mxu0 }
 0xb02   : > { %v2916_v20 = vpop.f32.mrb[56].mxu0 }
 0xb03   : > { %v2917_v21 = vadd.f32 %v2916_v20, %v2867_v16  ;;  %v9505_v22 = vpop.f32.mrb[57].mxu0  ;;  %v10051_v16 = vld [vmem:[%s12576_s4 + $0xc0] ss:$0 sps:$4 sm:$0x11]  }
 0xb04   : > { %v2919_v23 = vpop.f32.mrb[58].mxu0  ;;  %v3465_v17 = vand.u32 %v10051_v16, %v11160_v32 }
 0xb05   : > { %v2920_v24 = vadd.f32 %v2919_v23, %v2870_v18  ;;  %v9506_v25 = vpop.f32.mrb[59].mxu0 }
 0xb0a   : > { %v3042_v26 = vpop.f32.mrb[60].mxu0 }
 0xb0b   : > { %v3049_v27 = vadd.f32 %v3042_v26, %v2917_v21  ;;  %v9523_v28 = vpop.f32.mrb[61].mxu0 }
 0xb0c   : > { %v3045_v29 = vpop.f32.mrb[62].mxu0 }
 0xb0d   : > { %v3050_v30 = vadd.f32 %v3045_v29, %v2920_v24  ;;  %v9524_v31 = vpop.f32.mrb[63].mxu0  ;;  %v10052_v29 = vld [vmem:[%s12577_s6 + $0x30] sm:$0xff]  }
 0xb0e   : > { %v10054_v31 = vld [vmem:[%s12576_s4 + $0xcc] sm:$0xff]  }
 0xb1a   : > { %v3117_v33 = vpop.f32.mrb[64].mxu0 }
 0xb1b   : > { %v9535_v34 = vpop.f32.mrb[65].mxu0 }
 0xb1c   : > { %v3120_v35 = vpop.f32.mrb[66].mxu0  ;;  %v10056_v34 = vld [vmem:[%s12576_s4 + $0xdc] ss:$0 sps:$4 sm:$0x11]  }
 0xb1d   : > { %v3124_v36 = vpack.c.bf16 %v3120_v35, %v3117_v33  ;;  %v9536_v37 = vpop.f32.mrb[67].mxu0  ;;  %v10055_v33 = vld [vmem:[%s12576_s4 + $0xd4] sm:$0xff]   ;;  %v3593_v35 = vand.u32 %v10056_v34, %v11160_v32 }
 0xb1f   : > { %9538 = vmatpush3.bf16.msra.mxu1 %v3124_v36 }
 0xb20   : > { %9543 = vmatprep.subr.bf16.mxu1 %v10359_v5 }
 0xb22   : > { %9540 = vmatmul.mubr.msk.bf16.vlgmr.msra.gmra.mrb[36].mxu1 %vm2829_vm9, %v10037_v38 }
 0xb23   : > { %9544 = vmatpush3.bf16.msra.mxu1 %v10038_v39  ;;  %9551 = vmatprep.mubr.msk.bf16.mxu1 %vm10360_vm5, %v10359_v5 }
 0xb24   : > { %9545 = vmatprep.subr.bf16.mxu1 %v10359_v5 }
 0xb27   : > { %9546 = vmatpush3.bf16.msra.mxu1 %v10039_v40 }
 0xb28   : > { %9547 = vmatprep.subr.bf16.mxu1 %v10359_v5 }
 0xb2b   : > { %9548 = vmatpush3.bf16.msra.mxu1 %v10040_v41 }
 0xb2c   : > { %9549 = vmatprep.subr.bf16.mxu1 %v10359_v5 }
 0xb2f   : > { %9550 = vmatpush3.bf16.msra.mxu1 %v3209_v43 }
 0xb30   : > { %9573 = vmatprep.subr.bf16.mxu1 %v10359_v5 }
 0xb32   : > { %9552 = vmatmul.mubr.msk.bf16.vlgmr.msra.gmra.mrb[40].mxu1 %vm2693_vm8, %v11173_v49 }
 0xb33   : > { %9575 = vmatprep.mubr.msk.bf16.mxu1 %vm10360_vm5, %v10359_v5 }
 0xbf5   : > { %v3170_v44 = vpop.f32.mrb[36].mxu1 }
 0xbf6   : > { %v3177_v45 = vadd.f32 %v3170_v44, %v3049_v27  ;;  %v9541_v46 = vpop.f32.mrb[37].mxu1 }
 0xbf7   : > { %v3173_v47 = vpop.f32.mrb[38].mxu1 }
 0xbf8   : > { %v3178_v48 = vadd.f32 %v3173_v47, %v3050_v30  ;;  %v9542_v50 = vpop.f32.mrb[39].mxu1  ;;  %v10053_v30 = vld [vmem:[%s12576_s4 + $0xc4] sm:$0xff]   ;;  %v10057_v47 = vld [vmem:[%s12577_s6 + $0x38] sm:$0xff]  }
 0xbf9   : > { %v10059_v50 = vld [vmem:[%s12576_s4 + $0xe8] sm:$0xff]  }
 0xc05   : > { %v3245_v51 = vpop.f32.mrb[40].mxu1 }
 0xc06   : > { %v9553_v53 = vpop.f32.mrb[41].mxu1 }
 0xc07   : > { %v3248_v55 = vpop.f32.mrb[42].mxu1  ;;  %v10061_v53 = vld [vmem:[%s12576_s4 + $0xf8] ss:$0 sps:$4 sm:$0x11]  }
 0xc08   : > { %v3252_v56 = vpack.c.bf16 %v3248_v55, %v3245_v51  ;;  %v9554_v57 = vpop.f32.mrb[43].mxu1  ;;  %v10060_v51 = vld [vmem:[%s12576_s4 + $0xf0] sm:$0xff]   ;;  %v3721_v55 = vand.u32 %v10061_v53, %v11160_v32 }
 0xc0a   : > { %9556 = vmatpush3.bf16.msra.mxu0 %v3252_v56 }
 0xc0b   : > { %9561 = vmatprep.subr.bf16.mxu0 %v10359_v5 }
 0xc0d   : > { %9558 = vmatmul.mubr.msk.bf16.vlgmr.msra.gmra.mrb[68].mxu0 %vm2829_vm9, %v10042_v58 }
 0xc0e   : > { %9562 = vmatpush3.bf16.msra.mxu0 %v10043_v59  ;;  %9569 = vmatprep.mubr.msk.bf16.mxu0 %vm10360_vm5, %v10359_v5 }
 0xc0f   : > { %9563 = vmatprep.subr.bf16.mxu0 %v10359_v5 }
 0xc12   : > { %9564 = vmatpush3.bf16.msra.mxu0 %v10044_v60 }
 0xc13   : > { %9565 = vmatprep.subr.bf16.mxu0 %v10359_v5 }
 0xc16   : > { %9566 = vmatpush3.bf16.msra.mxu0 %v10045_v52 }
 0xc17   : > { %9567 = vmatprep.subr.bf16.mxu0 %v10359_v5 }
 0xc1a   : > { %9568 = vmatpush3.bf16.msra.mxu0 %v3337_v62 }
 0xc1b   : > { %9591 = vmatprep.subr.bf16.mxu0 %v10359_v5 }
 0xc1d   : > { %9570 = vmatmul.mubr.msk.bf16.vlgmr.msra.gmra.mrb[72].mxu0 %vm2693_vm8, %v11173_v49 }
 0xc1e   : > { %9593 = vmatprep.mubr.msk.bf16.mxu0 %vm10360_vm5, %v10359_v5 }
 0xce0   : > { %v3298_v63 = vpop.f32.mrb[68].mxu0 }
 0xce1   : > { %v3305_v0 = vadd.f32 %v3298_v63, %v3177_v45  ;;  %v9559_v1 = vpop.f32.mrb[69].mxu0 }
 0xce2   : > { %v3301_v2 = vpop.f32.mrb[70].mxu0 }
 0xce3   : > { %v3306_v3 = vadd.f32 %v3301_v2, %v3178_v48  ;;  %v9560_v6 = vpop.f32.mrb[71].mxu0  ;;  %v10058_v48 = vld [vmem:[%s12576_s4 + $0xe0] sm:$0xff]  }
 0xce4   : > { %v10062_v2 = vld [vmem:[%s12577_s6 + $0x40] sm:$0xff]  }
 0xcf0   : > { %v3373_v8 = vpop.f32.mrb[72].mxu0 }
 0xcf1   : > { %v9571_v9 = vpop.f32.mrb[73].mxu0 }
 0xcf2   : > { %v3376_v10 = vpop.f32.mrb[74].mxu0  ;;  %v3824_v9 = vpop.permute.xlu1 %3823 }
 0xcf3   : > { %v3380_v11 = vpack.c.bf16 %v3376_v10, %v3373_v8  ;;  %v9572_v54 = vpop.f32.mrb[75].mxu0 }
 0xcf5   : > { %9574 = vmatpush3.bf16.msra.mxu1 %v3380_v11 }
 0xcf6   : > { %9579 = vmatprep.subr.bf16.mxu1 %v10359_v5 }
 0xcf8   : > { %9576 = vmatmul.mubr.msk.bf16.vlgmr.msra.gmra.mrb[44].mxu1 %vm2829_vm9, %v10047_v12 }
 0xcf9   : > { %9580 = vmatpush3.bf16.msra.mxu1 %v10048_v13  ;;  %9587 = vmatprep.mubr.msk.bf16.mxu1 %vm10360_vm5, %v10359_v5  ;;  %v3829_v13 = vpop.permute.xlu0 %3828 }
 0xcfa   : > { %9581 = vmatprep.subr.bf16.mxu1 %v10359_v5 }
 0xcfd   : > { %9582 = vmatpush3.bf16.msra.mxu1 %v10049_v14 }
 0xcfe   : > { %9583 = vmatprep.subr.bf16.mxu1 %v10359_v5 }
 0xd01   : > { %9584 = vmatpush3.bf16.msra.mxu1 %v10050_v15 }
 0xd02   : > { %9585 = vmatprep.subr.bf16.mxu1 %v10359_v5 }
 0xd05   : > { %9586 = vmatpush3.bf16.msra.mxu1 %v3465_v17 }
 0xd06   : > { %9609 = vmatprep.subr.bf16.mxu1 %v10359_v5 }
 0xd08   : > { %9588 = vmatmul.mubr.msk.bf16.vlgmr.msra.gmra.mrb[48].mxu1 %vm2693_vm8, %v11173_v49 }
 0xd09   : > { %9611 = vmatprep.mubr.msk.bf16.mxu1 %vm10360_vm5, %v10359_v5 }
 0xdcb   : > { %v3426_v18 = vpop.f32.mrb[44].mxu1 }
 0xdcc   : > { %v3433_v19 = vadd.f32 %v3426_v18, %v3305_v0  ;;  %v9577_v20 = vpop.f32.mrb[45].mxu1 }
 0xdcd   : > { %v3429_v21 = vpop.f32.mrb[46].mxu1 }
 0xdce   : > { %v3434_v22 = vadd.f32 %v3429_v21, %v3306_v3  ;;  %v9578_v23 = vpop.f32.mrb[47].mxu1 }
 0xddb   : > { %v3501_v24 = vpop.f32.mrb[48].mxu1 }
 0xddc   : > { %v9589_v25 = vpop.f32.mrb[49].mxu1 }
 0xddd   : > { %v3504_v26 = vpop.f32.mrb[50].mxu1 }
 0xdde   : > { %v3508_v27 = vpack.c.bf16 %v3504_v26, %v3501_v24  ;;  %v9590_v28 = vpop.f32.mrb[51].mxu1 }
 0xde0   : > { %9592 = vmatpush3.bf16.msra.mxu0 %v3508_v27 }
 0xde1   : > { %9597 = vmatprep.subr.bf16.mxu0 %v10359_v5 }
 0xde3   : > { %9594 = vmatmul.mubr.msk.bf16.vlgmr.msra.gmra.mrb[76].mxu0 %vm2829_vm9, %v10052_v29  ;;  %v3937_v29 = vpop.permute.xlu0 %3936 }
 0xde4   : > { %9598 = vmatpush3.bf16.msra.mxu0 %v10053_v30  ;;  %9605 = vmatprep.mubr.msk.bf16.mxu0 %vm10360_vm5, %v10359_v5 }
 0xde5   : > { %9599 = vmatprep.subr.bf16.mxu0 %v10359_v5 }
 0xde8   : > { %9600 = vmatpush3.bf16.msra.mxu0 %v10054_v31  ;;  %v3932_v31 = vpop.permute.xlu1 %3931 }
 0xde9   : > { %9601 = vmatprep.subr.bf16.mxu0 %v10359_v5 }
 0xdec   : > { %9602 = vmatpush3.bf16.msra.mxu0 %v10055_v33 }
 0xded   : > { %9603 = vmatprep.subr.bf16.mxu0 %v10359_v5 }
 0xdf0   : > { %9604 = vmatpush3.bf16.msra.mxu0 %v3593_v35 }
 0xdf1   : > { %9627 = vmatprep.subr.bf16.mxu0 %v10359_v5 }
 0xdf3   : > { %9606 = vmatmul.mubr.msk.bf16.vlgmr.msra.gmra.mrb[80].mxu0 %vm2693_vm8, %v11173_v49 }
 0xdf4   : > { %9629 = vmatprep.mubr.msk.bf16.mxu0 %vm10360_vm5, %v10359_v5 }
 0xeb6   : > { %v3554_v36 = vpop.f32.mrb[76].mxu0 }
 0xeb7   : > { %v3561_v37 = vadd.f32 %v3554_v36, %v3433_v19  ;;  %v9595_v38 = vpop.f32.mrb[77].mxu0 }
 0xeb8   : > { %v3557_v39 = vpop.f32.mrb[78].mxu0 }
 0xeb9   : > { %v3562_v40 = vadd.f32 %v3557_v39, %v3434_v22  ;;  %v9596_v41 = vpop.f32.mrb[79].mxu0  ;;  %v10064_v22 = vld [vmem:[%s12536_s9 + $0x8] sm:$0xff]  }
 0xec6   : > { %v3629_v42 = vpop.f32.mrb[80].mxu0 }
 0xec7   : > { %v9607_v43 = vpop.f32.mrb[81].mxu0 }
 0xec8   : > { %v3632_v44 = vpop.f32.mrb[82].mxu0 }
 0xec9   : > { %v3636_v45 = vpack.c.bf16 %v3632_v44, %v3629_v42  ;;  %v9608_v46 = vpop.f32.mrb[83].mxu0  ;;  %v3947_v44 = vpop.permute.xlu0 %3946 }
 0xecb   : > { %9610 = vmatpush3.bf16.msra.mxu1 %v3636_v45 }
 0xecc   : > { %9615 = vmatprep.subr.bf16.mxu1 %v10359_v5 }
 0xece   : > { %9612 = vmatmul.mubr.msk.bf16.vlgmr.msra.gmra.mrb[52].mxu1 %vm2829_vm9, %v10057_v47  ;;  %v3942_v47 = vpop.permute.xlu1 %3941 }
 0xecf   : > { %9616 = vmatpush3.bf16.msra.mxu1 %v10058_v48  ;;  %9623 = vmatprep.mubr.msk.bf16.mxu1 %vm10360_vm5, %v10359_v5 }
 0xed0   : > { %9617 = vmatprep.subr.bf16.mxu1 %v10359_v5 }
 0xed3   : > { %9618 = vmatpush3.bf16.msra.mxu1 %v10059_v50 }
 0xed4   : > { %9619 = vmatprep.subr.bf16.mxu1 %v10359_v5 }
 0xed7   : > { %9620 = vmatpush3.bf16.msra.mxu1 %v10060_v51 }
 0xed8   : > { %9621 = vmatprep.subr.bf16.mxu1 %v10359_v5 }
 0xedb   : > { %9622 = vmatpush3.bf16.msra.mxu1 %v3721_v55 }
 0xedc   : > { %9639 = vmatprep.subr.bf16.mxu1 %v10359_v5 }
 0xede   : > { %9624 = vmatmul.mubr.msk.bf16.vlgmr.msra.gmra.mrb[56].mxu1 %vm2693_vm8, %v11173_v49  ;;  %v10063_v49 = vld [vmem:[%s12536_s9] sm:$0xff]  }
 0xedf   : > { %9643 = vmatprep.mubr.msk.bf16.mxu1 %vm10360_vm5, %v10359_v5 }
 0xfa1   : > { %v3682_v56 = vpop.f32.mrb[52].mxu1 }
 0xfa2   : > { %v3689_v57 = vadd.f32 %v3682_v56, %v3561_v37  ;;  %v9613_v58 = vpop.f32.mrb[53].mxu1 }
 0xfa3   : > { %v3685_v59 = vpop.f32.mrb[54].mxu1 }
 0xfa4   : > { %v3690_v60 = vadd.f32 %v3685_v59, %v3562_v40  ;;  %v9614_v52 = vpop.f32.mrb[55].mxu1 }
 0xfb1   : > { %v3757_v61 = vpop.f32.mrb[56].mxu1 }
 0xfb2   : > { %v9625_v62 = vpop.f32.mrb[57].mxu1 }
 0xfb3   : > { %v3760_v63 = vpop.f32.mrb[58].mxu1 }
 0xfb4   : > { %v3764_v0 = vpack.c.bf16 %v3760_v63, %v3757_v61  ;;  %v9626_v1 = vpop.f32.mrb[59].mxu1 }
 0xfb6   : > { %9628 = vmatpush3.bf16.msra.mxu0 %v3764_v0 }
 0xfb9   : > { %9630 = vmatmul.mubr.msk.bf16.vlgmr.msra.gmra.mrb[84].mxu0 %vm2829_vm9, %v10062_v2 }
 0xfba   : > { %9635 = vmatprep.mubr.msk.bf16.mxu0 %vm2829_vm9, %v10063_v49 }
0x108c   : > { %v3810_v3 = vpop.f32.mrb[84].mxu0 }
0x108d   : > { %v3817_v6 = vadd.f32 %v3810_v3, %v3689_v57  ;;  %v9631_v8 = vpop.f32.mrb[85].mxu0 }
0x108e   : > { %v3813_v10 = vpop.f32.mrb[86].mxu0 }
0x108f   : > { %v3831_v11 = vadd.f32 %v3824_v9, %v3817_v6  ;;  %v3818_v54 = vadd.f32 %v3813_v10, %v3690_v60  ;;  %v9632_v12 = vpop.f32.mrb[87].mxu0 }
0x1091   : > { %v3833_v14 = vmax.f32 %v3831_v11, 0.0  ;;  %v3832_v15 = vadd.f32 %v3829_v13, %v3818_v54 }
0x1093   : > { %v3835_v16 = vmul.f32 %v3833_v14, %v3833_v14  ;;  %v3834_v17 = vmax.f32 %v3832_v15, 0.0 }
0x1095   : > { %v3836_v18 = vmul.f32 %v3834_v17, %v3834_v17  ;;  %v3851_v19 = vpack.c.bf16 %v3834_v17, %v3833_v14  ;;  %v3838_v20 = vsel %vm3837_vm10, %v3835_v16, 0.0 }
0x1097   : > { %v3839_v21 = vsel %vm3837_vm10, %v3836_v18, 0.0  ;;  %9633 = vmatprep.subr.bf16.mxu0 %v3851_v19 }
0x1098   : > { %v3840_v23 = vadd.f32 %v3839_v21, %v3838_v20  ;;  %9634 = vmatpush3.bf16.msra.mxu0 %v3851_v19 }
0x1099   : > { %9647 = vmatprep.subr.bf16.mxu0 %v10359_v5 }
0x109a   : > { %v3841_v24 = vrot.slane %v3840_v23, 4 }
0x109b   : > { %9636 = vmatmul.mubr.msk.bf16.vlgmr.msra.gmra.mrb[88].mxu0 %vm2829_vm9, %v10064_v22 }
0x109c   : > { %9649 = vmatprep.mubr.msk.bf16.mxu0 %vm10360_vm5, %v10359_v5  ;;  %v3842_v25 = vadd.f32 %v3841_v24, %v3840_v23 }
0x109e   : > { %v3843_v26 = vrot.slane %v3842_v25, 2 }
0x10a0   : > { %v3844_v27 = vadd.f32 %v3843_v26, %v3842_v25 }
0x10a2   : > { %v3845_v28 = vrot.slane %v3844_v27, 1 }
0x10a4   : > { %v3846_v33 = vadd.f32 %v3845_v28, %v3844_v27 }
0x116e   : > { %v9637_v30 = vpop.f32.mrb[88].mxu0 }
0x116f   : > { %v3919_v34 = vmul.f32 2.0, %v9637_v30  ;;  %v3902_v35 = vpop.f32.mrb[89].mxu0 }
0x1170   : > { %v3917_v36 = vmul.f32 2.0, %v3902_v35  ;;  %v9638_v37 = vpop.f32.mrb[90].mxu0 }
0x1171   : > { %v3923_v38 = vsub.f32 %v3846_v33, %v3919_v34  ;;  %v3920_v39 = vmul.f32 2.0, %v9638_v37  ;;  %v3905_v40 = vpop.f32.mrb[91].mxu0 }
0x1172   : > { %v3921_v41 = vsub.f32 %v3846_v33, %v3917_v36  ;;  %v3918_v42 = vmul.f32 2.0, %v3905_v40 }
0x1173   : > { %v3924_v43 = vsub.f32 %v3846_v33, %v3920_v39  ;;  %v3951_v53 = vadd.f32 %v3942_v47, %v3923_v38 }
0x1174   : > { %v3922_v45 = vsub.f32 %v3846_v33, %v3918_v42  ;;  %v3949_v46 = vadd.f32 %v3932_v31, %v3921_v41 }
0x1175   : > { %v3952_v48 = vadd.f32 %v3947_v44, %v3924_v43  ;;  %v3955_v59 = vmax.f32 %v3951_v53, 0.0  ;;  %v10065_v44 = vld [vmem:[%s12538_s11] sm:$0xff]   ;;  %v10067_v53 = vld [vmem:[%s12539_s12 + $0x8] sm:$0xff]  }
0x1176   : > { %v3953_v50 = vmax.f32 %v3949_v46, 0.0  ;;  %v3950_v51 = vadd.f32 %v3937_v29, %v3922_v45 }
0x1177   : > { %v3956_v57 = vmax.f32 %v3952_v48, 0.0  ;;  %v3963_v52 = vsel %vm3837_vm10, %v3955_v59, inf  ;;  %v10072_v59 = vld [vmem:[%s12539_s12 + $0x30] sm:$0xff]  }
0x1178   : > { %v3957_v55 = vsel %vm3837_vm10, %v3953_v50, inf  ;;  %v3954_v56 = vmax.f32 %v3950_v51, 0.0  ;;  %v10066_v51 = vld [vmem:[%s12539_s12] sm:$0xff]  }
0x1179   : > { %3958 = vmin.xlane.f32.xlu1 %v3957_v55  ;;  %v3966_v60 = vsel %vm3837_vm10, %v3956_v57, inf  ;;  %v10068_v55 = vld [vmem:[%s12539_s12 + $0x10] sm:$0xff]   ;;  %v10070_v57 = vld [vmem:[%s12539_s12 + $0x20] sm:$0xff]  }
0x117a   : > { %v3960_v58 = vsel %vm3837_vm10, %v3954_v56, inf  ;;  %v10069_v56 = vld [vmem:[%s12539_s12 + $0x18] sm:$0xff]  }
0x117b   : > { %3961 = vmin.xlane.f32.xlu0 %v3960_v58  ;;  %v10071_v58 = vld [vmem:[%s12539_s12 + $0x28] sm:$0xff]  }
0x117d   : > { %3967 = vmin.xlane.f32.xlu1 %v3966_v60  ;;  %v10073_v60 = vld [vmem:[%s12539_s12 + $0x38] sm:$0xff]  }
0x117f   : > { %3964 = vmin.xlane.f32.xlu0 %v3963_v52  ;;  %v10074_v52 = vld [vmem:[%s12539_s12 + $0x40] sm:$0xff]  }
0x1206   : > { %v3959_v61 = vpop.xlane.xlu1 %3958 }
0x1207   : > { %3970 = vst.msk [vmem:[%s752_s5] sm:$0xff] %vm3969_vm11, %v3959_v61  ;;  %v3974_v2 = vsub.f32 0.0, %v3959_v61  ;;  %v10075_v61 = vld [vmem:[%s12539_s12 + $0x48] sm:$0xff]  }
0x1208   : > { %v3962_v62 = vpop.xlane.xlu0 %3961 }
0x1209   : > { %3971 = vst.msk [vmem:[%s752_s5 + $0x8] sm:$0xff] %vm3969_vm11, %v3962_v62  ;;  %v3975_v0 = vsub.f32 0.0, %v3962_v62  ;;  %v10076_v62 = vld [vmem:[%s12539_s12 + $0x50] sm:$0xff]  }
0x120a   : > { %v3968_v63 = vpop.xlane.xlu1 %3967 }
0x120b   : > { %3973 = vst.msk [vmem:[%s752_s5 + $0x18] sm:$0xff] %vm3969_vm11, %v3968_v63  ;;  %v3977_v49 = vsub.f32 0.0, %v3968_v63  ;;  %v3978_v6 = vmax.f32 %v3974_v2, %v3975_v0  ;;  %v10077_v63 = vld [vmem:[%s12539_s12 + $0x58] sm:$0xff]  }
0x120c   : > { %v3965_v1 = vpop.xlane.xlu0 %3964 }
0x120d   : > { %3972 = vst.msk [vmem:[%s752_s5 + $0x10] sm:$0xff] %vm3969_vm11, %v3965_v1  ;;  %v3976_v3 = vsub.f32 0.0, %v3965_v1  ;;  %v10079_v1 = vld [vmem:[%s12539_s12 + $0x68] sm:$0xff]   ;;  %s747_s5 = scalar_lea.vmem %s12550_s23, %s9257_s0 }
0x120f   : > { %v3979_v8 = vmax.f32 %v3976_v3, %v3977_v49 }
0x1211   : > { %v3980_v9 = vmax.f32 %v3978_v6, %v3979_v8  ;;  %v10083_v6 = vld [vmem:[%s12539_s12 + $0x88] sm:$0xff]   ;;  %v10084_v8 = vld [vmem:[%s12539_s12 + $0x90] sm:$0xff]  }
0x1213   : > { %v3981_v10 = vrot.slane %v3980_v9, 4 }
0x1215   : > { %v3982_v11 = vmax.f32 %v3980_v9, %v3981_v10  ;;  %v10085_v9 = vld [vmem:[%s12539_s12 + $0x98] sm:$0xff]   ;;  %v10086_v10 = vld [vmem:[%s12539_s12 + $0xa0] sm:$0xff]  }
0x1217   : > { %v3983_v54 = vrot.slane %v3982_v11, 2 }
0x1219   : > { %v3984_v12 = vmax.f32 %v3982_v11, %v3983_v54  ;;  %v10087_v11 = vld [vmem:[%s12539_s12 + $0xa8] sm:$0xff]   ;;  %v10088_v54 = vld [vmem:[%s12539_s12 + $0xb0] sm:$0xff]  }
0x121b   : > { %v3985_v13 = vrot.slane %v3984_v12, 1 }
0x121d   : > { %v3986_v14 = vmax.f32 %v3984_v12, %v3985_v13  ;;  %v10089_v12 = vld [vmem:[%s12539_s12 + $0xb8] sm:$0xff]   ;;  %v10090_v13 = vld [vmem:[%s12539_s12 + $0xc0] sm:$0xff]  }
0x121f   : > { %v3987_v15 = vsub.f32 %v3974_v2, %v3986_v14  ;;  %v3988_v16 = vsub.f32 %v3975_v0, %v3986_v14  ;;  %v3989_v17 = vsub.f32 %v3976_v3, %v3986_v14  ;;  %v3990_v18 = vsub.f32 %v3977_v49, %v3986_v14  ;;  %v10078_v0 = vld [vmem:[%s12539_s12 + $0x60] sm:$0xff]   ;;  %v10080_v2 = vld [vmem:[%s12539_s12 + $0x70] sm:$0xff]   ;;  %v10081_v49 = vld [vmem:[%s12539_s12 + $0x78] sm:$0xff]  }
0x1220   : > { %v10082_v3 = vld [vmem:[%s12539_s12 + $0x80] sm:$0xff]  }
0x1221   : > { %v3991_v19 = vmul.f32 1.442695, %v3987_v15  ;;  %v3993_v20 = vmul.f32 1.442695, %v3988_v16  ;;  %v3995_v21 = vmul.f32 1.442695, %v3989_v17 }
0x1222   : > { %v3997_v22 = vmul.f32 1.442695, %v3990_v18  ;;  %v4118_v14 = vld [vmem:[%s12540_s13] sm:$0xff]  ;;  %v4119_v16 = vld [vmem:[%s12540_s13 + $0x8] sm:$0xff] }
0x1223   : > { %10331 = vpow2.f32 %v3991_v19 }
0x1224   : > { %10333 = vpow2.f32 %v3993_v20 }
0x1225   : > { %10335 = vpow2.f32 %v3995_v21 }
0x1226   : > { %10337 = vpow2.f32 %v3997_v22 }
0x122d   : > { %v10332_v23 = vpop.eup %10331 }
0x122e   : > { %v10334_v24 = vpop.eup %10333 }
0x122f   : > { %v3999_v25 = vadd.f32 %v10334_v24, %v10332_v23  ;;  %v10336_v26 = vpop.eup %10335 }
0x1230   : > { %v10338_v28 = vpop.eup %10337 }
0x1231   : > { %v4000_v27 = vadd.f32 %v10336_v26, %v3999_v25 }
0x1233   : > { %v4001_v29 = vadd.f32 %v10338_v28, %v4000_v27 }
0x1235   : > { %v4002_v30 = vrot.slane %v4001_v29, 4 }
0x1237   : > { %v4003_v31 = vadd.f32 %v4002_v30, %v4001_v29 }
0x1239   : > { %v4004_v33 = vrot.slane %v4003_v31, 2 }
0x123b   : > { %v4005_v34 = vadd.f32 %v4004_v33, %v4003_v31 }
0x123d   : > { %v4006_v35 = vrot.slane %v4005_v34, 1 }
0x123f   : > { %v4007_v36 = vadd.f32 %v4006_v35, %v4005_v34  ;;  %v4122_v35 = vld [vmem:[%s12540_s13 + $0x20] sm:$0xff] }
0x1241   : > { %10339 = vrcp.f32 %v4007_v36 }
0x124b   : > { %v10340_v37 = vpop.eup %10339 }
0x124c   : > { %v4009_v38 = vmul.f32 %v10340_v37, %v10332_v23  ;;  %v4010_v39 = vmul.f32 %v10340_v37, %v10334_v24  ;;  %v4011_v41 = vmul.f32 %v10340_v37, %v10336_v26  ;;  %v4012_v42 = vmul.f32 %v10340_v37, %v10338_v28  ;;  %v4120_v24 = vld [vmem:[%s12540_s13 + $0x10] sm:$0xff]  ;;  %v4121_v26 = vld [vmem:[%s12540_s13 + $0x18] sm:$0xff]  ;;  %v4123_v37 = vld [vmem:[%s12540_s13 + $0x28] sm:$0xff] }
0x124e   : > { %v4015_v40 = vpack.c.bf16 %v4010_v39, %v4009_v38  ;;  %v4016_v43 = vpack.c.bf16 %v4012_v42, %v4011_v41 }
0x1250   : > { %9640 = vmatpush3.bf16.msra.mxu1 %v4015_v40 }
0x1251   : > { %9641 = vmatprep.subr.bf16.mxu1 %v10359_v5 }
0x1254   : > { %9642 = vmatpush3.bf16.msra.mxu1 %v4016_v43 }
0x1255   : > { %9749 = vmatprep.subr.bf16.mxu1 %v10359_v5 }
0x1257   : > { %9644 = vmatmul.mubr.msk.bf16.vlgmr.msra.gmra.mrb[60].mxu1 %vm4022_vm12, %v10065_v44 }
0x1258   : > { %9753 = vmatprep.mubr.msk.bf16.mxu1 %vm10360_vm5, %v10359_v5 }
0x132a   : > { %v4060_v45 = vpop.f32.mrb[60].mxu1 }
0x132b   : > { %v9645_v46 = vpop.f32.mrb[61].mxu1 }
0x132c   : > { %v4063_v47 = vpop.f32.mrb[62].mxu1 }
0x132d   : > { %v4117_v48 = vpack.c.bf16 %v4063_v47, %v4060_v45  ;;  %v9646_v50 = vpop.f32.mrb[63].mxu1  ;;  %v4124_v45 = vld [vmem:[%s12540_s13 + $0x30] sm:$0xff]  ;;  %v4125_v47 = vld [vmem:[%s12540_s13 + $0x38] sm:$0xff] }
0x132f   : > { %9648 = vmatpush3.bf16.msra.mxu0 %v4117_v48 }
0x1332   : > { %9650 = vmatmul.mubr.msk.bf16.vlgmr.msra.gmra.mrb[92].mxu0 %vm2829_vm9, %v10066_v51 }
0x1333   : > { %9653 = vmatprep.mubr.msk.bf16.mxu0 %vm10360_vm5, %v10359_v5 }
0x133a   : > { %9654 = vmatmul.mubr.msk.bf16.gmra.mrb[96].mxu0 %vm2829_vm9, %v10067_v53 }
0x133b   : > { %9657 = vmatprep.mubr.msk.bf16.mxu0 %vm10360_vm5, %v10359_v5 }
0x1342   : > { %9658 = vmatmul.mubr.msk.bf16.gmra.mrb[100].mxu0 %vm2829_vm9, %v10068_v55 }
0x1343   : > { %9661 = vmatprep.mubr.msk.bf16.mxu0 %vm10360_vm5, %v10359_v5 }
0x134a   : > { %9662 = vmatmul.mubr.msk.bf16.gmra.mrb[104].mxu0 %vm2829_vm9, %v10069_v56 }
0x134b   : > { %9665 = vmatprep.mubr.msk.bf16.mxu0 %vm10360_vm5, %v10359_v5 }
0x1352   : > { %9666 = vmatmul.mubr.msk.bf16.gmra.mrb[108].mxu0 %vm2829_vm9, %v10070_v57 }
0x1353   : > { %9669 = vmatprep.mubr.msk.bf16.mxu0 %vm10360_vm5, %v10359_v5 }
0x135a   : > { %9670 = vmatmul.mubr.msk.bf16.gmra.mrb[112].mxu0 %vm2829_vm9, %v10071_v58  ;;  %v4126_v58 = vld [vmem:[%s12540_s13 + $0x40] sm:$0xff] }
0x135b   : > { %9673 = vmatprep.mubr.msk.bf16.mxu0 %vm10360_vm5, %v10359_v5 }
0x1362   : > { %9674 = vmatmul.mubr.msk.bf16.gmra.mrb[116].mxu0 %vm2829_vm9, %v10072_v59 }
0x1363   : > { %9677 = vmatprep.mubr.msk.bf16.mxu0 %vm10360_vm5, %v10359_v5 }
0x136a   : > { %9678 = vmatmul.mubr.msk.bf16.gmra.mrb[120].mxu0 %vm2829_vm9, %v10073_v60  ;;  %v4127_v60 = vld [vmem:[%s12540_s13 + $0x48] sm:$0xff] }
0x136b   : > { %9681 = vmatprep.mubr.msk.bf16.mxu0 %vm10360_vm5, %v10359_v5 }
0x1372   : > { %9682 = vmatmul.mubr.msk.bf16.gmra.mrb[124].mxu0 %vm2829_vm9, %v10074_v52 }
0x1373   : > { %9685 = vmatprep.mubr.msk.bf16.mxu0 %vm10360_vm5, %v10359_v5 }
0x137a   : > { %9686 = vmatmul.mubr.msk.bf16.gmra.mrb[128].mxu0 %vm2829_vm9, %v10075_v61 }
0x137b   : > { %9689 = vmatprep.mubr.msk.bf16.mxu0 %vm10360_vm5, %v10359_v5 }
0x1382   : > { %9690 = vmatmul.mubr.msk.bf16.gmra.mrb[132].mxu0 %vm2829_vm9, %v10076_v62 }
0x1383   : > { %9693 = vmatprep.mubr.msk.bf16.mxu0 %vm10360_vm5, %v10359_v5 }
0x138a   : > { %9694 = vmatmul.mubr.msk.bf16.gmra.mrb[136].mxu0 %vm2829_vm9, %v10077_v63 }
0x138b   : > { %9697 = vmatprep.mubr.msk.bf16.mxu0 %vm10360_vm5, %v10359_v5 }
0x1392   : > { %9698 = vmatmul.mubr.msk.bf16.gmra.mrb[140].mxu0 %vm2829_vm9, %v10078_v0 }
0x1393   : > { %9701 = vmatprep.mubr.msk.bf16.mxu0 %vm10360_vm5, %v10359_v5 }
0x139a   : > { %9702 = vmatmul.mubr.msk.bf16.gmra.mrb[144].mxu0 %vm2829_vm9, %v10079_v1 }
0x139b   : > { %9705 = vmatprep.mubr.msk.bf16.mxu0 %vm10360_vm5, %v10359_v5 }
0x13a2   : > { %9706 = vmatmul.mubr.msk.bf16.gmra.mrb[148].mxu0 %vm2829_vm9, %v10080_v2 }
0x13a3   : > { %9709 = vmatprep.mubr.msk.bf16.mxu0 %vm10360_vm5, %v10359_v5 }
0x13aa   : > { %9710 = vmatmul.mubr.msk.bf16.gmra.mrb[152].mxu0 %vm2829_vm9, %v10081_v49  ;;  %v4128_v49 = vld [vmem:[%s12540_s13 + $0x50] sm:$0xff] }
0x13ab   : > { %9713 = vmatprep.mubr.msk.bf16.mxu0 %vm10360_vm5, %v10359_v5 }
0x13b2   : > { %9714 = vmatmul.mubr.msk.bf16.gmra.mrb[156].mxu0 %vm2829_vm9, %v10082_v3 }
0x13b3   : > { %9717 = vmatprep.mubr.msk.bf16.mxu0 %vm10360_vm5, %v10359_v5 }
0x13ba   : > { %9718 = vmatmul.mubr.msk.bf16.gmra.mrb[160].mxu0 %vm2829_vm9, %v10083_v6  ;;  %v4129_v6 = vld [vmem:[%s12540_s13 + $0x58] sm:$0xff] }
0x13bb   : > { %9721 = vmatprep.mubr.msk.bf16.mxu0 %vm10360_vm5, %v10359_v5 }
0x13c2   : > { %9722 = vmatmul.mubr.msk.bf16.gmra.mrb[164].mxu0 %vm2829_vm9, %v10084_v8 }
0x13c3   : > { %9725 = vmatprep.mubr.msk.bf16.mxu0 %vm10360_vm5, %v10359_v5 }
0x13ca   : > { %9726 = vmatmul.mubr.msk.bf16.gmra.mrb[168].mxu0 %vm2829_vm9, %v10085_v9 }
0x13cb   : > { %9729 = vmatprep.mubr.msk.bf16.mxu0 %vm10360_vm5, %v10359_v5 }
0x13d2   : > { %9730 = vmatmul.mubr.msk.bf16.gmra.mrb[172].mxu0 %vm2829_vm9, %v10086_v10 }
0x13d3   : > { %9733 = vmatprep.mubr.msk.bf16.mxu0 %vm10360_vm5, %v10359_v5 }
0x13da   : > { %9734 = vmatmul.mubr.msk.bf16.gmra.mrb[176].mxu0 %vm2829_vm9, %v10087_v11 }
0x13db   : > { %9737 = vmatprep.mubr.msk.bf16.mxu0 %vm10360_vm5, %v10359_v5 }
0x13e2   : > { %9738 = vmatmul.mubr.msk.bf16.gmra.mrb[180].mxu0 %vm2829_vm9, %v10088_v54 }
0x13e3   : > { %9741 = vmatprep.mubr.msk.bf16.mxu0 %vm10360_vm5, %v10359_v5 }
0x13ea   : > { %9742 = vmatmul.mubr.msk.bf16.gmra.mrb[184].mxu0 %vm2829_vm9, %v10089_v12 }
0x13eb   : > { %9745 = vmatprep.mubr.msk.bf16.mxu0 %vm10360_vm5, %v10359_v5 }
0x13f2   : > { %9746 = vmatmul.mubr.msk.bf16.gmra.mrb[188].mxu0 %vm2829_vm9, %v10090_v13 }
0x13f3   : > { %6440 = vmatprep.mubr.bf16.mxu0 %v10358_v4 }
0x1405   : > { %v4402_v15 = vpop.f32.mrb[92].mxu0 }
0x1406   : > { %v4403_v17 = vadd.f32 %v4402_v15, %v4118_v14  ;;  %v9651_v18 = vpop.f32.mrb[93].mxu0  ;;  %v4130_v14 = vld [vmem:[%s12540_s13 + $0x60] sm:$0xff] }
0x1407   : > { %v4405_v19 = vpop.f32.mrb[94].mxu0 }
0x1408   : > { %v4601_v20 = vmax.f32 %v4403_v17, 0.0  ;;  %v4406_v21 = vadd.f32 %v4405_v19, %v4119_v16  ;;  %v9652_v22 = vpop.f32.mrb[95].mxu0  ;;  %v4131_v16 = vld [vmem:[%s12540_s13 + $0x68] sm:$0xff] }
0x140a   : > { %v4602_v23 = vmax.f32 %v4406_v21, 0.0  ;;  %4656 = vperm.xlu0 %9887, %v4601_v20  }
0x140c   : > { %4661 = vperm.xlu1 %9888, %v4602_v23  }
0x140d   : > { %v4410_v25 = vpop.f32.mrb[96].mxu0 }
0x140e   : > { %v4411_v27 = vadd.f32 %v4410_v25, %v4120_v24  ;;  %v9655_v28 = vpop.f32.mrb[97].mxu0  ;;  %v4132_v24 = vld [vmem:[%s12540_s13 + $0x70] sm:$0xff] }
0x140f   : > { %v4413_v29 = vpop.f32.mrb[98].mxu0 }
0x1410   : > { %v4603_v30 = vmax.f32 %v4411_v27, 0.0  ;;  %v4414_v31 = vadd.f32 %v4413_v29, %v4121_v26  ;;  %v9656_v33 = vpop.f32.mrb[99].mxu0  ;;  %v4133_v26 = vld [vmem:[%s12540_s13 + $0x78] sm:$0xff] }
0x1412   : > { %v4604_v34 = vmax.f32 %v4414_v31, 0.0  ;;  %4671 = vperm.xlu1 %9888, %v4603_v30  }
0x1414   : > { %4676 = vperm.xlu0 %9887, %v4604_v34  }
0x1415   : > { %v4418_v36 = vpop.f32.mrb[100].mxu0 }
0x1416   : > { %v4419_v38 = vadd.f32 %v4418_v36, %v4122_v35  ;;  %v9659_v39 = vpop.f32.mrb[101].mxu0  ;;  %v4134_v35 = vld [vmem:[%s12540_s13 + $0x80] sm:$0xff] }
0x1417   : > { %v4421_v40 = vpop.f32.mrb[102].mxu0 }
0x1418   : > { %v4605_v41 = vmax.f32 %v4419_v38, 0.0  ;;  %v4422_v42 = vadd.f32 %v4421_v40, %v4123_v37  ;;  %v9660_v43 = vpop.f32.mrb[103].mxu0  ;;  %v4135_v37 = vld [vmem:[%s12540_s13 + $0x88] sm:$0xff] }
0x141a   : > { %v4606_v44 = vmax.f32 %v4422_v42, 0.0  ;;  %4686 = vperm.xlu1 %9888, %v4605_v41  }
0x141c   : > { %4691 = vperm.xlu0 %9887, %v4606_v44  }
0x141d   : > { %v4426_v46 = vpop.f32.mrb[104].mxu0 }
0x141e   : > { %v4427_v48 = vadd.f32 %v4426_v46, %v4124_v45  ;;  %v9663_v50 = vpop.f32.mrb[105].mxu0  ;;  %v4136_v45 = vld [vmem:[%s12540_s13 + $0x90] sm:$0xff] }
0x141f   : > { %v4429_v51 = vpop.f32.mrb[106].mxu0 }
0x1420   : > { %v4607_v53 = vmax.f32 %v4427_v48, 0.0  ;;  %v4430_v55 = vadd.f32 %v4429_v51, %v4125_v47  ;;  %v9664_v56 = vpop.f32.mrb[107].mxu0  ;;  %v4137_v47 = vld [vmem:[%s12540_s13 + $0x98] sm:$0xff] }
0x1422   : > { %v4608_v57 = vmax.f32 %v4430_v55, 0.0  ;;  %4701 = vperm.xlu1 %9888, %v4607_v53  }
0x1424   : > { %4706 = vperm.xlu0 %9887, %v4608_v57  }
0x1425   : > { %v4434_v59 = vpop.f32.mrb[108].mxu0 }
0x1426   : > { %v4435_v52 = vadd.f32 %v4434_v59, %v4126_v58  ;;  %v9667_v61 = vpop.f32.mrb[109].mxu0  ;;  %v4138_v58 = vld [vmem:[%s12540_s13 + $0xa0] sm:$0xff] }
0x1427   : > { %v4437_v62 = vpop.f32.mrb[110].mxu0 }
0x1428   : > { %v4609_v63 = vmax.f32 %v4435_v52, 0.0  ;;  %v4438_v0 = vadd.f32 %v4437_v62, %v4127_v60  ;;  %v9668_v1 = vpop.f32.mrb[111].mxu0  ;;  %v4139_v60 = vld [vmem:[%s12540_s13 + $0xa8] sm:$0xff] }
0x142a   : > { %v4610_v2 = vmax.f32 %v4438_v0, 0.0  ;;  %4716 = vperm.xlu1 %9888, %v4609_v63  }
0x142c   : > { %4721 = vperm.xlu0 %9887, %v4610_v2  }
0x142d   : > { %v4442_v3 = vpop.f32.mrb[112].mxu0 }
0x142e   : > { %v4443_v8 = vadd.f32 %v4442_v3, %v4128_v49  ;;  %v9671_v9 = vpop.f32.mrb[113].mxu0  ;;  %v4140_v49 = vld [vmem:[%s12540_s13 + $0xb0] sm:$0xff] }
0x142f   : > { %v4445_v10 = vpop.f32.mrb[114].mxu0 }
0x1430   : > { %v4611_v11 = vmax.f32 %v4443_v8, 0.0  ;;  %v4446_v54 = vadd.f32 %v4445_v10, %v4129_v6  ;;  %v9672_v12 = vpop.f32.mrb[115].mxu0  ;;  %v4141_v6 = vld [vmem:[%s12540_s13 + $0xb8] sm:$0xff] }
0x1432   : > { %v4612_v13 = vmax.f32 %v4446_v54, 0.0  ;;  %4731 = vperm.xlu1 %9888, %v4611_v11  }
0x1434   : > { %4736 = vperm.xlu0 %9887, %v4612_v13  }
0x1435   : > { %v4450_v15 = vpop.f32.mrb[116].mxu0 }
0x1436   : > { %v4451_v17 = vadd.f32 %v4450_v15, %v4130_v14  ;;  %v9675_v18 = vpop.f32.mrb[117].mxu0  ;;  %v4142_v14 = vld [vmem:[%s12540_s13 + $0xc0] sm:$0xff] }
0x1437   : > { %v4453_v19 = vpop.f32.mrb[118].mxu0 }
0x1438   : > { %v4613_v20 = vmax.f32 %v4451_v17, 0.0  ;;  %v4454_v21 = vadd.f32 %v4453_v19, %v4131_v16  ;;  %v9676_v22 = vpop.f32.mrb[119].mxu0  ;;  %v4143_v16 = vld [vmem:[%s12540_s13 + $0xc8] sm:$0xff] }
0x143a   : > { %v4614_v23 = vmax.f32 %v4454_v21, 0.0  ;;  %4746 = vperm.xlu1 %9888, %v4613_v20  }
0x143c   : > { %4751 = vperm.xlu0 %9887, %v4614_v23  }
0x143d   : > { %v4458_v25 = vpop.f32.mrb[120].mxu0 }
0x143e   : > { %v4459_v27 = vadd.f32 %v4458_v25, %v4132_v24  ;;  %v9679_v28 = vpop.f32.mrb[121].mxu0  ;;  %v4144_v24 = vld [vmem:[%s12540_s13 + $0xd0] sm:$0xff] }
0x143f   : > { %v4461_v29 = vpop.f32.mrb[122].mxu0 }
0x1440   : > { %v4615_v30 = vmax.f32 %v4459_v27, 0.0  ;;  %v4462_v31 = vadd.f32 %v4461_v29, %v4133_v26  ;;  %v9680_v33 = vpop.f32.mrb[123].mxu0  ;;  %v4145_v26 = vld [vmem:[%s12540_s13 + $0xd8] sm:$0xff] }
0x1442   : > { %v4616_v34 = vmax.f32 %v4462_v31, 0.0  ;;  %4761 = vperm.xlu1 %9888, %v4615_v30  }
0x1444   : > { %4766 = vperm.xlu0 %9887, %v4616_v34  }
0x1445   : > { %v4466_v36 = vpop.f32.mrb[124].mxu0 }
0x1446   : > { %v4467_v38 = vadd.f32 %v4466_v36, %v4134_v35  ;;  %v9683_v39 = vpop.f32.mrb[125].mxu0  ;;  %v4146_v35 = vld [vmem:[%s12540_s13 + $0xe0] sm:$0xff] }
0x1447   : > { %v4469_v40 = vpop.f32.mrb[126].mxu0 }
0x1448   : > { %v4617_v41 = vmax.f32 %v4467_v38, 0.0  ;;  %v4470_v42 = vadd.f32 %v4469_v40, %v4135_v37  ;;  %v9684_v43 = vpop.f32.mrb[127].mxu0  ;;  %v4147_v37 = vld [vmem:[%s12540_s13 + $0xe8] sm:$0xff] }
0x144a   : > { %v4618_v44 = vmax.f32 %v4470_v42, 0.0  ;;  %4776 = vperm.xlu1 %9888, %v4617_v41  }
0x144c   : > { %4781 = vperm.xlu0 %9887, %v4618_v44  }
0x144d   : > { %v4474_v46 = vpop.f32.mrb[128].mxu0 }
0x144e   : > { %v4475_v48 = vadd.f32 %v4474_v46, %v4136_v45  ;;  %v9687_v50 = vpop.f32.mrb[129].mxu0  ;;  %v4148_v45 = vld [vmem:[%s12540_s13 + $0xf0] sm:$0xff] }
0x144f   : > { %v4477_v51 = vpop.f32.mrb[130].mxu0 }
0x1450   : > { %v4619_v53 = vmax.f32 %v4475_v48, 0.0  ;;  %v4478_v55 = vadd.f32 %v4477_v51, %v4137_v47  ;;  %v9688_v56 = vpop.f32.mrb[131].mxu0  ;;  %v4149_v47 = vld [vmem:[%s12540_s13 + $0xf8] sm:$0xff] }
0x1452   : > { %v4620_v57 = vmax.f32 %v4478_v55, 0.0  ;;  %4791 = vperm.xlu1 %9888, %v4619_v53  }
0x1454   : > { %4796 = vperm.xlu0 %9887, %v4620_v57  }
0x1455   : > { %v4482_v59 = vpop.f32.mrb[132].mxu0 }
0x1456   : > { %v4483_v52 = vadd.f32 %v4482_v59, %v4138_v58  ;;  %v9691_v61 = vpop.f32.mrb[133].mxu0  ;;  %v4150_v58 = vld [vmem:[%s12540_s13 + $0x100] sm:$0xff] }
0x1457   : > { %v4485_v62 = vpop.f32.mrb[134].mxu0 }
0x1458   : > { %v4621_v63 = vmax.f32 %v4483_v52, 0.0  ;;  %v4486_v0 = vadd.f32 %v4485_v62, %v4139_v60  ;;  %v9692_v1 = vpop.f32.mrb[135].mxu0  ;;  %v4151_v60 = vld [vmem:[%s12540_s13 + $0x108] sm:$0xff] }
0x145a   : > { %v4622_v2 = vmax.f32 %v4486_v0, 0.0  ;;  %4806 = vperm.xlu1 %9888, %v4621_v63  }
0x145c   : > { %4811 = vperm.xlu0 %9887, %v4622_v2  }
0x145d   : > { %v4490_v3 = vpop.f32.mrb[136].mxu0 }
0x145e   : > { %v4491_v8 = vadd.f32 %v4490_v3, %v4140_v49  ;;  %v9695_v9 = vpop.f32.mrb[137].mxu0  ;;  %v4152_v49 = vld [vmem:[%s12540_s13 + $0x110] sm:$0xff] }
0x145f   : > { %v4493_v10 = vpop.f32.mrb[138].mxu0 }
0x1460   : > { %v4623_v11 = vmax.f32 %v4491_v8, 0.0  ;;  %v4494_v54 = vadd.f32 %v4493_v10, %v4141_v6  ;;  %v9696_v12 = vpop.f32.mrb[139].mxu0  ;;  %v4153_v6 = vld [vmem:[%s12540_s13 + $0x118] sm:$0xff] }
0x1462   : > { %v4624_v13 = vmax.f32 %v4494_v54, 0.0  ;;  %4821 = vperm.xlu1 %9888, %v4623_v11  }
0x1464   : > { %4826 = vperm.xlu0 %9887, %v4624_v13  }
0x1465   : > { %v4498_v15 = vpop.f32.mrb[140].mxu0 }
0x1466   : > { %v4499_v17 = vadd.f32 %v4498_v15, %v4142_v14  ;;  %v9699_v18 = vpop.f32.mrb[141].mxu0  ;;  %v4154_v14 = vld [vmem:[%s12540_s13 + $0x120] sm:$0xff] }
0x1467   : > { %v4501_v19 = vpop.f32.mrb[142].mxu0 }
0x1468   : > { %v4625_v20 = vmax.f32 %v4499_v17, 0.0  ;;  %v4502_v21 = vadd.f32 %v4501_v19, %v4143_v16  ;;  %v9700_v22 = vpop.f32.mrb[143].mxu0  ;;  %v4155_v16 = vld [vmem:[%s12540_s13 + $0x128] sm:$0xff] }
0x146a   : > { %v4626_v23 = vmax.f32 %v4502_v21, 0.0  ;;  %4836 = vperm.xlu1 %9888, %v4625_v20  }
0x146c   : > { %4841 = vperm.xlu0 %9887, %v4626_v23  }
0x146d   : > { %v4506_v25 = vpop.f32.mrb[144].mxu0 }
0x146e   : > { %v4507_v27 = vadd.f32 %v4506_v25, %v4144_v24  ;;  %v9703_v28 = vpop.f32.mrb[145].mxu0  ;;  %v4156_v24 = vld [vmem:[%s12540_s13 + $0x130] sm:$0xff] }
0x146f   : > { %v4509_v29 = vpop.f32.mrb[146].mxu0 }
0x1470   : > { %v4627_v30 = vmax.f32 %v4507_v27, 0.0  ;;  %v4510_v31 = vadd.f32 %v4509_v29, %v4145_v26  ;;  %v9704_v33 = vpop.f32.mrb[147].mxu0  ;;  %v4157_v26 = vld [vmem:[%s12540_s13 + $0x138] sm:$0xff] }
0x1472   : > { %v4628_v34 = vmax.f32 %v4510_v31, 0.0  ;;  %4851 = vperm.xlu1 %9888, %v4627_v30  }
0x1474   : > { %4856 = vperm.xlu0 %9887, %v4628_v34  }
0x1475   : > { %v4514_v36 = vpop.f32.mrb[148].mxu0 }
0x1476   : > { %v4515_v38 = vadd.f32 %v4514_v36, %v4146_v35  ;;  %v9707_v39 = vpop.f32.mrb[149].mxu0  ;;  %v4158_v35 = vld [vmem:[%s12540_s13 + $0x140] sm:$0xff] }
0x1477   : > { %v4517_v40 = vpop.f32.mrb[150].mxu0 }
0x1478   : > { %v4629_v41 = vmax.f32 %v4515_v38, 0.0  ;;  %v4518_v42 = vadd.f32 %v4517_v40, %v4147_v37  ;;  %v9708_v43 = vpop.f32.mrb[151].mxu0  ;;  %v4159_v37 = vld [vmem:[%s12540_s13 + $0x148] sm:$0xff] }
0x147a   : > { %v4630_v44 = vmax.f32 %v4518_v42, 0.0  ;;  %4866 = vperm.xlu1 %9888, %v4629_v41  }
0x147c   : > { %4871 = vperm.xlu0 %9887, %v4630_v44  }
0x147d   : > { %v4522_v46 = vpop.f32.mrb[152].mxu0 }
0x147e   : > { %v4523_v48 = vadd.f32 %v4522_v46, %v4148_v45  ;;  %v9711_v50 = vpop.f32.mrb[153].mxu0  ;;  %v4160_v45 = vld [vmem:[%s12540_s13 + $0x150] sm:$0xff] }
0x147f   : > { %v4525_v51 = vpop.f32.mrb[154].mxu0 }
0x1480   : > { %v4631_v53 = vmax.f32 %v4523_v48, 0.0  ;;  %v4526_v55 = vadd.f32 %v4525_v51, %v4149_v47  ;;  %v9712_v56 = vpop.f32.mrb[155].mxu0  ;;  %v4161_v47 = vld [vmem:[%s12540_s13 + $0x158] sm:$0xff] }
0x1482   : > { %v4632_v57 = vmax.f32 %v4526_v55, 0.0  ;;  %4881 = vperm.xlu1 %9888, %v4631_v53  }
0x1484   : > { %4886 = vperm.xlu0 %9887, %v4632_v57  }
0x1485   : > { %v4530_v59 = vpop.f32.mrb[156].mxu0 }
0x1486   : > { %v4531_v52 = vadd.f32 %v4530_v59, %v4150_v58  ;;  %v9715_v61 = vpop.f32.mrb[157].mxu0  ;;  %v4162_v58 = vld [vmem:[%s12540_s13 + $0x160] sm:$0xff] }
0x1487   : > { %v4533_v62 = vpop.f32.mrb[158].mxu0 }
0x1488   : > { %v4633_v63 = vmax.f32 %v4531_v52, 0.0  ;;  %v4534_v0 = vadd.f32 %v4533_v62, %v4151_v60  ;;  %v9716_v1 = vpop.f32.mrb[159].mxu0  ;;  %v4163_v60 = vld [vmem:[%s12540_s13 + $0x168] sm:$0xff] }
0x148a   : > { %v4634_v2 = vmax.f32 %v4534_v0, 0.0  ;;  %4896 = vperm.xlu1 %9888, %v4633_v63  }
0x148c   : > { %4901 = vperm.xlu0 %9887, %v4634_v2  }
0x148d   : > { %v4538_v3 = vpop.f32.mrb[160].mxu0 }
0x148e   : > { %v4539_v8 = vadd.f32 %v4538_v3, %v4152_v49  ;;  %v9719_v9 = vpop.f32.mrb[161].mxu0  ;;  %v4164_v49 = vld [vmem:[%s12540_s13 + $0x170] sm:$0xff] }
0x148f   : > { %v4541_v10 = vpop.f32.mrb[162].mxu0 }
0x1490   : > { %v4635_v11 = vmax.f32 %v4539_v8, 0.0  ;;  %v4542_v54 = vadd.f32 %v4541_v10, %v4153_v6  ;;  %v9720_v12 = vpop.f32.mrb[163].mxu0  ;;  %v4165_v6 = vld [vmem:[%s12540_s13 + $0x178] sm:$0xff] }
0x1492   : > { %v4636_v13 = vmax.f32 %v4542_v54, 0.0  ;;  %4911 = vperm.xlu1 %9888, %v4635_v11  }
0x1494   : > { %4916 = vperm.xlu0 %9887, %v4636_v13  }
0x1495   : > { %v4546_v15 = vpop.f32.mrb[164].mxu0 }
0x1496   : > { %v4547_v17 = vadd.f32 %v4546_v15, %v4154_v14  ;;  %v9723_v18 = vpop.f32.mrb[165].mxu0  ;;  %v4166_v14 = vld [vmem:[%s12540_s13 + $0x180] sm:$0xff] }
0x1497   : > { %v4549_v19 = vpop.f32.mrb[166].mxu0 }
0x1498   : > { %v4637_v20 = vmax.f32 %v4547_v17, 0.0  ;;  %v4550_v21 = vadd.f32 %v4549_v19, %v4155_v16  ;;  %v9724_v22 = vpop.f32.mrb[167].mxu0  ;;  %v4167_v16 = vld [vmem:[%s12540_s13 + $0x188] sm:$0xff] }
0x149a   : > { %v4638_v23 = vmax.f32 %v4550_v21, 0.0  ;;  %4926 = vperm.xlu1 %9888, %v4637_v20  }
0x149c   : > { %4931 = vperm.xlu0 %9887, %v4638_v23  }
0x149d   : > { %v4554_v25 = vpop.f32.mrb[168].mxu0 }
0x149e   : > { %v4555_v27 = vadd.f32 %v4554_v25, %v4156_v24  ;;  %v9727_v28 = vpop.f32.mrb[169].mxu0  ;;  %v10091_v24 = vld [vmem:[%s12541_s14] sm:$0xff]  }
0x149f   : > { %v4557_v29 = vpop.f32.mrb[170].mxu0  ;;  %v6061_v25 = vld [vmem:[%s12543_s16] sm:$0xff]  ;;  %9750 = vmatpush3.bf16.msra.mxu1 %v10091_v24 }
0x14a0   : > { %v4639_v30 = vmax.f32 %v4555_v27, 0.0  ;;  %v4558_v31 = vadd.f32 %v4557_v29, %v4157_v26  ;;  %v9728_v33 = vpop.f32.mrb[171].mxu0  ;;  %v10092_v26 = vld [vmem:[%s12541_s14 + $0x8] sm:$0x1f]   ;;  %9751 = vmatprep.subr.bf16.mxu1 %v10359_v5  ;;  %v7353_v29 = vld [vmem:[%s12546_s19] sm:$0xff] }
0x14a1   : > { %v6062_v27 = vld [vmem:[%s12543_s16 + $0x8] sm:$0xff]  ;;  %v5048_v28 = vand.u32 %v10092_v26, %v10514_v7  ;;  %v4662_v33 = vpop.permute.xlu1 %4661 }
0x14a2   : > { %v4640_v34 = vmax.f32 %v4558_v31, 0.0  ;;  %4941 = vperm.xlu1 %9888, %v4639_v30   ;;  %v9253_v30 = vld [vmem:[#allocation2] ss:$0 sm:$0xff]  ;;  %v4657_v31 = vpop.permute.xlu0 %4656 }
0x14a3   : > { %9752 = vmatpush3.bf16.msra.mxu1 %v5048_v28 }
0x14a4   : > { %4946 = vperm.xlu0 %9887, %v4640_v34   ;;  %9757 = vmatprep.subr.bf16.mxu1 %v10359_v5 }
0x14a5   : > { %v4562_v36 = vpop.f32.mrb[172].mxu0  ;;  %v4672_v34 = vpop.permute.xlu1 %4671 }
0x14a6   : > { %v4563_v38 = vadd.f32 %v4562_v36, %v4158_v35  ;;  %v9731_v39 = vpop.f32.mrb[173].mxu0  ;;  %v4677_v35 = vpop.permute.xlu0 %4676 }
0x14a7   : > { %v4565_v40 = vpop.f32.mrb[174].mxu0 }
0x14a8   : > { %v4641_v41 = vmax.f32 %v4563_v38, 0.0  ;;  %v4566_v42 = vadd.f32 %v4565_v40, %v4159_v37  ;;  %v9732_v43 = vpop.f32.mrb[175].mxu0 }
0x14a9   : > { %v4687_v36 = vpop.permute.xlu1 %4686 }
0x14aa   : > { %v4642_v44 = vmax.f32 %v4566_v42, 0.0  ;;  %4956 = vperm.xlu1 %9888, %v4641_v41   ;;  %v4692_v37 = vpop.permute.xlu0 %4691 }
0x14ac   : > { %4961 = vperm.xlu0 %9887, %v4642_v44  }
0x14ad   : > { %v4570_v46 = vpop.f32.mrb[176].mxu0  ;;  %v4702_v38 = vpop.permute.xlu1 %4701 }
0x14ae   : > { %v4571_v48 = vadd.f32 %v4570_v46, %v4160_v45  ;;  %v9735_v50 = vpop.f32.mrb[177].mxu0  ;;  %v4707_v39 = vpop.permute.xlu0 %4706 }
0x14af   : > { %v4573_v51 = vpop.f32.mrb[178].mxu0 }
0x14b0   : > { %v4643_v53 = vmax.f32 %v4571_v48, 0.0  ;;  %v4574_v55 = vadd.f32 %v4573_v51, %v4161_v47  ;;  %v9736_v56 = vpop.f32.mrb[179].mxu0 }
0x14b1   : > { %v4717_v40 = vpop.permute.xlu1 %4716 }
0x14b2   : > { %v4644_v57 = vmax.f32 %v4574_v55, 0.0  ;;  %4971 = vperm.xlu1 %9888, %v4643_v53   ;;  %v4722_v41 = vpop.permute.xlu0 %4721 }
0x14b4   : > { %4976 = vperm.xlu0 %9887, %v4644_v57   ;;  %v4651_v57 = vlaneseq }
0x14b5   : > { %v4578_v59 = vpop.f32.mrb[180].mxu0  ;;  %v4732_v42 = vpop.permute.xlu1 %4731 }
0x14b6   : > { %v4579_v52 = vadd.f32 %v4578_v59, %v4162_v58  ;;  %v9739_v61 = vpop.f32.mrb[181].mxu0  ;;  %v4737_v43 = vpop.permute.xlu0 %4736 }
0x14b7   : > { %v4581_v62 = vpop.f32.mrb[182].mxu0 }
0x14b8   : > { %v4645_v63 = vmax.f32 %v4579_v52, 0.0  ;;  %v4582_v0 = vadd.f32 %v4581_v62, %v4163_v60  ;;  %v9740_v1 = vpop.f32.mrb[183].mxu0  ;;  %v11740_v60 = vand.u32 127, %v4651_v57 }
0x14b9   : > { %v4747_v44 = vpop.permute.xlu1 %4746 }
0x14ba   : > { %v4646_v2 = vmax.f32 %v4582_v0, 0.0  ;;  %4986 = vperm.xlu1 %9888, %v4645_v63   ;;  %vm4668_vm13 = vcmp.eq.s32.totalorder %v11740_v60, 1  ;;  %vm4653_vm14 = vcmp.eq.s32.totalorder %v11740_v60, 0  ;;  %vm4683_vm15 = vcmp.eq.s32.totalorder %v11740_v60, 2 }
0x14bb   : > { %v4752_v45 = vpop.permute.xlu0 %4751  ;;  %v4679_v62 = vsel %vm4668_vm13, %v4672_v34, 0.0  ;;  %v4680_v63 = vsel %vm4668_vm13, %v4677_v35, 0.0  ;;  %vm4698_vm1 = vcmp.eq.s32.totalorder %v11740_v60, 3  ;;  %vm4713_vm2 = vcmp.eq.s32.totalorder %v11740_v60, 4 }
0x14bc   : > { %4991 = vperm.xlu0 %9887, %v4646_v2   ;;  %v4664_v2 = vsel %vm4653_vm14, %v4657_v31, 0.0  ;;  %vm4728_vm7 = vcmp.eq.s32.totalorder %v11740_v60, 5  ;;  %vm4743_vm11 = vcmp.eq.s32.totalorder %v11740_v60, 6  ;;  %vm4758_vm12 = vcmp.eq.s32.totalorder %v11740_v60, 7 }
0x14bd   : > { %v4586_v3 = vpop.f32.mrb[184].mxu0  ;;  %v4755_v26 = vsel %vm4743_vm11, %v4752_v45, 0.0  ;;  %vm4773_vm13 = vcmp.eq.s32.totalorder %v11740_v60, 8 }
0x14be   : > { %v4587_v8 = vadd.f32 %v4586_v3, %v4164_v49  ;;  %v9743_v9 = vpop.f32.mrb[185].mxu0  ;;  %v4665_v49 = vsel %vm4653_vm14, %v4662_v33, 0.0  ;;  %v4694_v3 = vsel %vm4683_vm15, %v4687_v36, 0.0  ;;  %vm4788_vm14 = vcmp.eq.s32.totalorder %v11740_v60, 9 }
0x14bf   : > { %v4589_v10 = vpop.f32.mrb[186].mxu0  ;;  %v4682_v9 = vadd.f32 %v4680_v63, %v4665_v49 }
0x14c0   : > { %v4647_v11 = vmax.f32 %v4587_v8, 0.0  ;;  %v4590_v54 = vadd.f32 %v4589_v10, %v4165_v6  ;;  %v9744_v12 = vpop.f32.mrb[187].mxu0  ;;  %v4695_v6 = vsel %vm4683_vm15, %v4692_v37, 0.0  ;;  %v4681_v8 = vadd.f32 %v4679_v62, %v4664_v2 }
0x14c1   : > { %v4762_v46 = vpop.permute.xlu1 %4761  ;;  %v4709_v10 = vsel %vm4698_vm1, %v4702_v38, 0.0  ;;  %v4697_v12 = vadd.f32 %v4695_v6, %v4682_v9  ;;  %vm4803_vm15 = vcmp.eq.s32.totalorder %v11740_v60, 10 }
0x14c2   : > { %v4648_v13 = vmax.f32 %v4590_v54, 0.0  ;;  %5001 = vperm.xlu1 %9888, %v4647_v11   ;;  %v4710_v11 = vsel %vm4698_vm1, %v4707_v39, 0.0  ;;  %v4696_v54 = vadd.f32 %v4694_v3, %v4681_v8  ;;  %vm4818_vm1 = vcmp.eq.s32.totalorder %v11740_v60, 11 }
0x14c3   : > { %v4767_v47 = vpop.permute.xlu0 %4766 }
0x14c4   : > { %5006 = vperm.xlu0 %9887, %v4648_v13  }
0x14c5   : > { %v4594_v15 = vpop.f32.mrb[188].mxu0 }
0x14c6   : > { %v4595_v17 = vadd.f32 %v4594_v15, %v4166_v14  ;;  %v9747_v18 = vpop.f32.mrb[189].mxu0  ;;  %v4724_v15 = vsel %vm4713_vm2, %v4717_v40, 0.0 }
0x14c7   : > { %v4597_v19 = vpop.f32.mrb[190].mxu0  ;;  %v4712_v18 = vadd.f32 %v4710_v11, %v4697_v12 }
0x14c8   : > { %v4649_v20 = vmax.f32 %v4595_v17, 0.0  ;;  %v4598_v21 = vadd.f32 %v4597_v19, %v4167_v16  ;;  %v9748_v22 = vpop.f32.mrb[191].mxu0  ;;  %v4725_v16 = vsel %vm4713_vm2, %v4722_v41, 0.0  ;;  %v4711_v17 = vadd.f32 %v4709_v10, %v4696_v54 }
0x14c9   : > { %v4777_v48 = vpop.permute.xlu1 %4776  ;;  %v4739_v19 = vsel %vm4728_vm7, %v4732_v42, 0.0  ;;  %v4727_v22 = vadd.f32 %v4725_v16, %v4712_v18  ;;  %vm4833_vm2 = vcmp.eq.s32.totalorder %v11740_v60, 12 }
0x14ca   : > { %v4650_v23 = vmax.f32 %v4598_v21, 0.0  ;;  %5016 = vperm.xlu1 %9888, %v4649_v20   ;;  %v4740_v20 = vsel %vm4728_vm7, %v4737_v43, 0.0  ;;  %v4726_v21 = vadd.f32 %v4724_v15, %v4711_v17  ;;  %v4784_v36 = vsel %vm4773_vm13, %v4777_v48, 0.0 }
0x14cb   : > { %v4782_v50 = vpop.permute.xlu0 %4781  ;;  %v4742_v28 = vadd.f32 %v4740_v20, %v4727_v22  ;;  %vm4848_vm7 = vcmp.eq.s32.totalorder %v11740_v60, 13 }
0x14cc   : > { %5021 = vperm.xlu0 %9887, %v4650_v23   ;;  %v4785_v37 = vsel %vm4773_vm13, %v4782_v50, 0.0  ;;  %vm4893_vm13 = vcmp.eq.s32.totalorder %v11740_v60, 16 }
0x14cd   : > { %v4757_v33 = vadd.f32 %v4755_v26, %v4742_v28 }
0x14ce   : > { %6065 = vperm.xlu1 %9888, %v6061_v25   ;;  %v4754_v25 = vsel %vm4743_vm11, %v4747_v44, 0.0  ;;  %vm4863_vm11 = vcmp.eq.s32.totalorder %v11740_v60, 14 }
0x14d0   : > { %6070 = vperm.xlu0 %9887, %v6062_v27   ;;  %v4741_v27 = vadd.f32 %v4739_v19, %v4726_v21 }
0x14d1   : > { %v4792_v51 = vpop.permute.xlu1 %4791 }
0x14d2   : > { %7356 = vperm.xlu1 %9888, %v7353_v29   ;;  %v4769_v29 = vsel %vm4758_vm12, %v4762_v46, 0.0  ;;  %v4756_v31 = vadd.f32 %v4754_v25, %v4741_v27  ;;  %v4799_v40 = vsel %vm4788_vm14, %v4792_v51, 0.0 }
0x14d3   : > { %v4797_v53 = vpop.permute.xlu0 %4796 }
0x14d4   : > { %8184 = vperm.xlu0 %9887, %v9253_v30   ;;  %v4770_v30 = vsel %vm4758_vm12, %v4767_v47, 0.0  ;;  %v4771_v38 = vadd.f32 %v4769_v29, %v4756_v31  ;;  %v4800_v41 = vsel %vm4788_vm14, %v4797_v53, 0.0  ;;  %vm4878_vm12 = vcmp.eq.s32.totalorder %v11740_v60, 15 }
0x14d5   : > { %v4772_v39 = vadd.f32 %v4770_v30, %v4757_v33  ;;  %vm4908_vm14 = vcmp.eq.s32.totalorder %v11740_v60, 17 }
0x14d6   : > { %v4786_v42 = vadd.f32 %v4784_v36, %v4771_v38 }
0x14d7   : > { %v4787_v43 = vadd.f32 %v4785_v37, %v4772_v39 }
0x14d8   : > { %v4801_v57 = vadd.f32 %v4799_v40, %v4786_v42 }
0x14d9   : > { %v11732_v55 = vpop.permute.xlu1 %4806  ;;  %v4802_v62 = vadd.f32 %v4800_v41, %v4787_v43 }
0x14da   : > { %v4814_v46 = vsel %vm4803_vm15, %v11732_v55, 0.0 }
0x14db   : > { %v11734_v56 = vpop.permute.xlu0 %4811  ;;  %v4816_v51 = vadd.f32 %v4814_v46, %v4801_v57 }
0x14dc   : > { %v4815_v47 = vsel %vm4803_vm15, %v11734_v56, 0.0  ;;  %vm4923_vm15 = vcmp.eq.s32.totalorder %v11740_v60, 18 }
0x14dd   : > { %v4817_v53 = vadd.f32 %v4815_v47, %v4802_v62 }
0x14e1   : > { %v11736_v58 = vpop.permute.xlu1 %4821 }
0x14e2   : > { %v4829_v48 = vsel %vm4818_vm1, %v11736_v58, 0.0 }
0x14e3   : > { %v11738_v59 = vpop.permute.xlu0 %4826  ;;  %v4831_v3 = vadd.f32 %v4829_v48, %v4816_v51 }
0x14e4   : > { %v4830_v50 = vsel %vm4818_vm1, %v11738_v59, 0.0  ;;  %vm4938_vm1 = vcmp.eq.s32.totalorder %v11740_v60, 19 }
0x14e5   : > { %v4832_v56 = vadd.f32 %v4830_v50, %v4817_v53 }
0x14e9   : > { %v11743_v52 = vpop.permute.xlu1 %4836 }
0x14ea   : > { %v4844_v49 = vsel %vm4833_vm2, %v11743_v52, 0.0 }
0x14eb   : > { %v11745_v61 = vpop.permute.xlu0 %4841  ;;  %v4846_v8 = vadd.f32 %v4844_v49, %v4831_v3 }
0x14ec   : > { %v4845_v55 = vsel %vm4833_vm2, %v11745_v61, 0.0  ;;  %vm4953_vm2 = vcmp.eq.s32.totalorder %v11740_v60, 20 }
0x14ed   : > { %v4847_v59 = vadd.f32 %v4845_v55, %v4832_v56 }
0x14f1   : > { %v11750_v0 = vpop.permute.xlu1 %4851 }
0x14f2   : > { %v4859_v6 = vsel %vm4848_vm7, %v11750_v0, 0.0 }
0x14f3   : > { %v11752_v1 = vpop.permute.xlu0 %4856  ;;  %v4861_v12 = vadd.f32 %v4859_v6, %v4846_v8 }
0x14f4   : > { %v4860_v58 = vsel %vm4848_vm7, %v11752_v1, 0.0  ;;  %vm4968_vm7 = vcmp.eq.s32.totalorder %v11740_v60, 21 }
0x14f5   : > { %v4862_v52 = vadd.f32 %v4860_v58, %v4847_v59  ;;  %v10093_v59 = vld [vmem:[%s12541_s14 + $0x10] sm:$0xff]  }
0x14f9   : > { %v4867_v13 = vpop.permute.xlu1 %4866 }
0x14fa   : > { %v4874_v11 = vsel %vm4863_vm11, %v4867_v13, 0.0 }
0x14fb   : > { %v4872_v14 = vpop.permute.xlu0 %4871  ;;  %v4876_v16 = vadd.f32 %v4874_v11, %v4861_v12 }
0x14fc   : > { %v4875_v54 = vsel %vm4863_vm11, %v4872_v14, 0.0  ;;  %vm4983_vm11 = vcmp.eq.s32.totalorder %v11740_v60, 22 }
0x14fd   : > { %v4877_v17 = vadd.f32 %v4875_v54, %v4862_v52 }
0x1501   : > { %v4882_v23 = vpop.permute.xlu1 %4881 }
0x1502   : > { %v4889_v61 = vsel %vm4878_vm12, %v4882_v23, 0.0 }
0x1503   : > { %v4887_v24 = vpop.permute.xlu0 %4886  ;;  %v4891_v20 = vadd.f32 %v4889_v61, %v4876_v16 }
0x1504   : > { %v4890_v15 = vsel %vm4878_vm12, %v4887_v24, 0.0  ;;  %vm4998_vm12 = vcmp.eq.s32.totalorder %v11740_v60, 23 }
0x1505   : > { %v4892_v21 = vadd.f32 %v4890_v15, %v4877_v17 }
0x1509   : > { %v4897_v34 = vpop.permute.xlu1 %4896 }
0x150a   : > { %v4904_v18 = vsel %vm4893_vm13, %v4897_v34, 0.0 }
0x150b   : > { %v4902_v35 = vpop.permute.xlu0 %4901  ;;  %v4906_v22 = vadd.f32 %v4904_v18, %v4891_v20  ;;  %v10095_v18 = vld [vmem:[%s12542_s15 + $0x8] sm:$0xff]   ;;  %v10097_v20 = vld [vmem:[%s12541_s14 + $0x20] sm:$0xff]  }
0x150c   : > { %v4905_v19 = vsel %vm4893_vm13, %v4902_v35, 0.0  ;;  %vm5013_vm13 = vcmp.eq.s32.totalorder %v11740_v60, 24  ;;  %v10094_v60 = vld [vmem:[%s12541_s14 + $0x18] sm:$0x1f]  }
0x150d   : > { %v4907_v25 = vadd.f32 %v4905_v19, %v4892_v21  ;;  %v10096_v19 = vld [vmem:[%s12542_s15] sm:$0xff]   ;;  %v10098_v21 = vld [vmem:[%s12541_s14 + $0x28] sm:$0x1f]  }
0x1511   : > { %v4912_v44 = vpop.permute.xlu1 %4911 }
0x1512   : > { %v4919_v13 = vsel %vm4908_vm14, %v4912_v44, 0.0 }
0x1513   : > { %v4917_v45 = vpop.permute.xlu0 %4916  ;;  %v4921_v28 = vadd.f32 %v4919_v13, %v4906_v22  ;;  %v5273_v13 = vand.u32 %v10098_v21, %v10514_v7 }
0x1514   : > { %v4920_v14 = vsel %vm4908_vm14, %v4917_v45, 0.0 }
0x1515   : > { %v4922_v29 = vadd.f32 %v4920_v14, %v4907_v25 }
0x1519   : > { %v4927_v63 = vpop.permute.xlu1 %4926 }
0x151a   : > { %v4934_v26 = vsel %vm4923_vm15, %v4927_v63, 0.0 }
0x151b   : > { %v4932_v2 = vpop.permute.xlu0 %4931  ;;  %v4936_v33 = vadd.f32 %v4934_v26, %v4921_v28 }
0x151c   : > { %v4935_v27 = vsel %vm4923_vm15, %v4932_v2, 0.0 }
0x151d   : > { %v4937_v34 = vadd.f32 %v4935_v27, %v4922_v29 }
0x1521   : > { %v4942_v9 = vpop.permute.xlu1 %4941 }
0x1522   : > { %v4949_v30 = vsel %vm4938_vm1, %v4942_v9, 0.0 }
0x1523   : > { %v4947_v10 = vpop.permute.xlu0 %4946  ;;  %v4951_v39 = vadd.f32 %v4949_v30, %v4936_v33 }
0x1524   : > { %v4950_v31 = vsel %vm4938_vm1, %v4947_v10, 0.0  ;;  %v5111_v10 = vand.u32 %v10094_v60, %v10514_v7 }
0x1525   : > { %v4952_v40 = vadd.f32 %v4950_v31, %v4937_v34 }
0x1529   : > { %v4957_v0 = vpop.permute.xlu1 %4956 }
0x152a   : > { %v4964_v37 = vsel %vm4953_vm2, %v4957_v0, 0.0 }
0x152b   : > { %v4962_v1 = vpop.permute.xlu0 %4961  ;;  %v4966_v43 = vadd.f32 %v4964_v37, %v4951_v39  ;;  %v10099_v37 = vld [vmem:[%s12542_s15 + $0x10] sm:$0xff]   ;;  %v10101_v39 = vld [vmem:[%s12541_s14 + $0x38] sm:$0x1f]  }
0x152c   : > { %v4965_v38 = vsel %vm4953_vm2, %v4962_v1, 0.0 }
0x152d   : > { %v4967_v44 = vadd.f32 %v4965_v38, %v4952_v40  ;;  %v10100_v38 = vld [vmem:[%s12541_s14 + $0x30] sm:$0xff]   ;;  %v5388_v40 = vand.u32 %v10101_v39, %v10514_v7 }
0x152e   : > { %v10112_v39 = vld [vmem:[%s12541_s14 + $0x70] sm:$0xff]  }
0x1531   : > { %v4972_v23 = vpop.permute.xlu1 %4971 }
0x1532   : > { %v4979_v41 = vsel %vm4968_vm7, %v4972_v23, 0.0 }
0x1533   : > { %v4977_v24 = vpop.permute.xlu0 %4976  ;;  %v4981_v62 = vadd.f32 %v4979_v41, %v4966_v43 }
0x1534   : > { %v4980_v42 = vsel %vm4968_vm7, %v4977_v24, 0.0 }
0x1535   : > { %v4982_v48 = vadd.f32 %v4980_v42, %v4967_v44 }
0x1539   : > { %v4987_v35 = vpop.permute.xlu1 %4986 }
0x153a   : > { %v4994_v47 = vsel %vm4983_vm11, %v4987_v35, 0.0 }
0x153b   : > { %v4992_v36 = vpop.permute.xlu0 %4991  ;;  %v4996_v53 = vadd.f32 %v4994_v47, %v4981_v62 }
0x153c   : > { %v4995_v57 = vsel %vm4983_vm11, %v4992_v36, 0.0 }
0x153d   : > { %v4997_v63 = vadd.f32 %v4995_v57, %v4982_v48 }
0x1541   : > { %v5002_v45 = vpop.permute.xlu1 %5001 }
0x1542   : > { %v5009_v50 = vsel %vm4998_vm12, %v5002_v45, 0.0 }
0x1543   : > { %v5007_v46 = vpop.permute.xlu0 %5006  ;;  %v5011_v55 = vadd.f32 %v5009_v50, %v4996_v53  ;;  %v10103_v53 = vld [vmem:[%s12541_s14 + $0x40] sm:$0xff]  }
0x1544   : > { %v5010_v51 = vsel %vm4998_vm12, %v5007_v46, 0.0 }
0x1545   : > { %v5012_v3 = vadd.f32 %v5010_v51, %v4997_v63  ;;  %v10102_v51 = vld [vmem:[%s12542_s15 + $0x18] sm:$0xff]   ;;  %v10104_v63 = vld [vmem:[%s12541_s14 + $0x48] sm:$0x1f]  }
0x1549   : > { %v5017_v2 = vpop.permute.xlu1 %5016 }
0x154a   : > { %v5024_v49 = vsel %vm5013_vm13, %v5017_v2, 0.0  ;;  %v5503_v2 = vand.u32 %v10104_v63, %v10514_v7  ;;  %v10115_v63 = vld [vmem:[%s12541_s14 + $0x80] sm:$0xff]  }
0x154b   : > { %v5022_v56 = vpop.permute.xlu0 %5021  ;;  %v5026_v58 = vadd.f32 %v5024_v49, %v5011_v55 }
0x154c   : > { %v5025_v6 = vsel %vm5013_vm13, %v5022_v56, 0.0 }
0x154d   : > { %v5027_v8 = vadd.f32 %v5025_v6, %v5012_v3 }
0x154f   : > { %v11789_v9 = vpack.c.bf16 %v5027_v8, %v5026_v58 }
0x1551   : > { %9754 = vmatmul.mubr.msk.bf16.vlgmr.msra.gmra.mrb[64].mxu1 %vm3837_vm10, %v11789_v9 }
0x1552   : > { %9758 = vmatpush3.bf16.msra.mxu1 %v10093_v59  ;;  %9761 = vmatprep.mubr.msk.bf16.mxu1 %vm10360_vm5, %v10359_v5 }
0x1553   : > { %9759 = vmatprep.subr.bf16.mxu1 %v10359_v5 }
0x1556   : > { %9760 = vmatpush3.bf16.msra.mxu1 %v5111_v10 }
0x1557   : > { %9765 = vmatprep.subr.bf16.mxu1 %v10359_v5 }
0x1559   : > { %9762 = vmatmul.mubr.msk.bf16.vlgmr.msra.gmra.mrb[68].mxu1 %vm3837_vm10, %v11789_v9 }
0x155a   : > { %9767 = vmatprep.mubr.msk.bf16.mxu1 %vm10360_vm5, %v10359_v5 }
0x1624   : > { %v5084_v11 = vpop.f32.mrb[64].mxu1 }
0x1625   : > { %v9755_v54 = vpop.f32.mrb[65].mxu1 }
0x1626   : > { %v5087_v12 = vpop.f32.mrb[66].mxu1  ;;  %v10105_v54 = vld [vmem:[%s12542_s15 + $0x20] sm:$0xff]  }
0x1627   : > { %v5091_v52 = vpack.c.bf16 %v5087_v12, %v5084_v11  ;;  %v9756_v61 = vpop.f32.mrb[67].mxu1  ;;  %v10106_v12 = vld [vmem:[%s12541_s14 + $0x50] sm:$0xff]  }
0x162c   : > { %v5147_v15 = vpop.f32.mrb[68].mxu1 }
0x162d   : > { %v9763_v16 = vpop.f32.mrb[69].mxu1 }
0x162e   : > { %v5150_v17 = vpop.f32.mrb[70].mxu1 }
0x162f   : > { %v5154_v0 = vpack.c.bf16 %v5150_v17, %v5147_v15  ;;  %v9764_v1 = vpop.f32.mrb[71].mxu1 }
0x1631   : > { %9766 = vmatpush3.bf16.msra.mxu1 %v5154_v0 }
0x1632   : > { %9771 = vmatprep.subr.bf16.mxu1 %v10359_v5 }
0x1634   : > { %9768 = vmatmul.mubr.msk.bf16.vlgmr.msra.gmra.mrb[72].mxu1 %vm2829_vm9, %v10095_v18 }
0x1635   : > { %9772 = vmatpush3.bf16.msra.mxu1 %v5091_v52  ;;  %9773 = vmatprep.mubr.msk.bf16.mxu1 %vm10360_vm5, %v10359_v5  ;;  %v10107_v52 = vld [vmem:[%s12541_s14 + $0x58] sm:$0x1f]  }
0x1636   : > { %9777 = vmatprep.subr.bf16.mxu1 %v10359_v5  ;;  %v5618_v61 = vand.u32 %v10107_v52, %v10514_v7 }
0x163c   : > { %9774 = vmatmul.mubr.msk.bf16.vlgmr.msra.gmra.mrb[76].mxu1 %vm2829_vm9, %v10096_v19 }
0x163d   : > { %9778 = vmatpush3.bf16.msra.mxu1 %v10097_v20  ;;  %9781 = vmatprep.mubr.msk.bf16.mxu1 %vm10360_vm5, %v10359_v5 }
0x163e   : > { %9779 = vmatprep.subr.bf16.mxu1 %v10359_v5 }
0x1641   : > { %9780 = vmatpush3.bf16.msra.mxu1 %v5273_v13 }
0x1642   : > { %9785 = vmatprep.subr.bf16.mxu1 %v10359_v5 }
0x1644   : > { %9782 = vmatmul.mubr.msk.bf16.vlgmr.msra.gmra.mrb[80].mxu1 %vm3837_vm10, %v11789_v9 }
0x1645   : > { %9787 = vmatprep.mubr.msk.bf16.mxu1 %vm10360_vm5, %v10359_v5 }
0x1707   : > { %v5200_v14 = vpop.f32.mrb[72].mxu1 }
0x1708   : > { %v9769_v22 = vpop.f32.mrb[73].mxu1 }
0x1709   : > { %v5203_v25 = vpop.f32.mrb[74].mxu1  ;;  %v10108_v22 = vld [vmem:[%s12542_s15 + $0x28] sm:$0xff]  }
0x170a   : > { %v9770_v23 = vpop.f32.mrb[75].mxu1 }
0x170b   : > { %v10110_v23 = vld [vmem:[%s12541_s14 + $0x68] sm:$0x1f]  }
0x170f   : > { %v5249_v24 = vpop.f32.mrb[76].mxu1 }
0x1710   : > { %v5250_v26 = vadd.f32 %v5249_v24, %v5200_v14  ;;  %v9775_v27 = vpop.f32.mrb[77].mxu1  ;;  %v5733_v24 = vand.u32 %v10110_v23, %v10514_v7 }
0x1711   : > { %v5252_v28 = vpop.f32.mrb[78].mxu1 }
0x1712   : > { %v5253_v29 = vadd.f32 %v5252_v28, %v5203_v25  ;;  %v9776_v30 = vpop.f32.mrb[79].mxu1  ;;  %v10109_v25 = vld [vmem:[%s12541_s14 + $0x60] sm:$0xff]  }
0x1717   : > { %v5309_v31 = vpop.f32.mrb[80].mxu1 }
0x1718   : > { %v9783_v33 = vpop.f32.mrb[81].mxu1 }
0x1719   : > { %v5312_v34 = vpop.f32.mrb[82].mxu1 }
0x171a   : > { %v5316_v35 = vpack.c.bf16 %v5312_v34, %v5309_v31  ;;  %v9784_v36 = vpop.f32.mrb[83].mxu1 }
0x171c   : > { %9786 = vmatpush3.bf16.msra.mxu1 %v5316_v35 }
0x171d   : > { %9791 = vmatprep.subr.bf16.mxu1 %v10359_v5 }
0x171f   : > { %9788 = vmatmul.mubr.msk.bf16.vlgmr.msra.gmra.mrb[84].mxu1 %vm2829_vm9, %v10099_v37 }
0x1720   : > { %9792 = vmatpush3.bf16.msra.mxu1 %v10100_v38  ;;  %9795 = vmatprep.mubr.msk.bf16.mxu1 %vm10360_vm5, %v10359_v5  ;;  %v10111_v38 = vld [vmem:[%s12542_s15 + $0x30] sm:$0xff]  }
0x1721   : > { %9793 = vmatprep.subr.bf16.mxu1 %v10359_v5 }
0x1724   : > { %9794 = vmatpush3.bf16.msra.mxu1 %v5388_v40  ;;  %v10113_v40 = vld [vmem:[%s12541_s14 + $0x78] sm:$0x1f]  }
0x1725   : > { %9799 = vmatprep.subr.bf16.mxu1 %v10359_v5 }
0x1727   : > { %9796 = vmatmul.mubr.msk.bf16.vlgmr.msra.gmra.mrb[88].mxu1 %vm3837_vm10, %v11789_v9 }
0x1728   : > { %9801 = vmatprep.mubr.msk.bf16.mxu1 %vm10360_vm5, %v10359_v5 }
0x17f2   : > { %v5362_v41 = vpop.f32.mrb[84].mxu1 }
0x17f3   : > { %v5369_v42 = vadd.f32 %v5362_v41, %v5250_v26  ;;  %v9789_v43 = vpop.f32.mrb[85].mxu1  ;;  %v5848_v41 = vand.u32 %v10113_v40, %v10514_v7 }
0x17f4   : > { %v5365_v44 = vpop.f32.mrb[86].mxu1 }
0x17f5   : > { %v5370_v45 = vadd.f32 %v5365_v44, %v5253_v29  ;;  %v9790_v46 = vpop.f32.mrb[87].mxu1 }
0x17fa   : > { %v5424_v47 = vpop.f32.mrb[88].mxu1 }
0x17fb   : > { %v9797_v57 = vpop.f32.mrb[89].mxu1 }
0x17fc   : > { %v5427_v62 = vpop.f32.mrb[90].mxu1 }
0x17fd   : > { %v5431_v48 = vpack.c.bf16 %v5427_v62, %v5424_v47  ;;  %v9798_v50 = vpop.f32.mrb[91].mxu1 }
0x17ff   : > { %9800 = vmatpush3.bf16.msra.mxu1 %v5431_v48 }
0x1800   : > { %9805 = vmatprep.subr.bf16.mxu1 %v10359_v5 }
0x1802   : > { %9802 = vmatmul.mubr.msk.bf16.vlgmr.msra.gmra.mrb[92].mxu1 %vm2829_vm9, %v10102_v51 }
0x1803   : > { %9806 = vmatpush3.bf16.msra.mxu1 %v10103_v53  ;;  %9809 = vmatprep.mubr.msk.bf16.mxu1 %vm10360_vm5, %v10359_v5  ;;  %v10114_v53 = vld [vmem:[%s12542_s15 + $0x38] sm:$0xff]  }
0x1804   : > { %9807 = vmatprep.subr.bf16.mxu1 %v10359_v5 }
0x1807   : > { %9808 = vmatpush3.bf16.msra.mxu1 %v5503_v2  ;;  %v10116_v2 = vld [vmem:[%s12541_s14 + $0x88] sm:$0x1f]  }
0x1808   : > { %9813 = vmatprep.subr.bf16.mxu1 %v10359_v5 }
0x180a   : > { %9810 = vmatmul.mubr.msk.bf16.vlgmr.msra.gmra.mrb[96].mxu1 %vm3837_vm10, %v11789_v9 }
0x180b   : > { %9815 = vmatprep.mubr.msk.bf16.mxu1 %vm10360_vm5, %v10359_v5 }
0x18d5   : > { %v5477_v49 = vpop.f32.mrb[92].mxu1 }
0x18d6   : > { %v5484_v55 = vadd.f32 %v5477_v49, %v5369_v42  ;;  %v9803_v3 = vpop.f32.mrb[93].mxu1  ;;  %v5963_v49 = vand.u32 %v10116_v2, %v10514_v7  ;;  %v10120_v7 = vld [vmem:[%s12544_s17 + $0x74] ss:$8 sps:$4 sm:$0xff]  }
0x18d7   : > { %v5480_v56 = vpop.f32.mrb[94].mxu1  ;;  %v10123_v3 = vld [vmem:[%s12544_s17 + $0x84] ss:$8 sps:$4 sm:$0xff]   ;;  %6408 = vmatprep.subr.bf16.mxu0 %v10120_v7 }
0x18d8   : > { %v5485_v6 = vadd.f32 %v5480_v56, %v5370_v45  ;;  %v9804_v58 = vpop.f32.mrb[95].mxu1  ;;  %v10126_v56 = vld [vmem:[%s12544_s17 + $0x94] ss:$8 sps:$4 sm:$0xff]  }
0x18d9   : > { %v10124_v58 = vld [vmem:[%s12544_s17 + $0x90] ss:$8 sps:$4 sm:$0xff]  }
0x18dd   : > { %v5539_v8 = vpop.f32.mrb[96].mxu1 }
0x18de   : > { %v9811_v59 = vpop.f32.mrb[97].mxu1 }
0x18df   : > { %v5542_v60 = vpop.f32.mrb[98].mxu1 }
0x18e0   : > { %v5546_v10 = vpack.c.bf16 %v5542_v60, %v5539_v8  ;;  %v9812_v11 = vpop.f32.mrb[99].mxu1 }
0x18e2   : > { %9814 = vmatpush3.bf16.msra.mxu1 %v5546_v10 }
0x18e3   : > { %9819 = vmatprep.subr.bf16.mxu1 %v10359_v5 }
0x18e5   : > { %9816 = vmatmul.mubr.msk.bf16.vlgmr.msra.gmra.mrb[100].mxu1 %vm2829_vm9, %v10105_v54 }
0x18e6   : > { %9820 = vmatpush3.bf16.msra.mxu1 %v10106_v12  ;;  %9823 = vmatprep.mubr.msk.bf16.mxu1 %vm10360_vm5, %v10359_v5 }
0x18e7   : > { %9821 = vmatprep.subr.bf16.mxu1 %v10359_v5 }
0x18ea   : > { %9822 = vmatpush3.bf16.msra.mxu1 %v5618_v61 }
0x18eb   : > { %9827 = vmatprep.subr.bf16.mxu1 %v10359_v5 }
0x18ed   : > { %9824 = vmatmul.mubr.msk.bf16.vlgmr.msra.gmra.mrb[104].mxu1 %vm3837_vm10, %v11789_v9 }
0x18ee   : > { %9829 = vmatprep.mubr.msk.bf16.mxu1 %vm10360_vm5, %v10359_v5 }
0x19b8   : > { %v5592_v15 = vpop.f32.mrb[100].mxu1 }
0x19b9   : > { %v5599_v16 = vadd.f32 %v5592_v15, %v5484_v55  ;;  %v9817_v17 = vpop.f32.mrb[101].mxu1  ;;  %v10118_v55 = vld [vmem:[%s12544_s17 + $0x70] ss:$8 sps:$4 sm:$0xff]  }
0x19ba   : > { %v5595_v0 = vpop.f32.mrb[102].mxu1  ;;  %6409 = vmatpush1.bf16.msra.mxu0 %v10118_v55 }
0x19bb   : > { %v5600_v1 = vadd.f32 %v5595_v0, %v5485_v6  ;;  %v9818_v18 = vpop.f32.mrb[103].mxu1  ;;  %6410 = vmatprep.subr.bf16.mxu0 %v10123_v3  ;;  %v10129_v0 = vld [vmem:[%s12544_s17 + $0x4] ss:$8 sps:$4 sm:$0xff]  }
0x19c0   : > { %v5654_v19 = vpop.f32.mrb[104].mxu1 }
0x19c1   : > { %v9825_v20 = vpop.f32.mrb[105].mxu1 }
0x19c2   : > { %v5657_v21 = vpop.f32.mrb[106].mxu1  ;;  %v10127_v20 = vld [vmem:[%s12544_s17] ss:$8 sps:$4 sm:$0xff]  }
0x19c3   : > { %v5661_v13 = vpack.c.bf16 %v5657_v21, %v5654_v19  ;;  %v9826_v14 = vpop.f32.mrb[107].mxu1  ;;  %v10117_v19 = vld [vmem:[%s12542_s15 + $0x40] sm:$0xff]   ;;  %v10134_v21 = vld [vmem:[%s12544_s17 + $0x14] ss:$8 sps:$4 sm:$0xff]  }
0x19c4   : > { %v10137_v14 = vld [vmem:[%s12544_s17 + $0x24] ss:$8 sps:$4 sm:$0xff]  }
0x19c5   : > { %9828 = vmatpush3.bf16.msra.mxu1 %v5661_v13  ;;  %v10132_v13 = vld [vmem:[%s12544_s17 + $0x10] ss:$8 sps:$4 sm:$0xff]  }
0x19c6   : > { %9833 = vmatprep.subr.bf16.mxu1 %v10359_v5 }
0x19c8   : > { %9830 = vmatmul.mubr.msk.bf16.vlgmr.msra.gmra.mrb[108].mxu1 %vm2829_vm9, %v10108_v22  ;;  %v10135_v22 = vld [vmem:[%s12544_s17 + $0x20] ss:$8 sps:$4 sm:$0xff]  }
0x19c9   : > { %9834 = vmatpush3.bf16.msra.mxu1 %v10109_v25  ;;  %9837 = vmatprep.mubr.msk.bf16.mxu1 %vm10360_vm5, %v10359_v5  ;;  %v6084_v25 = vld [vmem:[%s12544_s17 + $0x30] sm:$0x11] }
0x19ca   : > { %9835 = vmatprep.subr.bf16.mxu1 %v10359_v5  ;;  %v8961_v23 = vcombine.high %v6084_v25, %v6084_v25 }
0x19cd   : > { %9836 = vmatpush3.bf16.msra.mxu1 %v5733_v24  ;;  %v8960_v24 = vcombine.low %v6084_v25, %v6084_v25 }
0x19ce   : > { %9841 = vmatprep.subr.bf16.mxu1 %v10359_v5 }
0x19d0   : > { %9838 = vmatmul.mubr.msk.bf16.vlgmr.msra.gmra.mrb[112].mxu1 %vm3837_vm10, %v11789_v9 }
0x19d1   : > { %9843 = vmatprep.mubr.msk.bf16.mxu1 %vm10360_vm5, %v10359_v5 }
0x1a9b   : > { %v5707_v26 = vpop.f32.mrb[108].mxu1 }
0x1a9c   : > { %v5714_v27 = vadd.f32 %v5707_v26, %v5599_v16  ;;  %v9831_v28 = vpop.f32.mrb[109].mxu1  ;;  %v6127_v26 = vand.u32 %v8961_v23, %v11160_v32 }
0x1a9d   : > { %v5710_v29 = vpop.f32.mrb[110].mxu1  ;;  %v10142_v28 = vld [vmem:[%s12544_s17 + $0x3c] ss:$8 sps:$4 sm:$0xff]  }
0x1a9e   : > { %v5715_v30 = vadd.f32 %v5710_v29, %v5600_v1  ;;  %v9832_v31 = vpop.f32.mrb[111].mxu1 }
0x1aa3   : > { %v5769_v33 = vpop.f32.mrb[112].mxu1 }
0x1aa4   : > { %v9839_v34 = vpop.f32.mrb[113].mxu1 }
0x1aa5   : > { %v5772_v35 = vpop.f32.mrb[114].mxu1 }
0x1aa6   : > { %v5776_v36 = vpack.c.bf16 %v5772_v35, %v5769_v33  ;;  %v9840_v37 = vpop.f32.mrb[115].mxu1  ;;  %v6066_v33 = vpop.permute.xlu1 %6065 }
0x1aa8   : > { %9842 = vmatpush3.bf16.msra.mxu1 %v5776_v36 }
0x1aa9   : > { %9847 = vmatprep.subr.bf16.mxu1 %v10359_v5 }
0x1aab   : > { %9844 = vmatmul.mubr.msk.bf16.vlgmr.msra.gmra.mrb[116].mxu1 %vm2829_vm9, %v10111_v38  ;;  %v6071_v38 = vpop.permute.xlu0 %6070 }
0x1aac   : > { %9848 = vmatpush3.bf16.msra.mxu1 %v10112_v39  ;;  %9851 = vmatprep.mubr.msk.bf16.mxu1 %vm10360_vm5, %v10359_v5 }
0x1aad   : > { %9849 = vmatprep.subr.bf16.mxu1 %v10359_v5 }
0x1ab0   : > { %9850 = vmatpush3.bf16.msra.mxu1 %v5848_v41 }
0x1ab1   : > { %9855 = vmatprep.subr.bf16.mxu1 %v10359_v5 }
0x1ab3   : > { %9852 = vmatmul.mubr.msk.bf16.vlgmr.msra.gmra.mrb[120].mxu1 %vm3837_vm10, %v11789_v9 }
0x1ab4   : > { %9857 = vmatprep.mubr.msk.bf16.mxu1 %vm10360_vm5, %v10359_v5 }
0x1b7e   : > { %v5822_v42 = vpop.f32.mrb[116].mxu1 }
0x1b7f   : > { %v5829_v43 = vadd.f32 %v5822_v42, %v5714_v27  ;;  %v9845_v44 = vpop.f32.mrb[117].mxu1  ;;  %v6124_v27 = vand.u32 %v8960_v24, %v11160_v32  ;;  %v10140_v42 = vld [vmem:[%s12544_s17 + $0x38] ss:$8 sps:$4 sm:$0xff]  }
0x1b80   : > { %v5825_v45 = vpop.f32.mrb[118].mxu1  ;;  %v10145_v44 = vld [vmem:[%s12544_s17 + $0x4c] ss:$8 sps:$4 sm:$0xff]  }
0x1b81   : > { %v5830_v46 = vadd.f32 %v5825_v45, %v5715_v30  ;;  %v9846_v47 = vpop.f32.mrb[119].mxu1  ;;  %v8969_v45 = vld [vmem:[%s12544_s17 + $0x68] sm:$0x11] }
0x1b82   : > { %v10148_v47 = vld [vmem:[%s12544_s17 + $0x5c] ss:$8 sps:$4 sm:$0xff]  }
0x1b86   : > { %v5884_v57 = vpop.f32.mrb[120].mxu1 }
0x1b87   : > { %v9853_v62 = vpop.f32.mrb[121].mxu1 }
0x1b88   : > { %v5887_v48 = vpop.f32.mrb[122].mxu1  ;;  %v10146_v62 = vld [vmem:[%s12544_s17 + $0x58] ss:$8 sps:$4 sm:$0xff]  }
0x1b89   : > { %v5891_v50 = vpack.c.bf16 %v5887_v48, %v5884_v57  ;;  %v9854_v51 = vpop.f32.mrb[123].mxu1  ;;  %v8977_v57 = vcombine.high %v8969_v45, %v8969_v45  ;;  %v8976_v48 = vcombine.low %v8969_v45, %v8969_v45 }
0x1b8b   : > { %9856 = vmatpush3.bf16.msra.mxu1 %v5891_v50  ;;  %v6222_v50 = vand.u32 %v8977_v57, %v11160_v32  ;;  %v6219_v51 = vand.u32 %v8976_v48, %v11160_v32  ;;  %v10162_v57 = vld [vmem:[%s12544_s17 + $0xe0] ss:$8 sps:$4 sm:$0xff]   ;;  %v9024_v48 = vld [vmem:[%s12544_s17 + $0x110] sm:$0x11] }
0x1b8c   : > { %9861 = vmatprep.subr.bf16.mxu1 %v10359_v5 }
0x1b8e   : > { %9858 = vmatmul.mubr.msk.bf16.vlgmr.msra.gmra.mrb[124].mxu1 %vm2829_vm9, %v10114_v53 }
0x1b8f   : > { %9862 = vmatpush3.bf16.msra.mxu1 %v10115_v63  ;;  %9865 = vmatprep.mubr.msk.bf16.mxu1 %vm10360_vm5, %v10359_v5 }
0x1b90   : > { %9863 = vmatprep.subr.bf16.mxu1 %v10359_v5 }
0x1b93   : > { %9864 = vmatpush3.bf16.msra.mxu1 %v5963_v49 }
0x1b94   : > { %9869 = vmatprep.subr.bf16.mxu1 %v10359_v5 }
0x1b96   : > { %9866 = vmatmul.mubr.msk.bf16.vlgmr.msra.gmra.mrb[128].mxu1 %vm3837_vm10, %v11789_v9  ;;  %v8988_v9 = vld [vmem:[%s12544_s17 + $0xa0] sm:$0x11] }
0x1b97   : > { %9871 = vmatprep.mubr.msk.bf16.mxu1 %vm10360_vm5, %v10359_v5  ;;  %v10121_v5 = vld [vmem:[%s12544_s17 + $0x80] ss:$8 sps:$4 sm:$0xff]   ;;  %v8996_v6 = vcombine.high %v8988_v9, %v8988_v9  ;;  %v8995_v8 = vcombine.low %v8988_v9, %v8988_v9 }
0x1b98   : > { %6411 = vmatpush1.bf16.msra.mxu0 %v10121_v5 }
0x1b99   : > { %6412 = vmatprep.subr.bf16.mxu0 %v10126_v56  ;;  %v6406_v59 = vand.u32 %v8996_v6, %v11160_v32  ;;  %v6403_v60 = vand.u32 %v8995_v8, %v11160_v32 }
0x1b9c   : > { %6413 = vmatpush1.bf16.msra.mxu0 %v10124_v58 }
0x1b9d   : > { %6414 = vmatprep.subr.bf16.mxu0 %v6406_v59 }
0x1ba0   : > { %6415 = vmatpush1.bf16.msra.mxu0 %v6403_v60 }
0x1c61   : > { %v5937_v10 = vpop.f32.mrb[124].mxu1 }
0x1c62   : > { %v5944_v11 = vadd.f32 %v5937_v10, %v5829_v43  ;;  %v9859_v54 = vpop.f32.mrb[125].mxu1 }
0x1c63   : > { %v5940_v12 = vpop.f32.mrb[126].mxu1 }
0x1c64   : > { %v5945_v52 = vadd.f32 %v5940_v12, %v5830_v46  ;;  %v9860_v61 = vpop.f32.mrb[127].mxu1  ;;  %v10143_v46 = vld [vmem:[%s12544_s17 + $0x48] ss:$8 sps:$4 sm:$0xff]   ;;  %v8979_v12 = vld [vmem:[%s12545_s18 + $0x4] sm:$0xf] }
0x1c65   : > { %v10153_v61 = vld [vmem:[%s12544_s17 + $0xac] ss:$8 sps:$4 sm:$0xff]  }
0x1c69   : > { %v5999_v15 = vpop.f32.mrb[128].mxu1 }
0x1c6a   : > { %v9867_v16 = vpop.f32.mrb[129].mxu1 }
0x1c6b   : > { %v6002_v17 = vpop.f32.mrb[130].mxu1  ;;  %v8998_v16 = vld [vmem:[%s12545_s18 + $0x8] sm:$0xf] }
0x1c6c   : > { %v6006_v1 = vpack.c.bf16 %v6002_v17, %v5999_v15  ;;  %v9868_v18 = vpop.f32.mrb[131].mxu1  ;;  %v10151_v15 = vld [vmem:[%s12544_s17 + $0xa8] ss:$8 sps:$4 sm:$0xff]   ;;  %v10156_v17 = vld [vmem:[%s12544_s17 + $0xbc] ss:$8 sps:$4 sm:$0xff]  }
0x1c6d   : > { %v10159_v18 = vld [vmem:[%s12544_s17 + $0xcc] ss:$8 sps:$4 sm:$0xff]  }
0x1c6e   : > { %9870 = vmatpush3.bf16.msra.mxu1 %v6006_v1  ;;  %v10154_v1 = vld [vmem:[%s12544_s17 + $0xb8] ss:$8 sps:$4 sm:$0xff]  }
0x1c6f   : > { %6129 = vmatprep.subr.bf16.mxu1 %v10129_v0  ;;  %v9006_v0 = vld [vmem:[%s12544_s17 + $0xd8] sm:$0x11] }
0x1c71   : > { %9872 = vmatmul.mubr.msk.bf16.vlgmr.msra.gmra.mrb[132].mxu1 %vm2829_vm9, %v10117_v19  ;;  %v9014_v19 = vcombine.high %v9006_v0, %v9006_v0 }
0x1c72   : > { %6130 = vmatpush1.bf16.msra.mxu1 %v10127_v20  ;;  %6161 = vmatprep.mubr.bf16.mxu1 %v10358_v4  ;;  %v10157_v20 = vld [vmem:[%s12544_s17 + $0xc8] ss:$8 sps:$4 sm:$0xff]  }
0x1c73   : > { %6131 = vmatprep.subr.bf16.mxu1 %v10134_v21  ;;  %v9013_v21 = vcombine.low %v9006_v0, %v9006_v0 }
0x1c76   : > { %6132 = vmatpush1.bf16.msra.mxu1 %v10132_v13  ;;  %v6548_v13 = vand.u32 %v9014_v19, %v11160_v32 }
0x1c77   : > { %6133 = vmatprep.subr.bf16.mxu1 %v10137_v14  ;;  %v6545_v14 = vand.u32 %v9013_v21, %v11160_v32 }
0x1c7a   : > { %6134 = vmatpush1.bf16.msra.mxu1 %v10135_v22 }
0x1c7b   : > { %6135 = vmatprep.subr.bf16.mxu1 %v6127_v26 }
0x1c7e   : > { %6136 = vmatpush1.bf16.msra.mxu1 %v6124_v27 }
0x1c7f   : > { %6224 = vmatprep.subr.bf16.mxu1 %v10142_v28 }
0x1d44   : > { %v6052_v29 = vpop.f32.mrb[132].mxu1 }
0x1d45   : > { %v6059_v30 = vadd.f32 %v6052_v29, %v5944_v11  ;;  %v9873_v31 = vpop.f32.mrb[133].mxu1 }
0x1d46   : > { %v6055_v34 = vpop.f32.mrb[134].mxu1 }
0x1d47   : > { %v6073_v35 = vadd.f32 %v6066_v33, %v6059_v30  ;;  %v6060_v36 = vadd.f32 %v6055_v34, %v5945_v52  ;;  %v9874_v37 = vpop.f32.mrb[135].mxu1  ;;  %v6174_v52 = vld [vmem:[%s12545_s18] sm:$0xf] }
0x1d49   : > { %v6074_v39 = vadd.f32 %v6071_v38, %v6060_v36  ;;  %v6075_v40 = vmax.f32 %v6073_v35, 0.0 }
0x1d4b   : > { %v6076_v41 = vmax.f32 %v6074_v39, 0.0 }
0x1d4d   : > { %v12006_v43 = vpack.c.bf16 %v6076_v41, %v6075_v40 }
0x1d4f   : > { %8962 = vmatmul.mubr.msk.bf16.vlgmr.msra.gmra.mrb[136].mxu1 %vm2693_vm8, %v12006_v43  ;;  %8997 = vmatmul.mubr.msk.bf16.vlgmr.msra.gmra.mrb[192].mxu0 %vm2693_vm8, %v12006_v43 }
0x1d50   : > { %6225 = vmatpush1.bf16.msra.mxu1 %v10140_v42  ;;  %6256 = vmatprep.mubr.bf16.mxu1 %v10358_v4 }
0x1d51   : > { %6226 = vmatprep.subr.bf16.mxu1 %v10145_v44  ;;  %6632 = vmatprep.mubr.bf16.mxu0 %v10358_v4 }
0x1d54   : > { %6227 = vmatpush1.bf16.msra.mxu1 %v10143_v46  ;;  %v10164_v46 = vld [vmem:[%s12544_s17 + $0xe4] ss:$8 sps:$4 sm:$0xff]  }
0x1d55   : > { %6228 = vmatprep.subr.bf16.mxu1 %v10148_v47  ;;  %v9016_v47 = vld [vmem:[%s12545_s18 + $0xc] sm:$0xf] }
0x1d58   : > { %6229 = vmatpush1.bf16.msra.mxu1 %v10146_v62  ;;  %v10167_v62 = vld [vmem:[%s12544_s17 + $0xf4] ss:$8 sps:$4 sm:$0xff]  }
0x1d59   : > { %6230 = vmatprep.subr.bf16.mxu1 %v6222_v50  ;;  %v10165_v50 = vld [vmem:[%s12544_s17 + $0xf0] ss:$8 sps:$4 sm:$0xff]  }
0x1d5c   : > { %6231 = vmatpush1.bf16.msra.mxu1 %v6219_v51  ;;  %v10170_v51 = vld [vmem:[%s12544_s17 + $0x104] ss:$8 sps:$4 sm:$0xff]  }
0x1d5f   : > { %8978 = vmatmul.mubr.msk.bf16.vlgmr.msra.gmra.mrb[140].mxu1 %vm2693_vm8, %v12006_v43 }
0x1d60   : > { %6306 = vmatprep.mubr.bf16.mxu1 %v10358_v4 }
0x1e22   : > { %v6163_v53 = vpop.f32.mrb[136].mxu1  ;;  %v6442_v63 = vpop.f32.mrb[192].mxu0 }
0x1e23   : > { %v6165_v2 = vpop.f32.mrb[137].mxu1  ;;  %v6444_v49 = vpop.f32.mrb[193].mxu0 }
0x1e24   : > { %v6167_v55 = vpop.f32.mrb[138].mxu1  ;;  %v6446_v7 = vpop.f32.mrb[194].mxu0 }
0x1e25   : > { %v6172_v3 = vpack.c.bf16 %v6167_v55, %v6163_v53  ;;  %v6451_v9 = vpack.c.bf16 %v6446_v7, %v6442_v63  ;;  %v6169_v5 = vpop.f32.mrb[139].mxu1  ;;  %v6448_v56 = vpop.f32.mrb[195].mxu0  ;;  %v9032_v53 = vcombine.high %v9024_v48, %v9024_v48  ;;  %v10168_v63 = vld [vmem:[%s12544_s17 + $0x100] ss:$8 sps:$4 sm:$0xff]  }
0x1e26   : > { %v6173_v6 = vpack.c.bf16 %v6169_v5, %v6165_v2  ;;  %v6452_v58 = vpack.c.bf16 %v6448_v56, %v6444_v49  ;;  %v9031_v2 = vcombine.low %v9024_v48, %v9024_v48 }
0x1e27   : > { %v6690_v49 = vand.u32 %v9032_v53, %v11160_v32 }
0x1e28   : > { %v6687_v55 = vand.u32 %v9031_v2, %v11160_v32 }
0x1e32   : > { %v6258_v8 = vpop.f32.mrb[140].mxu1 }
0x1e33   : > { %v6260_v59 = vpop.f32.mrb[141].mxu1 }
0x1e34   : > { %v6262_v60 = vpop.f32.mrb[142].mxu1 }
0x1e35   : > { %v6267_v10 = vpack.c.bf16 %v6262_v60, %v6258_v8  ;;  %v6264_v11 = vpop.f32.mrb[143].mxu1 }
0x1e36   : > { %v6268_v54 = vpack.c.bf16 %v6264_v11, %v6260_v59 }
0x1e38   : > { %6274 = vmatprep.subr.bf16.mxu1 %v6268_v54  ;;  %v10175_v54 = vld [vmem:[%s12544_s17 + $0x11c] ss:$8 sps:$4 sm:$0xff]  }
0x1e39   : > { %6275 = vmatpush1.bf16.msra.mxu1 %v6267_v10 }
0x1e3a   : > { %6318 = vmatprep.subr.bf16.mxu1 %v6173_v6 }
0x1e3c   : > { %8980 = vmatmul.mubr.msk.bf16.vlgmr.msra.gmra.mrb[144].mxu1 %vm2829_vm9, %v8979_v12  ;;  %v9034_v12 = vld [vmem:[%s12545_s18 + $0x10] sm:$0xf] }
0x1e3d   : > { %6319 = vmatpush1.bf16.msra.mxu1 %v6172_v3  ;;  %6350 = vmatprep.mubr.bf16.mxu1 %v10358_v4 }
0x1e3e   : > { %6458 = vmatprep.subr.bf16.mxu1 %v6452_v58 }
0x1e44   : > { %8981 = vmatmul.mubr.msk.bf16.vlgmr.msra.gmra.mrb[148].mxu1 %vm2829_vm9, %v6174_v52  ;;  %v10173_v52 = vld [vmem:[%s12544_s17 + $0x118] ss:$8 sps:$4 sm:$0xff]  }
0x1e45   : > { %6459 = vmatpush1.bf16.msra.mxu1 %v6451_v9  ;;  %6490 = vmatprep.mubr.bf16.mxu1 %v10358_v4 }
0x1e46   : > { %6550 = vmatprep.subr.bf16.mxu1 %v10153_v61  ;;  %v10178_v61 = vld [vmem:[%s12544_s17 + $0x12c] ss:$8 sps:$4 sm:$0xff]  }
0x1e4c   : > { %8999 = vmatmul.mubr.msk.bf16.vlgmr.msra.gmra.mrb[152].mxu1 %vm2829_vm9, %v8998_v16  ;;  %v10176_v16 = vld [vmem:[%s12544_s17 + $0x128] ss:$8 sps:$4 sm:$0xff]  }
0x1e4d   : > { %6551 = vmatpush1.bf16.msra.mxu1 %v10151_v15  ;;  %6582 = vmatprep.mubr.bf16.mxu1 %v10358_v4  ;;  %v9042_v15 = vld [vmem:[%s12544_s17 + $0x148] sm:$0x11] }
0x1e4e   : > { %6552 = vmatprep.subr.bf16.mxu1 %v10156_v17  ;;  %v10181_v17 = vld [vmem:[%s12544_s17 + $0x13c] ss:$8 sps:$4 sm:$0xff]   ;;  %v9050_v0 = vcombine.high %v9042_v15, %v9042_v15 }
0x1e50   : > { %v6832_v19 = vand.u32 %v9050_v0, %v11160_v32 }
0x1e51   : > { %6553 = vmatpush1.bf16.msra.mxu1 %v10154_v1  ;;  %v10179_v1 = vld [vmem:[%s12544_s17 + $0x138] ss:$8 sps:$4 sm:$0xff]  }
0x1e52   : > { %6554 = vmatprep.subr.bf16.mxu1 %v10159_v18  ;;  %v9049_v18 = vcombine.low %v9042_v15, %v9042_v15 }
0x1e55   : > { %6555 = vmatpush1.bf16.msra.mxu1 %v10157_v20  ;;  %v6829_v20 = vand.u32 %v9049_v18, %v11160_v32 }
0x1e56   : > { %6556 = vmatprep.subr.bf16.mxu1 %v6548_v13 }
0x1e59   : > { %6557 = vmatpush1.bf16.msra.mxu1 %v6545_v14 }
0x1e5c   : > { %9015 = vmatmul.mubr.msk.bf16.vlgmr.msra.gmra.mrb[156].mxu1 %vm2693_vm8, %v12006_v43 }
0x1e5d   : > { %6774 = vmatprep.mubr.bf16.mxu1 %v10358_v4 }
0x1f0f   : > { %v6308_v22 = vpop.f32.mrb[144].mxu1 }
0x1f10   : > { %v6310_v25 = vpop.f32.mrb[145].mxu1 }
0x1f11   : > { %v6312_v23 = vpop.f32.mrb[146].mxu1 }
0x1f12   : > { %v6313_v24 = vpop.f32.mrb[147].mxu1 }
0x1f17   : > { %v6352_v26 = vpop.f32.mrb[148].mxu1 }
0x1f18   : > { %v6353_v27 = vadd.f32 %v6352_v26, %v6308_v22  ;;  %v6354_v28 = vpop.f32.mrb[149].mxu1 }
0x1f19   : > { %v6355_v29 = vadd.f32 %v6354_v28, %v6310_v25  ;;  %v6356_v30 = vpop.f32.mrb[150].mxu1 }
0x1f1a   : > { %v6357_v31 = vpop.f32.mrb[151].mxu1 }
0x1f1b   : > { %v10186_v31 = vld [vmem:[%s12544_s17 + $0x154] ss:$8 sps:$4 sm:$0xff]  }
0x1f1f   : > { %v6492_v33 = vpop.f32.mrb[152].mxu1 }
0x1f20   : > { %v6499_v34 = vadd.f32 %v6492_v33, %v6353_v27  ;;  %v6494_v35 = vpop.f32.mrb[153].mxu1  ;;  %v9052_v33 = vld [vmem:[%s12545_s18 + $0x14] sm:$0xf] }
0x1f21   : > { %v6500_v36 = vadd.f32 %v6494_v35, %v6355_v29  ;;  %v6496_v37 = vpop.f32.mrb[154].mxu1  ;;  %v10189_v35 = vld [vmem:[%s12544_s17 + $0x164] ss:$8 sps:$4 sm:$0xff]  }
0x1f22   : > { %v6497_v38 = vpop.f32.mrb[155].mxu1  ;;  %v10187_v37 = vld [vmem:[%s12544_s17 + $0x160] ss:$8 sps:$4 sm:$0xff]  }
0x1f23   : > { %v10192_v38 = vld [vmem:[%s12544_s17 + $0x174] ss:$8 sps:$4 sm:$0xff]  }
0x1f2f   : > { %v6584_v39 = vpop.f32.mrb[156].mxu1 }
0x1f30   : > { %v6586_v40 = vpop.f32.mrb[157].mxu1 }
0x1f31   : > { %v6588_v41 = vpop.f32.mrb[158].mxu1 }
0x1f32   : > { %v6593_v42 = vpack.c.bf16 %v6588_v41, %v6584_v39  ;;  %v6590_v44 = vpop.f32.mrb[159].mxu1 }
0x1f33   : > { %v6594_v45 = vpack.c.bf16 %v6590_v44, %v6586_v40  ;;  %v10190_v40 = vld [vmem:[%s12544_s17 + $0x170] ss:$8 sps:$4 sm:$0xff]  }
0x1f35   : > { %6600 = vmatprep.subr.bf16.mxu0 %v6594_v45 }
0x1f36   : > { %6601 = vmatpush1.bf16.msra.mxu0 %v6593_v42 }
0x1f37   : > { %6692 = vmatprep.subr.bf16.mxu0 %v10164_v46 }
0x1f39   : > { %9017 = vmatmul.mubr.msk.bf16.vlgmr.msra.gmra.mrb[196].mxu0 %vm2829_vm9, %v9016_v47 }
0x1f3a   : > { %6693 = vmatpush1.bf16.msra.mxu0 %v10162_v57  ;;  %6724 = vmatprep.mubr.bf16.mxu0 %v10358_v4 }
0x1f3b   : > { %6694 = vmatprep.subr.bf16.mxu0 %v10167_v62 }
0x1f3e   : > { %6695 = vmatpush1.bf16.msra.mxu0 %v10165_v50 }
0x1f3f   : > { %6696 = vmatprep.subr.bf16.mxu0 %v10170_v51 }
0x1f42   : > { %6697 = vmatpush1.bf16.msra.mxu0 %v10168_v63 }
0x1f43   : > { %6698 = vmatprep.subr.bf16.mxu0 %v6690_v49 }
0x1f46   : > { %6699 = vmatpush1.bf16.msra.mxu0 %v6687_v55  ;;  %v10197_v55 = vld [vmem:[%s12544_s17 + $0x18c] ss:$8 sps:$4 sm:$0xff]  }
0x1f49   : > { %9033 = vmatmul.mubr.msk.bf16.vlgmr.msra.gmra.mrb[200].mxu0 %vm2693_vm8, %v12006_v43 }
0x1f4a   : > { %6916 = vmatprep.mubr.bf16.mxu0 %v10358_v4 }
0x200c   : > { %v6634_v7 = vpop.f32.mrb[196].mxu0 }
0x200d   : > { %v6641_v3 = vadd.f32 %v6634_v7, %v6499_v34  ;;  %v6636_v9 = vpop.f32.mrb[197].mxu0  ;;  %v10184_v34 = vld [vmem:[%s12544_s17 + $0x150] ss:$8 sps:$4 sm:$0xff]  }
0x200e   : > { %v6642_v5 = vadd.f32 %v6636_v9, %v6500_v36  ;;  %v6638_v56 = vpop.f32.mrb[198].mxu0  ;;  %v9060_v36 = vld [vmem:[%s12544_s17 + $0x180] sm:$0x11]  ;;  %v9070_v7 = vld [vmem:[%s12545_s18 + $0x18] sm:$0xf] }
0x200f   : > { %v6639_v6 = vpop.f32.mrb[199].mxu0  ;;  %v9068_v39 = vcombine.high %v9060_v36, %v9060_v36  ;;  %v9067_v41 = vcombine.low %v9060_v36, %v9060_v36  ;;  %v10200_v9 = vld [vmem:[%s12544_s17 + $0x19c] ss:$8 sps:$4 sm:$0xff]   ;;  %v10198_v56 = vld [vmem:[%s12544_s17 + $0x198] ss:$8 sps:$4 sm:$0xff]  }
0x2010   : > { %v10203_v6 = vld [vmem:[%s12544_s17 + $0x1ac] ss:$8 sps:$4 sm:$0xff]   ;;  %v10240_v36 = vld [vmem:[%s12547_s20 + $0xfc] ss:$8 sps:$4 sm:$0xff]  }
0x2011   : > { %v6974_v42 = vand.u32 %v9068_v39, %v11160_v32  ;;  %v6971_v44 = vand.u32 %v9067_v41, %v11160_v32  ;;  %v10250_v39 = vld [vmem:[%s12547_s20 + $0x118] ss:$8 sps:$4 sm:$0xff]   ;;  %v10256_v41 = vld [vmem:[%s12547_s20 + $0x128] ss:$8 sps:$4 sm:$0xff]  }
0x201c   : > { %v6726_v58 = vpop.f32.mrb[200].mxu0 }
0x201d   : > { %v6728_v8 = vpop.f32.mrb[201].mxu0 }
0x201e   : > { %v6730_v59 = vpop.f32.mrb[202].mxu0 }
0x201f   : > { %v6735_v60 = vpack.c.bf16 %v6730_v59, %v6726_v58  ;;  %v6732_v10 = vpop.f32.mrb[203].mxu0 }
0x2020   : > { %v6736_v11 = vpack.c.bf16 %v6732_v10, %v6728_v8  ;;  %v10201_v8 = vld [vmem:[%s12544_s17 + $0x1a8] ss:$8 sps:$4 sm:$0xff]  }
0x2022   : > { %6742 = vmatprep.subr.bf16.mxu1 %v6736_v11 }
0x2023   : > { %6743 = vmatpush1.bf16.msra.mxu1 %v6735_v60 }
0x2024   : > { %6834 = vmatprep.subr.bf16.mxu1 %v10175_v54 }
0x2026   : > { %9035 = vmatmul.mubr.msk.bf16.vlgmr.msra.gmra.mrb[160].mxu1 %vm2829_vm9, %v9034_v12 }
0x2027   : > { %6835 = vmatpush1.bf16.msra.mxu1 %v10173_v52  ;;  %6866 = vmatprep.mubr.bf16.mxu1 %v10358_v4 }
0x2028   : > { %6836 = vmatprep.subr.bf16.mxu1 %v10178_v61 }
0x202b   : > { %6837 = vmatpush1.bf16.msra.mxu1 %v10176_v16 }
0x202c   : > { %6838 = vmatprep.subr.bf16.mxu1 %v10181_v17 }
0x202f   : > { %6839 = vmatpush1.bf16.msra.mxu1 %v10179_v1 }
0x2030   : > { %6840 = vmatprep.subr.bf16.mxu1 %v6832_v19 }
0x2033   : > { %6841 = vmatpush1.bf16.msra.mxu1 %v6829_v20  ;;  %v10208_v20 = vld [vmem:[%s12544_s17 + $0x1c4] ss:$8 sps:$4 sm:$0xff]  }
0x2036   : > { %9051 = vmatmul.mubr.msk.bf16.vlgmr.msra.gmra.mrb[164].mxu1 %vm2693_vm8, %v12006_v43 }
0x2037   : > { %7058 = vmatprep.mubr.bf16.mxu1 %v10358_v4 }
0x20f9   : > { %v6776_v21 = vpop.f32.mrb[160].mxu1 }
0x20fa   : > { %v6783_v13 = vadd.f32 %v6776_v21, %v6641_v3  ;;  %v6778_v14 = vpop.f32.mrb[161].mxu1  ;;  %v10195_v3 = vld [vmem:[%s12544_s17 + $0x188] ss:$8 sps:$4 sm:$0xff]   ;;  %v9088_v21 = vld [vmem:[%s12545_s18 + $0x1c] sm:$0xf] }
0x20fb   : > { %v6784_v22 = vadd.f32 %v6778_v14, %v6642_v5  ;;  %v6780_v25 = vpop.f32.mrb[162].mxu1  ;;  %v9078_v5 = vld [vmem:[%s12544_s17 + $0x1b8] sm:$0x11] }
0x20fc   : > { %v6781_v23 = vpop.f32.mrb[163].mxu1  ;;  %v9086_v58 = vcombine.high %v9078_v5, %v9078_v5  ;;  %v9085_v59 = vcombine.low %v9078_v5, %v9078_v5  ;;  %v10211_v14 = vld [vmem:[%s12544_s17 + $0x1d4] ss:$8 sps:$4 sm:$0xff]   ;;  %v10209_v25 = vld [vmem:[%s12544_s17 + $0x1d0] ss:$8 sps:$4 sm:$0xff]  }
0x20fd   : > { %v10214_v23 = vld [vmem:[%s12544_s17 + $0x1e4] ss:$8 sps:$4 sm:$0xff]  }
0x20fe   : > { %v7116_v60 = vand.u32 %v9086_v58, %v11160_v32  ;;  %v7113_v10 = vand.u32 %v9085_v59, %v11160_v32  ;;  %v10219_v58 = vld [vmem:[%s12547_s20 + $0x4] ss:$8 sps:$4 sm:$0xff]   ;;  %v10217_v59 = vld [vmem:[%s12547_s20] ss:$8 sps:$4 sm:$0xff]  }
0x2109   : > { %v6868_v24 = vpop.f32.mrb[164].mxu1 }
0x210a   : > { %v6870_v26 = vpop.f32.mrb[165].mxu1 }
0x210b   : > { %v6872_v27 = vpop.f32.mrb[166].mxu1 }
0x210c   : > { %v6877_v28 = vpack.c.bf16 %v6872_v27, %v6868_v24  ;;  %v6874_v29 = vpop.f32.mrb[167].mxu1 }
0x210d   : > { %v6878_v30 = vpack.c.bf16 %v6874_v29, %v6870_v26  ;;  %v10212_v26 = vld [vmem:[%s12544_s17 + $0x1e0] ss:$8 sps:$4 sm:$0xff]  }
0x210f   : > { %6884 = vmatprep.subr.bf16.mxu0 %v6878_v30  ;;  %v10220_v30 = vld [vmem:[%s12547_s20 + $0xc8] ss:$8 sps:$4 sm:$0xff]  }
0x2110   : > { %6885 = vmatpush1.bf16.msra.mxu0 %v6877_v28 }
0x2111   : > { %6976 = vmatprep.subr.bf16.mxu0 %v10186_v31  ;;  %v10222_v31 = vld [vmem:[%s12547_s20 + $0xcc] ss:$8 sps:$4 sm:$0xff]  }
0x2113   : > { %9053 = vmatmul.mubr.msk.bf16.vlgmr.msra.gmra.mrb[204].mxu0 %vm2829_vm9, %v9052_v33  ;;  %v10226_v33 = vld [vmem:[%s12547_s20 + $0xd8] ss:$8 sps:$4 sm:$0xff]  }
0x2114   : > { %6977 = vmatpush1.bf16.msra.mxu0 %v10184_v34  ;;  %7008 = vmatprep.mubr.bf16.mxu0 %v10358_v4  ;;  %v10234_v34 = vld [vmem:[%s12547_s20 + $0xec] ss:$8 sps:$4 sm:$0xff]  }
0x2115   : > { %6978 = vmatprep.subr.bf16.mxu0 %v10189_v35  ;;  %v10238_v35 = vld [vmem:[%s12547_s20 + $0xf8] ss:$8 sps:$4 sm:$0xff]  }
0x2118   : > { %6979 = vmatpush1.bf16.msra.mxu0 %v10187_v37  ;;  %v10244_v37 = vld [vmem:[%s12547_s20 + $0x108] ss:$8 sps:$4 sm:$0xff]  }
0x2119   : > { %6980 = vmatprep.subr.bf16.mxu0 %v10192_v38  ;;  %v10246_v38 = vld [vmem:[%s12547_s20 + $0x10c] ss:$8 sps:$4 sm:$0xff]  }
0x211c   : > { %6981 = vmatpush1.bf16.msra.mxu0 %v10190_v40  ;;  %v10252_v40 = vld [vmem:[%s12547_s20 + $0x11c] ss:$8 sps:$4 sm:$0xff]  }
0x211d   : > { %6982 = vmatprep.subr.bf16.mxu0 %v6974_v42  ;;  %v10258_v42 = vld [vmem:[%s12547_s20 + $0x12c] ss:$8 sps:$4 sm:$0xff]  }
0x2120   : > { %6983 = vmatpush1.bf16.msra.mxu0 %v6971_v44  ;;  %v10262_v44 = vld [vmem:[%s12547_s20 + $0x138] ss:$8 sps:$4 sm:$0xff]  }
0x2123   : > { %9069 = vmatmul.mubr.msk.bf16.vlgmr.msra.gmra.mrb[208].mxu0 %vm2693_vm8, %v12006_v43 }
0x2124   : > { %7200 = vmatprep.mubr.bf16.mxu0 %v10358_v4 }
0x21e6   : > { %v6918_v45 = vpop.f32.mrb[204].mxu0 }
0x21e7   : > { %v6925_v46 = vadd.f32 %v6918_v45, %v6783_v13  ;;  %v6920_v47 = vpop.f32.mrb[205].mxu0  ;;  %v10206_v13 = vld [vmem:[%s12544_s17 + $0x1c0] ss:$8 sps:$4 sm:$0xff]   ;;  %v10264_v45 = vld [vmem:[%s12547_s20 + $0x13c] ss:$8 sps:$4 sm:$0xff]  }
0x21e8   : > { %v6926_v57 = vadd.f32 %v6920_v47, %v6784_v22  ;;  %v6922_v62 = vpop.f32.mrb[206].mxu0  ;;  %v9096_v22 = vld [vmem:[%s12544_s17 + $0x1f0] sm:$0x11] }
0x21e9   : > { %v6923_v48 = vpop.f32.mrb[207].mxu0  ;;  %v9104_v24 = vcombine.high %v9096_v22, %v9096_v22  ;;  %v9103_v27 = vcombine.low %v9096_v22, %v9096_v22  ;;  %v10270_v47 = vld [vmem:[%s12547_s20 + $0x14c] ss:$8 sps:$4 sm:$0xff]   ;;  %v10276_v62 = vld [vmem:[%s12547_s20 + $0x15c] ss:$8 sps:$4 sm:$0xff]  }
0x21ea   : > { %v10280_v48 = vld [vmem:[%s12547_s20 + $0x168] ss:$8 sps:$4 sm:$0xff]   ;;  %v10279_v22 = vld [vmem:[%s12547_s20 + $0xa4] ss:$8 sps:$4 sm:$0xff]  }
0x21eb   : > { %v7258_v28 = vand.u32 %v9104_v24, %v11160_v32  ;;  %v7255_v29 = vand.u32 %v9103_v27, %v11160_v32  ;;  %v10228_v32 = vld [vmem:[%s12547_s20 + $0xdc] ss:$8 sps:$4 sm:$0xff]   ;;  %v10283_v24 = vld [vmem:[%s12547_s20 + $0xb0] ss:$8 sps:$4 sm:$0xff]  }
0x21ec   : > { %v10286_v27 = vld [vmem:[%s12547_s20 + $0x178] ss:$8 sps:$4 sm:$0xff]  }
0x21f6   : > { %v7010_v50 = vpop.f32.mrb[208].mxu0 }
0x21f7   : > { %v7012_v51 = vpop.f32.mrb[209].mxu0 }
0x21f8   : > { %v7014_v53 = vpop.f32.mrb[210].mxu0 }
0x21f9   : > { %v7019_v63 = vpack.c.bf16 %v7014_v53, %v7010_v50  ;;  %v7016_v2 = vpop.f32.mrb[211].mxu0  ;;  %v10282_v50 = vld [vmem:[%s12547_s20 + $0x16c] ss:$8 sps:$4 sm:$0xff]  }
0x21fa   : > { %v7020_v49 = vpack.c.bf16 %v7016_v2, %v7012_v51 }
0x21fc   : > { %7026 = vmatprep.subr.bf16.mxu1 %v7020_v49 }
0x21fd   : > { %7027 = vmatpush1.bf16.msra.mxu1 %v7019_v63 }
0x21fe   : > { %7118 = vmatprep.subr.bf16.mxu1 %v10197_v55 }
0x2200   : > { %9071 = vmatmul.mubr.msk.bf16.vlgmr.msra.gmra.mrb[168].mxu1 %vm2829_vm9, %v9070_v7 }
0x2201   : > { %7119 = vmatpush1.bf16.msra.mxu1 %v10195_v3  ;;  %7150 = vmatprep.mubr.bf16.mxu1 %v10358_v4 }
0x2202   : > { %7120 = vmatprep.subr.bf16.mxu1 %v10200_v9 }
0x2205   : > { %7121 = vmatpush1.bf16.msra.mxu1 %v10198_v56 }
0x2206   : > { %7122 = vmatprep.subr.bf16.mxu1 %v10203_v6 }
0x2209   : > { %7123 = vmatpush1.bf16.msra.mxu1 %v10201_v8  ;;  %v9106_v8 = vld [vmem:[%s12545_s18 + $0x20] sm:$0xf] }
0x220a   : > { %7124 = vmatprep.subr.bf16.mxu1 %v7116_v60  ;;  %v10225_v60 = vld [vmem:[%s12547_s20 + $0x14] ss:$8 sps:$4 sm:$0xff]  }
0x220d   : > { %7125 = vmatpush1.bf16.msra.mxu1 %v7113_v10  ;;  %v10223_v10 = vld [vmem:[%s12547_s20 + $0x10] ss:$8 sps:$4 sm:$0xff]  }
0x2210   : > { %9087 = vmatmul.mubr.msk.bf16.vlgmr.msra.gmra.mrb[172].mxu1 %vm2693_vm8, %v12006_v43 }
0x2211   : > { %7342 = vmatprep.mubr.bf16.mxu1 %v10358_v4 }
0x22d3   : > { %v7060_v11 = vpop.f32.mrb[168].mxu1 }
0x22d4   : > { %v12199_v54 = vadd.f32 %v7060_v11, %v6925_v46  ;;  %v7062_v12 = vpop.f32.mrb[169].mxu1  ;;  %v10268_v46 = vld [vmem:[%s12547_s20 + $0x148] ss:$8 sps:$4 sm:$0xff]   ;;  %v10231_v11 = vld [vmem:[%s12547_s20 + $0x24] ss:$8 sps:$4 sm:$0xff]  }
0x22d5   : > { %v12201_v52 = vadd.f32 %v7062_v12, %v6926_v57  ;;  %v7064_v61 = vpop.f32.mrb[170].mxu1  ;;  %v10274_v57 = vld [vmem:[%s12547_s20 + $0x158] ss:$8 sps:$4 sm:$0xff]   ;;  %v10237_v12 = vld [vmem:[%s12547_s20 + $0x34] ss:$8 sps:$4 sm:$0xff]  }
0x22d6   : > { %v7065_v15 = vpop.f32.mrb[171].mxu1  ;;  %v10243_v61 = vld [vmem:[%s12547_s20 + $0x44] ss:$8 sps:$4 sm:$0xff]  }
0x22d7   : > { %v10241_v15 = vld [vmem:[%s12547_s20 + $0x40] ss:$8 sps:$4 sm:$0xff]  }
0x22e3   : > { %v7152_v16 = vpop.f32.mrb[172].mxu1 }
0x22e4   : > { %v7154_v17 = vpop.f32.mrb[173].mxu1 }
0x22e5   : > { %v7156_v0 = vpop.f32.mrb[174].mxu1 }
0x22e6   : > { %v7161_v1 = vpack.c.bf16 %v7156_v0, %v7152_v16  ;;  %v7158_v18 = vpop.f32.mrb[175].mxu1  ;;  %v10249_v16 = vld [vmem:[%s12547_s20 + $0x54] ss:$8 sps:$4 sm:$0xff]   ;;  %v10255_v0 = vld [vmem:[%s12547_s20 + $0x64] ss:$8 sps:$4 sm:$0xff]  }
0x22e7   : > { %v7162_v19 = vpack.c.bf16 %v7158_v18, %v7154_v17  ;;  %v10247_v17 = vld [vmem:[%s12547_s20 + $0x50] ss:$8 sps:$4 sm:$0xff]   ;;  %v10261_v18 = vld [vmem:[%s12547_s20 + $0x74] ss:$8 sps:$4 sm:$0xff]  }
0x22e9   : > { %7168 = vmatprep.subr.bf16.mxu0 %v7162_v19  ;;  %v10259_v19 = vld [vmem:[%s12547_s20 + $0x70] ss:$8 sps:$4 sm:$0xff]  }
0x22ea   : > { %7169 = vmatpush1.bf16.msra.mxu0 %v7161_v1  ;;  %v10253_v1 = vld [vmem:[%s12547_s20 + $0x60] ss:$8 sps:$4 sm:$0xff]  }
0x22eb   : > { %7260 = vmatprep.subr.bf16.mxu0 %v10208_v20  ;;  %v10267_v20 = vld [vmem:[%s12547_s20 + $0x84] ss:$8 sps:$4 sm:$0xff]  }
0x22ed   : > { %9089 = vmatmul.mubr.msk.bf16.vlgmr.msra.gmra.mrb[212].mxu0 %vm2829_vm9, %v9088_v21  ;;  %v10265_v21 = vld [vmem:[%s12547_s20 + $0x80] ss:$8 sps:$4 sm:$0xff]  }
0x22ee   : > { %7261 = vmatpush1.bf16.msra.mxu0 %v10206_v13  ;;  %7292 = vmatprep.mubr.bf16.mxu0 %v10358_v4  ;;  %v10273_v13 = vld [vmem:[%s12547_s20 + $0x94] ss:$8 sps:$4 sm:$0xff]  }
0x22ef   : > { %7262 = vmatprep.subr.bf16.mxu0 %v10211_v14  ;;  %v10271_v14 = vld [vmem:[%s12547_s20 + $0x90] ss:$8 sps:$4 sm:$0xff]  }
0x22f2   : > { %7263 = vmatpush1.bf16.msra.mxu0 %v10209_v25  ;;  %v10277_v25 = vld [vmem:[%s12547_s20 + $0xa0] ss:$8 sps:$4 sm:$0xff]  }
0x22f3   : > { %7264 = vmatprep.subr.bf16.mxu0 %v10214_v23  ;;  %v10285_v23 = vld [vmem:[%s12547_s20 + $0xb4] ss:$8 sps:$4 sm:$0xff]  }
0x22f6   : > { %7265 = vmatpush1.bf16.msra.mxu0 %v10212_v26  ;;  %v10288_v26 = vld [vmem:[%s12547_s20 + $0x17c] ss:$8 sps:$4 sm:$0xff]  }
0x22f7   : > { %7266 = vmatprep.subr.bf16.mxu0 %v7258_v28  ;;  %v7389_v28 = vld [vmem:[%s12547_s20 + $0xc0] sm:$0x33] }
0x22fa   : > { %7267 = vmatpush1.bf16.msra.mxu0 %v7255_v29  ;;  %v9133_v29 = vcombine.high %v7389_v28, %v7389_v28 }
0x22fb   : > { %7724 = vmatprep.subr.bf16.mxu0 %v10222_v31  ;;  %v9160_v31 = vld [vmem:[%s12547_s20 + $0x188] sm:$0x33] }
0x22fd   : > { %9105 = vmatmul.mubr.msk.bf16.vlgmr.msra.gmra.mrb[216].mxu0 %vm2693_vm8, %v12006_v43  ;;  %v10232_v43 = vld [vmem:[%s12547_s20 + $0xe8] ss:$8 sps:$4 sm:$0xff]  }
0x22fe   : > { %7725 = vmatpush1.bf16.msra.mxu0 %v10220_v30  ;;  %v9132_v30 = vcombine.low %v7389_v28, %v7389_v28 }
0x22ff   : > { %7726 = vmatprep.subr.bf16.mxu0 %v10228_v32  ;;  %v9185_v32 = vcombine.low %v9160_v31, %v9160_v31 }
0x2302   : > { %7727 = vmatpush1.bf16.msra.mxu0 %v10226_v33  ;;  %v9186_v33 = vcombine.high %v9160_v31, %v9160_v31  ;;  %v9247_v31 = vld [vmem:[%s12548_s21 + $0x4] sm:$0x3] }
0x2303   : > { %7728 = vmatprep.subr.bf16.mxu0 %v10234_v34  ;;  %v7719_v34 = vsel %vm934_vm3, %v9185_v32, 0 }
0x2306   : > { %7729 = vmatpush1.bf16.msra.mxu0 %v10232_v43  ;;  %v7519_v43 = vsel %vm934_vm3, %v9132_v30, 0 }
0x2307   : > { %7730 = vmatprep.subr.bf16.mxu0 %v10240_v36 }
0x230a   : > { %7731 = vmatpush1.bf16.msra.mxu0 %v10238_v35  ;;  %v10295_v35 = vld [vmem:[%s12547_s20 + $0x194] ss:$8 sps:$4 sm:$0xff]  }
0x230b   : > { %7732 = vmatprep.subr.bf16.mxu0 %v10246_v38 }
0x230e   : > { %7733 = vmatpush1.bf16.msra.mxu0 %v10244_v37 }
0x230f   : > { %7734 = vmatprep.subr.bf16.mxu0 %v10252_v40 }
0x2312   : > { %7735 = vmatpush1.bf16.msra.mxu0 %v10250_v39  ;;  %v7357_v39 = vpop.permute.xlu1 %7356 }
0x2313   : > { %7736 = vmatprep.subr.bf16.mxu0 %v10258_v42 }
0x2316   : > { %7737 = vmatpush1.bf16.msra.mxu0 %v10256_v41 }
0x2317   : > { %7738 = vmatprep.subr.bf16.mxu0 %v10264_v45 }
0x231a   : > { %7739 = vmatpush1.bf16.msra.mxu0 %v10262_v44 }
0x231b   : > { %7740 = vmatprep.subr.bf16.mxu0 %v10270_v47 }
0x231e   : > { %7741 = vmatpush1.bf16.msra.mxu0 %v10268_v46 }
0x231f   : > { %7742 = vmatprep.subr.bf16.mxu0 %v10276_v62  ;;  %v10293_v62 = vld [vmem:[%s12547_s20 + $0x190] ss:$8 sps:$4 sm:$0xff]  }
0x2322   : > { %7743 = vmatpush1.bf16.msra.mxu0 %v10274_v57 }
0x2323   : > { %7744 = vmatprep.subr.bf16.mxu0 %v10282_v50  ;;  %v10298_v50 = vld [vmem:[%s12547_s20 + $0x1a4] ss:$8 sps:$4 sm:$0xff]  }
0x2326   : > { %7745 = vmatpush1.bf16.msra.mxu0 %v10280_v48 }
0x2327   : > { %7746 = vmatprep.subr.bf16.mxu0 %v10288_v26 }
0x232a   : > { %7747 = vmatpush1.bf16.msra.mxu0 %v10286_v27 }
0x232b   : > { %9187 = vmatprep.subr.msk.bf16.mxu0 %vm934_vm3, %v9186_v33 }
0x232e   : > { %7749 = vmatpush1.bf16.msra.mxu0 %v7719_v34 }
0x23c0   : > { %v7202_v51 = vpop.f32.mrb[212].mxu0 }
0x23c1   : > { %v12300_v53 = vadd.f32 %v7202_v51, %v12199_v54  ;;  %v7204_v63 = vpop.f32.mrb[213].mxu0  ;;  %v10229_v54 = vld [vmem:[%s12547_s20 + $0x20] ss:$8 sps:$4 sm:$0xff]  }
0x23c2   : > { %v12303_v2 = vadd.f32 %v7204_v63, %v12201_v52  ;;  %v7206_v49 = vpop.f32.mrb[214].mxu0  ;;  %v10235_v52 = vld [vmem:[%s12547_s20 + $0x30] ss:$8 sps:$4 sm:$0xff]   ;;  %v10296_v51 = vld [vmem:[%s12547_s20 + $0x1a0] ss:$8 sps:$4 sm:$0xff]  }
0x23c3   : > { %v7207_v55 = vpop.f32.mrb[215].mxu0  ;;  %v10299_v63 = vld [vmem:[%s12547_s20 + $0x1b0] ss:$8 sps:$4 sm:$0xff]   ;;  %v10302_v49 = vld [vmem:[%s12547_s20 + $0x1c0] ss:$8 sps:$4 sm:$0xff]  }
0x23c4   : > { %v10307_v55 = vld [vmem:[%s12547_s20 + $0x1d4] ss:$8 sps:$4 sm:$0xff]  }
0x23d0   : > { %v7294_v7 = vpop.f32.mrb[216].mxu0 }
0x23d1   : > { %v7296_v3 = vpop.f32.mrb[217].mxu0 }
0x23d2   : > { %v7298_v9 = vpop.f32.mrb[218].mxu0 }
0x23d3   : > { %v7303_v5 = vpack.c.bf16 %v7298_v9, %v7294_v7  ;;  %v7300_v56 = vpop.f32.mrb[219].mxu0  ;;  %v10305_v7 = vld [vmem:[%s12547_s20 + $0x1d0] ss:$8 sps:$4 sm:$0xff]   ;;  %v10308_v9 = vld [vmem:[%s12547_s20 + $0x1e0] ss:$8 sps:$4 sm:$0xff]  }
0x23d4   : > { %v7304_v6 = vpack.c.bf16 %v7300_v56, %v7296_v3  ;;  %v10310_v3 = vld [vmem:[%s12547_s20 + $0x1e4] ss:$8 sps:$4 sm:$0xff]   ;;  %v10311_v56 = vld [vmem:[%s12547_s20 + $0x1f0] ss:$8 sps:$4 sm:$0xff]  }
0x23d6   : > { %7310 = vmatprep.subr.bf16.mxu1 %v7304_v6  ;;  %v10316_v6 = vld [vmem:[%s12547_s20 + $0x204] ss:$8 sps:$4 sm:$0xff]  }
0x23d7   : > { %7311 = vmatpush1.bf16.msra.mxu1 %v7303_v5  ;;  %v10313_v5 = vld [vmem:[%s12547_s20 + $0x1f4] ss:$8 sps:$4 sm:$0xff]  }
0x23d8   : > { %7524 = vmatprep.subr.bf16.mxu1 %v10219_v58  ;;  %v10314_v58 = vld [vmem:[%s12547_s20 + $0x200] ss:$8 sps:$4 sm:$0xff]  }
0x23da   : > { %9107 = vmatmul.mubr.msk.bf16.vlgmr.msra.gmra.mrb[176].mxu1 %vm2829_vm9, %v9106_v8  ;;  %v10319_v8 = vld [vmem:[%s12547_s20 + $0x214] ss:$8 sps:$4 sm:$0xff]  }
0x23db   : > { %7525 = vmatpush1.bf16.msra.mxu1 %v10217_v59  ;;  %v10317_v59 = vld [vmem:[%s12547_s20 + $0x210] ss:$8 sps:$4 sm:$0xff]  }
0x23dc   : > { %7526 = vmatprep.subr.bf16.mxu1 %v10225_v60  ;;  %v10322_v60 = vld [vmem:[%s12547_s20 + $0x224] ss:$8 sps:$4 sm:$0xff]  }
0x23df   : > { %7527 = vmatpush1.bf16.msra.mxu1 %v10223_v10  ;;  %v10320_v10 = vld [vmem:[%s12547_s20 + $0x220] ss:$8 sps:$4 sm:$0xff]  }
0x23e0   : > { %7528 = vmatprep.subr.bf16.mxu1 %v10231_v11  ;;  %v10325_v11 = vld [vmem:[%s12547_s20 + $0x234] ss:$8 sps:$4 sm:$0xff]  }
0x23e3   : > { %7529 = vmatpush1.bf16.msra.mxu1 %v10229_v54  ;;  %v10323_v54 = vld [vmem:[%s12547_s20 + $0x230] ss:$8 sps:$4 sm:$0xff]  }
0x23e4   : > { %7530 = vmatprep.subr.bf16.mxu1 %v10237_v12  ;;  %v10328_v12 = vld [vmem:[%s12547_s20 + $0x244] ss:$8 sps:$4 sm:$0xff]  }
0x23e7   : > { %7531 = vmatpush1.bf16.msra.mxu1 %v10235_v52  ;;  %v9213_v52 = vld [vmem:[%s12547_s20 + $0x250] sm:$0x33] }
0x23e8   : > { %7532 = vmatprep.subr.bf16.mxu1 %v10243_v61  ;;  %v10326_v61 = vld [vmem:[%s12547_s20 + $0x240] ss:$8 sps:$4 sm:$0xff]  }
0x23eb   : > { %7533 = vmatpush1.bf16.msra.mxu1 %v10241_v15  ;;  %v9239_v15 = vcombine.high %v9213_v52, %v9213_v52 }
0x23ec   : > { %7534 = vmatprep.subr.bf16.mxu1 %v10249_v16  ;;  %v9238_v16 = vcombine.low %v9213_v52, %v9213_v52 }
0x23ef   : > { %7535 = vmatpush1.bf16.msra.mxu1 %v10247_v17  ;;  %v7919_v17 = vsel %vm934_vm3, %v9238_v16, 0 }
0x23f0   : > { %7536 = vmatprep.subr.bf16.mxu1 %v10255_v0 }
0x23f3   : > { %7537 = vmatpush1.bf16.msra.mxu1 %v10253_v1 }
0x23f4   : > { %7538 = vmatprep.subr.bf16.mxu1 %v10261_v18 }
0x23f7   : > { %7539 = vmatpush1.bf16.msra.mxu1 %v10259_v19 }
0x23f8   : > { %7540 = vmatprep.subr.bf16.mxu1 %v10267_v20 }
0x23fb   : > { %7541 = vmatpush1.bf16.msra.mxu1 %v10265_v21 }
0x23fc   : > { %7542 = vmatprep.subr.bf16.mxu1 %v10273_v13 }
0x23ff   : > { %7543 = vmatpush1.bf16.msra.mxu1 %v10271_v14 }
0x2400   : > { %7544 = vmatprep.subr.bf16.mxu1 %v10279_v22 }
0x2403   : > { %7545 = vmatpush1.bf16.msra.mxu1 %v10277_v25 }
0x2404   : > { %7546 = vmatprep.subr.bf16.mxu1 %v10285_v23 }
0x2407   : > { %7547 = vmatpush1.bf16.msra.mxu1 %v10283_v24  ;;  %v9242_v24 = vld [vmem:[%s12548_s21 + $0x2] sm:$0x3] }
0x2408   : > { %9134 = vmatprep.subr.msk.bf16.mxu1 %vm934_vm3, %v9133_v29  ;;  %v7967_v29 = vld [vmem:[%s12548_s21] sm:$0x3] }
0x240b   : > { %7549 = vmatpush1.bf16.msra.mxu1 %v7519_v43 }
0x240c   : > { %7924 = vmatprep.subr.bf16.mxu1 %v10295_v35 }
0x24ad   : > { %v7344_v36 = vpop.f32.mrb[176].mxu1 }
0x24ae   : > { %v7351_v37 = vadd.f32 %v7344_v36, %v12300_v53  ;;  %v7346_v38 = vpop.f32.mrb[177].mxu1  ;;  %v10301_v53 = vld [vmem:[%s12547_s20 + $0x1b4] ss:$8 sps:$4 sm:$0xff]  }
0x24af   : > { %v7352_v40 = vadd.f32 %v7346_v38, %v12303_v2  ;;  %v7348_v41 = vpop.f32.mrb[178].mxu1  ;;  %v10304_v2 = vld [vmem:[%s12547_s20 + $0x1c4] ss:$8 sps:$4 sm:$0xff]  }
0x24b0   : > { %v7359_v42 = vadd.f32 %v7357_v39, %v7351_v37  ;;  %v7349_v44 = vpop.f32.mrb[179].mxu1  ;;  %v9250_v38 = vld [vmem:[%s12548_s21 + $0x6] sm:$0x3] }
0x24b1   : > { %v7360_v45 = vadd.f32 %v7357_v39, %v7352_v40 }
0x24b2   : > { %v7361_v46 = vmax.f32 %v7359_v42, 0.0 }
0x24b3   : > { %v7362_v47 = vmax.f32 %v7360_v45, 0.0 }
0x24b4   : > { %v12407_v48 = vpack.c.bf16 %v7361_v46, %v7361_v46 }
0x24b5   : > { %v12402_v57 = vpack.c.bf16 %v7362_v47, %v7362_v47 }
0x24b6   : > { %v8024_v27 = vsel %vm775_vm0, %v12407_v48, 0 }
0x24b7   : > { %9135 = vmatprep.mubr.msk.bf16.mxu1 %vm930_vm4, %v12402_v57  ;;  %9188 = vmatprep.mubr.msk.bf16.mxu0 %vm930_vm4, %v12402_v57 }
0x24b8   : > { %7557 = vmatmul.mubr.bf16.vlgmr.msra.gmra.mrb[180].mxu1 %v12407_v48  ;;  %7757 = vmatmul.mubr.bf16.vlgmr.msra.gmra.mrb[220].mxu0 %v12407_v48 }
0x24b9   : > { %7925 = vmatpush1.bf16.msra.mxu1 %v10293_v62  ;;  %9241 = vmatprep.mubr.msk.bf16.mxu1 %vm930_vm4, %v12402_v57 }
0x24ba   : > { %7926 = vmatprep.subr.bf16.mxu1 %v10298_v50  ;;  %8011 = vmatprep.mubr.bf16.mxu0 %v10358_v4 }
0x24bd   : > { %7927 = vmatpush1.bf16.msra.mxu1 %v10296_v51 }
0x24be   : > { %7928 = vmatprep.subr.bf16.mxu1 %v10301_v53 }
0x24c1   : > { %7929 = vmatpush1.bf16.msra.mxu1 %v10299_v63 }
0x24c2   : > { %7930 = vmatprep.subr.bf16.mxu1 %v10304_v2 }
0x24c5   : > { %7931 = vmatpush1.bf16.msra.mxu1 %v10302_v49 }
0x24c6   : > { %7932 = vmatprep.subr.bf16.mxu1 %v10307_v55 }
0x24c9   : > { %7933 = vmatpush1.bf16.msra.mxu1 %v10305_v7  ;;  %v8185_v7 = vpop.permute.xlu0 %8184 }
0x24ca   : > { %7934 = vmatprep.subr.bf16.mxu1 %v10310_v3 }
0x24cd   : > { %7935 = vmatpush1.bf16.msra.mxu1 %v10308_v9 }
0x24ce   : > { %7936 = vmatprep.subr.bf16.mxu1 %v10313_v5 }
0x24d1   : > { %7937 = vmatpush1.bf16.msra.mxu1 %v10311_v56 }
0x24d2   : > { %7938 = vmatprep.subr.bf16.mxu1 %v10316_v6 }
0x24d5   : > { %7939 = vmatpush1.bf16.msra.mxu1 %v10314_v58 }
0x24d6   : > { %7940 = vmatprep.subr.bf16.mxu1 %v10319_v8 }
0x24d9   : > { %7941 = vmatpush1.bf16.msra.mxu1 %v10317_v59 }
0x24da   : > { %7942 = vmatprep.subr.bf16.mxu1 %v10322_v60 }
0x24dd   : > { %7943 = vmatpush1.bf16.msra.mxu1 %v10320_v10 }
0x24de   : > { %7944 = vmatprep.subr.bf16.mxu1 %v10325_v11 }
0x24e1   : > { %7945 = vmatpush1.bf16.msra.mxu1 %v10323_v54 }
0x24e2   : > { %7946 = vmatprep.subr.bf16.mxu1 %v10328_v12 }
0x24e5   : > { %7947 = vmatpush1.bf16.msra.mxu1 %v10326_v61 }
0x24e6   : > { %9240 = vmatprep.subr.msk.bf16.mxu1 %vm934_vm3, %v9239_v15  ;;  %vm8205_vm3 = vcmask 556036  }
0x24e7   : > { %vm8206_vm4 = vmor %vm8205_vm3, %vm775_vm0 }
0x24e9   : > { %7949 = vmatpush1.bf16.msra.mxu1 %v7919_v17 }
0x24ec   : > { %7957 = vmatmul.mubr.bf16.vlgmr.msra.gmra.mrb[184].mxu1 %v12407_v48 }
0x258b   : > { %v7558_v0 = vpop.f32.mrb[180].mxu1  ;;  %v7758_v1 = vpop.f32.mrb[220].mxu0 }
0x258c   : > { %v7565_v18 = vpack.c.bf16 %v7558_v0, %v7558_v0  ;;  %v7560_v19 = vpop.f32.mrb[181].mxu1  ;;  %v7760_v20 = vpop.f32.mrb[221].mxu0  ;;  %v7765_v28 = vpack.c.bf16 %v7758_v1, %v7758_v1 }
0x258d   : > { %v7566_v21 = vpack.c.bf16 %v7560_v19, %v7560_v19  ;;  %v7562_v13 = vpop.f32.mrb[182].mxu1  ;;  %v7762_v14 = vpop.f32.mrb[222].mxu0  ;;  %v7766_v26 = vpack.c.bf16 %v7760_v20, %v7760_v20 }
0x258e   : > { %v7974_v22 = vsel %vm775_vm0, %v7565_v18, 0  ;;  %v7563_v25 = vpop.f32.mrb[183].mxu1  ;;  %v7763_v23 = vpop.f32.mrb[223].mxu0  ;;  %v8075_v30 = vsel %vm775_vm0, %v7765_v28, 0 }
0x258f   : > { %9243 = vmatprep.subr.msk.bf16.mxu0 %vm775_vm0, %v7566_v21 }
0x2590   : > { %7980 = vmatpush1.bf16.msra.mxu0 %v7974_v22 }
0x2591   : > { %9245 = vmatprep.subr.msk.bf16.mxu0 %vm775_vm0, %v12402_v57 }
0x2593   : > { %9244 = vmatmul.mubr.msk.bf16.vlgmr.msra.gmra.mrb[224].mxu0 %vm1134_vm6, %v9242_v24 }
0x2594   : > { %8029 = vmatpush1.bf16.msra.mxu0 %v8024_v27  ;;  %8060 = vmatprep.mubr.bf16.mxu0 %v10358_v4 }
0x2595   : > { %9248 = vmatprep.subr.msk.bf16.mxu0 %vm775_vm0, %v7766_v26 }
0x259b   : > { %9246 = vmatmul.mubr.msk.bf16.vlgmr.msra.gmra.mrb[228].mxu0 %vm1134_vm6, %v7967_v29 }
0x259c   : > { %8081 = vmatpush1.bf16.msra.mxu0 %v8075_v30  ;;  %8112 = vmatprep.mubr.bf16.mxu0 %v10358_v4 }
0x25a3   : > { %9249 = vmatmul.mubr.msk.bf16.vlgmr.msra.gmra.mrb[232].mxu0 %vm1134_vm6, %v9247_v31 }
0x25a4   : > { %8166 = vmatprep.mubr.bf16.mxu0 %v10358_v4 }
0x25bf   : > { %v7958_v33 = vpop.f32.mrb[184].mxu1 }
0x25c0   : > { %v7965_v32 = vpack.c.bf16 %v7958_v33, %v7958_v33  ;;  %v7960_v43 = vpop.f32.mrb[185].mxu1 }
0x25c1   : > { %v7966_v34 = vpack.c.bf16 %v7960_v43, %v7960_v43  ;;  %v7962_v35 = vpop.f32.mrb[186].mxu1 }
0x25c2   : > { %v8129_v36 = vsel %vm775_vm0, %v7965_v32, 0  ;;  %v7963_v37 = vpop.f32.mrb[187].mxu1 }
0x25c3   : > { %9251 = vmatprep.subr.msk.bf16.mxu0 %vm775_vm0, %v7966_v34 }
0x25c4   : > { %8135 = vmatpush1.bf16.msra.mxu0 %v8129_v36 }
0x25c7   : > { %9252 = vmatmul.mubr.msk.bf16.vlgmr.msra.gmra.mrb[236].mxu0 %vm1134_vm6, %v9250_v38 }
0x2666   : > { %v8013_v39 = vpop.f32.mrb[224].mxu0 }
0x2667   : > { %v8015_v40 = vpop.f32.mrb[225].mxu0 }
0x2668   : > { %v8017_v4 = vpop.f32.mrb[226].mxu0 }
0x2669   : > { %v8018_v41 = vpop.f32.mrb[227].mxu0 }
0x266e   : > { %v8062_v42 = vpop.f32.mrb[228].mxu0 }
0x266f   : > { %v8063_v44 = vadd.f32 %v8062_v42, %v8013_v39  ;;  %v8064_v45 = vpop.f32.mrb[229].mxu0 }
0x2670   : > { %v8065_v46 = vadd.f32 %v8064_v45, %v8015_v40  ;;  %v8066_v47 = vpop.f32.mrb[230].mxu0 }
0x2671   : > { %v8067_v57 = vpop.f32.mrb[231].mxu0 }
0x2676   : > { %v8114_v62 = vpop.f32.mrb[232].mxu0 }
0x2677   : > { %v8121_v48 = vadd.f32 %v8114_v62, %v8063_v44  ;;  %v8116_v50 = vpop.f32.mrb[233].mxu0 }
0x2678   : > { %v8122_v51 = vadd.f32 %v8116_v50, %v8065_v46  ;;  %v8118_v53 = vpop.f32.mrb[234].mxu0 }
0x2679   : > { %v8119_v63 = vpop.f32.mrb[235].mxu0 }
0x269a   : > { %v8168_v2 = vpop.f32.mrb[236].mxu0 }
0x269b   : > { %v8175_v49 = vadd.f32 %v8168_v2, %v8121_v48  ;;  %v8170_v55 = vpop.f32.mrb[237].mxu0 }
0x269c   : > { %v8176_v3 = vadd.f32 %v8170_v55, %v8122_v51  ;;  %v8172_v9 = vpop.f32.mrb[238].mxu0 }
0x269d   : > { %v8187_v5 = vadd.f32 %v8185_v7, %v8175_v49  ;;  %v8173_v56 = vpop.f32.mrb[239].mxu0 }
0x269e   : > { %v8188_v6 = vadd.f32 %v8185_v7, %v8176_v3 }
0x269f   : > { %v8189_v58 = vsub.f32 0.0, %v8187_v5 }
0x26a0   : > { %v8190_v8 = vsub.f32 0.0, %v8188_v6 }
0x26a1   : > { %v8191_v59 = vmul.f32 1.442695, %v8189_v58 }
0x26a2   : > { %v8193_v60 = vmul.f32 1.442695, %v8190_v8 }
0x26a3   : > { %10341 = vpow2.f32 %v8191_v59 }
0x26a4   : > { %10343 = vpow2.f32 %v8193_v60 }
0x26ad   : > { %v10342_v10 = vpop.eup %10341 }
0x26ae   : > { %v10344_v11 = vpop.eup %10343  ;;  %v8195_v54 = vadd.f32 1.0, %v10342_v10 }
0x26af   : > { %v8196_v12 = vadd.f32 1.0, %v10344_v11 }
0x26b0   : > { %10345 = vrcp.f32 %v8195_v54 }
0x26b1   : > { %10347 = vrcp.f32 %v8196_v12 }
0x26ba   : > { %v10346_v52 = vpop.eup %10345 }
0x26bb   : > { %v10348_v61 = vpop.eup %10347 }
0x26bc   : > { %v8203_v15 = vcombine.low %v10346_v52, %v10348_v61 }
0x26be   : > { %8207 = vst.msk [vmem:[%s747_s5] sm:$0xff] %vm8206_vm4, %v8203_v15 }
0x26bf PF: > { %s37_s27 = sadd.s32 1, %s10355_s27  }
0x26c0   : > { %p34_p4 = scmp.ge.s32.totalorder %s37_s27, 4  }
0x26c2   :  { %36 = sbr.rel (!%p34_p4) target bundleno = 10 (0xa), region = 223 }

</bundles_post_ra>
